<compile_context>
chip_gen: v7x
topology: tpu7x:2x2x1
jax: 0.10.0
libtpu: 0.0.40
codegen_flags: <defaults>
</compile_context>

<pallas_src>
import functools

import jax
import jax.numpy as jnp
from jax.experimental import pallas as pl
from jax.experimental.pallas import tpu as pltpu

EPS = 1e-5          # nn.BatchNorm2d default eps
LANE = 128          # pad channel dims to multiples of the TPU lane width

_VMEM_LIMIT = 32 * 1024 * 1024
_CPARAMS_1D = pltpu.CompilerParams(dimension_semantics=("parallel",),
                                   vmem_limit_bytes=_VMEM_LIMIT)
_CPARAMS_2D = pltpu.CompilerParams(dimension_semantics=("parallel", "parallel"),
                                   vmem_limit_bytes=_VMEM_LIMIT)


def _round_up(x, m):
    return ((x + m - 1) // m) * m


def _pick_tile_m(m, target):
    """Tile for the flat M = N*H*W axis.  Prefer an exact multiple-of-16 divisor of m
    that leaves >= 2 grid steps (megacore); otherwise fall back to a fixed tile and
    zero-pad the rows (the padded rows are masked out of the BN statistics)."""
    target = max(16, (target // 16) * 16)
    cap = min(target, max(16, ((m // 2) // 16) * 16))
    for t in range(cap, 15, -16):
        if m % t == 0:
            return t
    if m <= target and m % 16 == 0:
        return m                       # tiny m: single full block
    return cap                         # rows will be zero-padded to a multiple of cap


def _pick_tile_h(n, h, w, target_rows=256):
    """Output rows of the 3x3 conv computed per grid step (matmul M = th * w)."""
    best = 1
    for th in range(1, h + 1):
        if h % th:
            continue
        if th * w > max(target_rows, w):         # keep the block modest
            continue
        if th > 1 and n * (h // th) < 2:         # keep >= 2 grid steps for megacore
            continue
        best = th
    return best


# --------------------------- Pallas kernel bodies --------------------------- #
def _masked_stats(y, m_true):
    """(2, C) = [sum, sum-of-squares] over rows, ignoring zero-padded rows."""
    ys = y
    if m_true is not None:
        row = (pl.program_id(0) * y.shape[0]
               + jax.lax.broadcasted_iota(jnp.int32, (y.shape[0], 1), 0))
        ys = jnp.where(row < m_true, y, 0.0)
    return jnp.concatenate([jnp.sum(ys, axis=0, keepdims=True),
                            jnp.sum(ys * ys, axis=0, keepdims=True)], axis=0)


def _mm_stats_kernel(x_ref, w_ref, y_ref, st_ref, *, m_true):
    """y = x @ w (bf16 MXU inputs, f32 acc); emit per-tile (sum, sumsq); store bf16."""
    y = jnp.dot(x_ref[...], w_ref[...], preferred_element_type=jnp.float32)
    y_ref[...] = y.astype(y_ref.dtype)
    st_ref[0] = _masked_stats(y, m_true)


def _affine_relu_mm_stats_kernel(x_ref, scale_ref, shift_ref, w_ref, y_ref, st_ref,
                                 *, m_true):
    """Fused [previous-stage BN-affine + ReLU] -> 1x1 conv -> per-tile stats."""
    a = jnp.maximum(x_ref[...].astype(jnp.float32) * scale_ref[...] + shift_ref[...],
                    0.0)
    y = jnp.dot(a.astype(jnp.bfloat16), w_ref[...],
                preferred_element_type=jnp.float32)
    y_ref[...] = y.astype(y_ref.dtype)
    st_ref[0] = _masked_stats(y, m_true)


def _conv3x3_block_kernel(img_ref, scale_ref, shift_ref, w_ref, y_ref, st_ref):
    """A TH-row block of a 3x3 / stride-1 / pad-1 conv.  The previous stage's
    BN-affine + ReLU is fused into the input load; the spatial halo is rebuilt
    in-register (clamped dynamic row slices + masks, zero columns for the W halo).
    The conv is accumulated as 3 matmuls of (TH*W, 3*Cin) x (3*Cin, Cout) -- the
    three kw taps are concatenated along K to fill the MXU depth."""
    h = img_ref.shape[1]
    w = img_ref.shape[2]
    cin = img_ref.shape[3]
    th = y_ref.shape[1]
    cout = y_ref.shape[3]

    r = pl.program_id(1)
    row0 = r * th

    scale = scale_ref[...].reshape(1, 1, cin)
    shift = shift_ref[...].reshape(1, 1, cin)

    def act(raw):                                 # fused BN-affine + ReLU (f32)
        return jnp.maximum(raw.astype(jnp.float32) * scale + shift, 0.0)

    main = act(img_ref[0, pl.ds(row0, th)]).astype(jnp.bfloat16)        # (th, w, cin)
    top_ok = (row0 > 0).astype(jnp.float32)
    bot_ok = (row0 + th < h).astype(jnp.float32)
    top = (act(img_ref[0, pl.ds(jnp.maximum(row0 - 1, 0), 1)]) * top_ok
           ).astype(jnp.bfloat16)                                       # (1, w, cin)
    bot = (act(img_ref[0, pl.ds(jnp.minimum(row0 + th, h - 1), 1)]) * bot_ok
           ).astype(jnp.bfloat16)

    rows_kh = (
        jnp.concatenate([top, main], axis=0)[:th],          # kh=0 -> input row i-1
        main,                                               # kh=1 -> input row i
        jnp.concatenate([main, bot], axis=0)[1:th + 1],     # kh=2 -> input row i+1
    )

    zcol = jnp.zeros((th, 1, cin), jnp.bfloat16)
    acc = jnp.zeros((th * w, cout), jnp.float32)
    for kh in range(3):
        a = rows_kh[kh]
        op = jnp.concatenate(
            [jnp.concatenate([zcol, a[:, :w - 1]], axis=1),  # kw=0 -> input col x-1
             a,                                              # kw=1 -> input col x
             jnp.concatenate([a[:, 1:], zcol], axis=1)],     # kw=2 -> input col x+1
            axis=-1).reshape(th * w, 3 * cin)
        acc = acc + jnp.dot(op, w_ref[kh], preferred_element_type=jnp.float32)

    y_ref[0] = acc.reshape(th, w, cout).astype(y_ref.dtype)
    st_ref[0, 0] = jnp.concatenate(
        [jnp.sum(acc, axis=0, keepdims=True),
         jnp.sum(acc * acc, axis=0, keepdims=True)], axis=0)


def _affine_add_relu_kernel(y_ref, scale_ref, shift_ref, res_ref, o_ref):
    """Final BN-affine + residual add + ReLU (f32 output)."""
    o_ref[...] = jnp.maximum(
        y_ref[...].astype(jnp.float32) * scale_ref[...] + shift_ref[...]
        + res_ref[...].astype(jnp.float32), 0.0)


# ---------------------------- pallas_call wrappers --------------------------- #
def _conv1x1_stats(x2d, w_p, scale=None, shift=None, *, tile_m, m_true=None):
    """x2d: (M_pad, Kp) bf16, w_p: (Kp, Cp) bf16 -> raw conv out (M_pad, Cp) bf16
    + per-tile (sum, sumsq) stats (T, 2, Cp) f32."""
    m_pad, kp = x2d.shape
    cp = w_p.shape[1]
    t = m_pad // tile_m
    x_spec = pl.BlockSpec((tile_m, kp), lambda i: (i, 0))
    w_spec = pl.BlockSpec((kp, cp), lambda i: (0, 0))
    vec_spec = pl.BlockSpec((1, kp), lambda i: (0, 0))
    y_spec = pl.BlockSpec((tile_m, cp), lambda i: (i, 0))
    st_spec = pl.BlockSpec((1, 2, cp), lambda i: (i, 0, 0))
    out_shape = (jax.ShapeDtypeStruct((m_pad, cp), jnp.bfloat16),
                 jax.ShapeDtypeStruct((t, 2, cp), jnp.float32))
    cost = pl.CostEstimate(flops=2 * m_pad * kp * cp, transcendentals=0,
                           bytes_accessed=2 * m_pad * (kp + cp) + 2 * kp * cp)
    if scale is None:
        return pl.pallas_call(
            functools.partial(_mm_stats_kernel, m_true=m_true),
            out_shape=out_shape, grid=(t,),
            in_specs=[x_spec, w_spec], out_specs=(y_spec, st_spec),
            compiler_params=_CPARAMS_1D, cost_estimate=cost,
        )(x2d, w_p)
    return pl.pallas_call(
        functools.partial(_affine_relu_mm_stats_kernel, m_true=m_true),
        out_shape=out_shape, grid=(t,),
        in_specs=[x_spec, vec_spec, vec_spec, w_spec], out_specs=(y_spec, st_spec),
        compiler_params=_CPARAMS_1D, cost_estimate=cost,
    )(x2d, scale, shift, w_p)


def _conv3x3_stats(y_prev, scale, shift, w3g, *, th):
    """y_prev: (N, H, W, Cin) bf16 raw previous conv output (unpadded spatially);
    previous-stage BN-affine + ReLU fused in-kernel.  Grid = (N, H // th); the full
    image block has a per-image-constant index_map so it is DMA'd once per image."""
    n, h, w, cin = y_prev.shape
    cout = w3g.shape[2]
    rb = h // th
    img_spec = pl.BlockSpec((1, h, w, cin), lambda b, r: (b, 0, 0, 0))
    vec_spec = pl.BlockSpec((1, cin), lambda b, r: (0, 0))
    w_spec = pl.BlockSpec((3, 3 * cin, cout), lambda b, r: (0, 0, 0))
    y_spec = pl.BlockSpec((1, th, w, cout), lambda b, r: (b, r, 0, 0))
    st_spec = pl.BlockSpec((1, 1, 2, cout), lambda b, r: (b, r, 0, 0))
    out_shape = (jax.ShapeDtypeStruct((n, h, w, cout), jnp.bfloat16),
                 jax.ShapeDtypeStruct((n, rb, 2, cout), jnp.float32))
    cost = pl.CostEstimate(flops=2 * 9 * n * h * w * cin * cout, transcendentals=0,
                           bytes_accessed=2 * n * h * w * (cin + cout)
                                          + 2 * 9 * cin * cout)
    return pl.pallas_call(
        _conv3x3_block_kernel, out_shape=out_shape, grid=(n, rb),
        in_specs=[img_spec, vec_spec, vec_spec, w_spec],
        out_specs=(y_spec, st_spec),
        compiler_params=_CPARAMS_2D, cost_estimate=cost,
    )(y_prev, scale, shift, w3g)


def _affine_add_relu(y, scale, shift, res, *, tile_m):
    m_pad, cp = y.shape
    t = m_pad // tile_m
    tile_spec = pl.BlockSpec((tile_m, cp), lambda i: (i, 0))
    vec_spec = pl.BlockSpec((1, cp), lambda i: (0, 0))
    return pl.pallas_call(
        _affine_add_relu_kernel,
        out_shape=jax.ShapeDtypeStruct((m_pad, cp), jnp.float32),
        grid=(t,),
        in_specs=[tile_spec, vec_spec, vec_spec, tile_spec], out_specs=tile_spec,
        compiler_params=_CPARAMS_1D,
        cost_estimate=pl.CostEstimate(flops=3 * m_pad * cp, transcendentals=0,
                                      bytes_accessed=8 * m_pad * cp),
    )(y, scale, shift, res)


# --------------------------------- JAX glue ---------------------------------- #
def _w1x1_to_mat(w, kp, cp):
    mat = jnp.transpose(w[:, :, 0, 0], (1, 0))                          # (Cin, Cout)
    mat = jnp.pad(mat, ((0, kp - mat.shape[0]), (0, cp - mat.shape[1])))
    return mat.astype(jnp.bfloat16)


def _w3x3_to_kgroups(w, cin_p, cout_p):
    """(Cout, Cin, 3, 3) -> (3, 3*Cin_p, Cout_p): per kh, the three kw taps are
    concatenated along K (matches the kernel's [col x-1 | col x | col x+1] operand)."""
    cout, cin = w.shape[0], w.shape[1]
    t = jnp.transpose(w, (2, 3, 1, 0))                                  # (kh, kw, Cin, Cout)
    t = jnp.pad(t, ((0, 0), (0, 0), (0, cin_p - cin), (0, cout_p - cout)))
    return t.reshape(3, 3 * cin_p, cout_p).astype(jnp.bfloat16)


def _pad_vec(v, cp):
    return jnp.pad(v.astype(jnp.float32), (0, cp - v.shape[0]))


def _stats_to_affine(stats, count, gamma_p, beta_p):
    """Reduce per-tile (sum, sumsq) partials -> BN affine (scale, shift), f32."""
    s = jnp.sum(stats.reshape(-1, 2, stats.shape[-1]), axis=0)          # (2, Cp)
    mean = s[0] / count
    var = jnp.maximum(s[1] / count - mean * mean, 0.0)                  # biased var (train-mode BN)
    scale = gamma_p * jax.lax.rsqrt(var + EPS)
    shift = beta_p - mean * scale
    return scale.reshape(1, -1), shift.reshape(1, -1)


@functools.partial(jax.jit, static_argnames=("tile_m_target",))
def bottleneck2_forward(x_nchw, params, *, tile_m_target=1024):
    """Bottleneck_2.forward (stride=1, downsample=None), NCHW in / NCHW out."""
    n, cin, h, w = x_nchw.shape
    planes = params["w1"].shape[0]
    cexp = 4 * planes
    assert cin == cexp, "residual add requires inplanes == 4 * planes (downsample=None)"

    cin_p = _round_up(cin, LANE)
    cpl_p = _round_up(planes, LANE)
    cexp_p = _round_up(cexp, LANE)
    m = n * h * w
    tile_m = _pick_tile_m(m, tile_m_target)
    m_pad = _round_up(m, tile_m)
    m_true = None if m_pad == m else m
    th = _pick_tile_h(n, h, w)

    # TODO(synk): a production entry point should take/return NHWC to avoid these
    # two layout transposes (each is an extra HBM pass over the activation).
    x = jnp.transpose(x_nchw, (0, 2, 3, 1))                             # NHWC
    x2d = jnp.pad(x, ((0, 0), (0, 0), (0, 0), (0, cin_p - cin))).reshape(m, cin_p)
    x2d = jnp.pad(x2d, ((0, m_pad - m), (0, 0))).astype(jnp.bfloat16)   # bf16 storage

    w1 = _w1x1_to_mat(params["w1"], cin_p, cpl_p)
    w2 = _w3x3_to_kgroups(params["w2"], cpl_p, cpl_p)
    w3 = _w3x3_to_kgroups(params["w3"], cpl_p, cpl_p)
    w4 = _w1x1_to_mat(params["w4"], cpl_p, cexp_p)
    g1, b1 = _pad_vec(params["g1"], cpl_p), _pad_vec(params["b1"], cpl_p)
    g2, b2 = _pad_vec(params["g2"], cpl_p), _pad_vec(params["b2"], cpl_p)
    g3, b3 = _pad_vec(params["g3"], cpl_p), _pad_vec(params["b3"], cpl_p)
    g4, b4 = _pad_vec(params["g4"], cexp_p), _pad_vec(params["b4"], cexp_p)

    # stage 1: conv1 (1x1) -> raw y1 (bf16) + batch stats
    y1, st1 = _conv1x1_stats(x2d, w1, tile_m=tile_m, m_true=m_true)
    s1, t1 = _stats_to_affine(st1, m, g1, b1)

    # stage 2: [bn1+relu fused in-kernel] -> conv2 (3x3, pad=1) -> y2 + stats
    y1img = y1[:m].reshape(n, h, w, cpl_p)
    y2, st2 = _conv3x3_stats(y1img, s1, t1, w2, th=th)
    s2, t2 = _stats_to_affine(st2, m, g2, b2)

    # stage 3: [bn2+relu] -> conv3 (3x3, pad=1) -> y3 + stats
    y3, st3 = _conv3x3_stats(y2, s2, t2, w3, th=th)
    s3, t3 = _stats_to_affine(st3, m, g3, b3)

    # stage 4: [bn3+relu] -> conv4 (1x1, expansion) -> y4 + stats
    y3f = y3.reshape(m, cpl_p)
    if m_pad != m:
        y3f = jnp.pad(y3f, ((0, m_pad - m), (0, 0)))
    y4, st4 = _conv1x1_stats(y3f, w4, s3, t3, tile_m=tile_m, m_true=m_true)
    s4, t4 = _stats_to_affine(st4, m, g4, b4)

    # final: bn4 affine + residual add + relu   (identity == x, cin == 4*planes)
    out = _affine_add_relu(y4, s4, t4, x2d, tile_m=tile_m)
    out = out[:m].reshape(n, h, w, cexp_p)[..., :cexp]
    return jnp.transpose(out, (0, 3, 1, 2))                             # back to NCHW


# ---------------------- pure-JAX reference (same math path) ------------------ #
def _ref_stage_affine(y_f32, g, b, count, cp):
    s = jnp.sum(y_f32, axis=0)
    sq = jnp.sum(y_f32 * y_f32, axis=0)
    mean = s / count
    var = jnp.maximum(sq / count - mean * mean, 0.0)
    scale = _pad_vec(g, cp) * jax.lax.rsqrt(var + EPS)
    shift = _pad_vec(b, cp) - mean * scale
    return scale, shift


def _ref_im2col(a_nhwc):
    """(N,H,W,C) -> (N*H*W, 9*C) with (kh, kw, c) column order (matches kernel)."""
    n, h, w, c = a_nhwc.shape
    ap = jnp.pad(a_nhwc, ((0, 0), (1, 1), (1, 1), (0, 0)))
    cols = [ap[:, dy:dy + h, dx:dx + w, :] for dy in range(3) for dx in range(3)]
    return jnp.concatenate(cols, axis=-1).reshape(n * h * w, 9 * c)


def bottleneck2_reference(x_nchw, params):
    """Mirrors the kernel's numerics (bf16 MXU inputs + bf16 activation storage,
    f32 accumulation / statistics) using plain XLA ops."""
    n, cin, h, w = x_nchw.shape
    planes = params["w1"].shape[0]
    cexp = 4 * planes
    cin_p = _round_up(cin, LANE)
    cpl_p = _round_up(planes, LANE)
    cexp_p = _round_up(cexp, LANE)
    m = n * h * w

    x = jnp.transpose(x_nchw, (0, 2, 3, 1))
    x2d = jnp.pad(x, ((0, 0), (0, 0), (0, 0), (0, cin_p - cin))
                  ).reshape(m, cin_p).astype(jnp.bfloat16)

    w1 = _w1x1_to_mat(params["w1"], cin_p, cpl_p)
    w2 = _w3x3_to_kgroups(params["w2"], cpl_p, cpl_p).reshape(9 * cpl_p, cpl_p)
    w3 = _w3x3_to_kgroups(params["w3"], cpl_p, cpl_p).reshape(9 * cpl_p, cpl_p)
    w4 = _w1x1_to_mat(params["w4"], cpl_p, cexp_p)

    def affine_relu_bf16(y_b, scale, shift):
        return jnp.maximum(y_b.astype(jnp.float32) * scale + shift,
                           0.0).astype(jnp.bfloat16)

    y1 = jnp.dot(x2d, w1, preferred_element_type=jnp.float32)
    s1, t1 = _ref_stage_affine(y1, params["g1"], params["b1"], m, cpl_p)
    a1 = affine_relu_bf16(y1.astype(jnp.bfloat16), s1, t1).reshape(n, h, w, cpl_p)

    y2 = jnp.dot(_ref_im2col(a1), w2, preferred_element_type=jnp.float32)
    s2, t2 = _ref_stage_affine(y2, params["g2"], params["b2"], m, cpl_p)
    a2 = affine_relu_bf16(y2.astype(jnp.bfloat16), s2, t2).reshape(n, h, w, cpl_p)

    y3 = jnp.dot(_ref_im2col(a2), w3, preferred_element_type=jnp.float32)
    s3, t3 = _ref_stage_affine(y3, params["g3"], params["b3"], m, cpl_p)
    a3 = affine_relu_bf16(y3.astype(jnp.bfloat16), s3, t3)

    y4 = jnp.dot(a3, w4, preferred_element_type=jnp.float32)
    s4, t4 = _ref_stage_affine(y4, params["g4"], params["b4"], m, cexp_p)
    out = jnp.maximum(y4.astype(jnp.bfloat16).astype(jnp.float32) * s4 + t4
                      + x2d.astype(jnp.float32), 0.0)
    out = out.reshape(n, h, w, cexp_p)[..., :cexp]
    return jnp.transpose(out, (0, 3, 1, 2))


# ----------------------------------- main ------------------------------------ #
if __name__ == "__main__":
    # 4*planes == inplanes so the residual add is well-typed (downsample=None).
    N, INPLANES, PLANES, H, W = 2, 16, 4, 16, 16

    key = jax.random.PRNGKey(0)
    ks = jax.random.split(key, 13)
    f32 = jnp.float32
    params = {
        "w1": 0.1 * jax.random.normal(ks[0], (PLANES, INPLANES, 1, 1), f32),
        "w2": 0.1 * jax.random.normal(ks[1], (PLANES, PLANES, 3, 3), f32),
        "w3": 0.1 * jax.random.normal(ks[2], (PLANES, PLANES, 3, 3), f32),
        "w4": 0.1 * jax.random.normal(ks[3], (4 * PLANES, PLANES, 1, 1), f32),
        "g1": 1.0 + 0.1 * jax.random.normal(ks[4], (PLANES,), f32),
        "b1": 0.1 * jax.random.normal(ks[5], (PLANES,), f32),
        "g2": 1.0 + 0.1 * jax.random.normal(ks[6], (PLANES,), f32),
        "b2": 0.1 * jax.random.normal(ks[7], (PLANES,), f32),
        "g3": 1.0 + 0.1 * jax.random.normal(ks[8], (PLANES,), f32),
        "b3": 0.1 * jax.random.normal(ks[9], (PLANES,), f32),
        "g4": 1.0 + 0.1 * jax.random.normal(ks[10], (4 * PLANES,), f32),
        "b4": 0.1 * jax.random.normal(ks[11], (4 * PLANES,), f32),
    }
    x = jax.random.normal(ks[12], (N, INPLANES, H, W), f32)   # NCHW, PyTorch layout

    ref = jax.block_until_ready(bottleneck2_reference(x, params))
    # default (large) row tiles, plus a forced small-tile run that exercises the
    # multi-tile partial-stats -> global BN reduction path.
    out = jax.block_until_ready(bottleneck2_forward(x, params))
    out_tiled = jax.block_until_ready(bottleneck2_forward(x, params, tile_m_target=64))

    assert out.shape == (N, 4 * PLANES, H, W), out.shape
    err = float(jnp.max(jnp.abs(out - ref)))
    err_t = float(jnp.max(jnp.abs(out_tiled - ref)))
    # bf16 MXU inputs + bf16 intermediate storage (mirrored in the reference)
    assert jnp.allclose(out, ref, atol=1e-2, rtol=1e-2), err
    assert jnp.allclose(out_tiled, ref, atol=1e-2, rtol=1e-2), err_t

    print("KERNEL_OK")
</pallas_src>

<mosaic_0001>
module attributes {stable_mosaic.version = 11 : i64} {
  func.func @_mm_stats_kernel(%arg0: i32, %arg1: memref<256x128xbf16, #tpu.memory_space<vmem>>, %arg2: memref<128x128xbf16, #tpu.memory_space<vmem>>, %arg3: memref<256x128xbf16, #tpu.memory_space<vmem>>, %arg4: memref<1x2x128xf32, #tpu.memory_space<vmem>>) attributes {dimension_semantics = [#tpu.dimension_semantics<parallel>], iteration_bounds = array<i64: 2>, scalar_prefetch = 0 : i64, scratch_operands = 0 : i64, tpu.core_type = #tpu.core_type<tc>, window_params = [{transform_indices = @transform_0, window_bounds = array<i64: 256, 128>}, {pipeline_mode = #tpu.pipeline_mode<synchronous>, transform_indices = @transform_1, window_bounds = array<i64: 128, 128>}, {transform_indices = @transform_2, window_bounds = array<i64: 256, 128>}, {transform_indices = @transform_3, window_bounds = array<i64: 1, 2, 128>}]} {
    %c0 = arith.constant 0 : index
    %c0_0 = arith.constant 0 : index
    %0 = vector.load %arg1[%c0, %c0_0] : memref<256x128xbf16, #tpu.memory_space<vmem>>, vector<256x128xbf16>
    %c0_1 = arith.constant 0 : index
    %c0_2 = arith.constant 0 : index
    %1 = vector.load %arg2[%c0_1, %c0_2] : memref<128x128xbf16, #tpu.memory_space<vmem>>, vector<128x128xbf16>
    %cst = arith.constant dense<0.000000e+00> : vector<256x128xf32>
    %2 = tpu.matmul %0, %1, %cst {dimension_numbers = #tpu.dot_dimension_numbers<[1], [0], [0], [1], [0, 0, 1, 1], [], []>} : vector<256x128xbf16>, vector<128x128xbf16>, vector<256x128xf32> -> vector<256x128xf32>
    %3 = arith.truncf %2 : vector<256x128xf32> to vector<256x128xbf16>
    %c0_3 = arith.constant 0 : index
    %c0_4 = arith.constant 0 : index
    %4 = vector.load %arg3[%c0_3, %c0_4] : memref<256x128xbf16, #tpu.memory_space<vmem>>, vector<256x128xbf16>
    tpu.vector_store %arg3[%c0_3, %c0_4], %3 {strides = array<i32>} : memref<256x128xbf16, #tpu.memory_space<vmem>>, vector<256x128xbf16>,
    %cst_5 = arith.constant dense<0.000000e+00> : vector<128xf32>
    %5 = vector.multi_reduction <add>, %2, %cst_5 [0] : vector<256x128xf32> to vector<128xf32>
    %6 = vector.shape_cast %5 : vector<128xf32> to vector<1x128xf32>
    %7 = arith.mulf %2, %2 : vector<256x128xf32>
    %cst_6 = arith.constant dense<0.000000e+00> : vector<128xf32>
    %8 = vector.multi_reduction <add>, %7, %cst_6 [0] : vector<256x128xf32> to vector<128xf32>
    %9 = vector.shape_cast %8 : vector<128xf32> to vector<1x128xf32>
    %10 = tpu.concatenate %6, %9 in 0 : vector<1x128xf32>, vector<1x128xf32> -> vector<2x128xf32>
    %c0_7 = arith.constant 0 : index
    %c0_8 = arith.constant 0 : index
    %c0_9 = arith.constant 0 : index
    %11 = vector.load %arg4[%c0_7, %c0_8, %c0_9] : memref<1x2x128xf32, #tpu.memory_space<vmem>>, vector<1x2x128xf32>
    %12 = vector.shape_cast %11 : vector<1x2x128xf32> to vector<2x128xf32>
    %13 = vector.shape_cast %10 : vector<2x128xf32> to vector<1x2x128xf32>
    tpu.vector_store %arg4[%c0_7, %c0_8, %c0_9], %13 {strides = array<i32>} : memref<1x2x128xf32, #tpu.memory_space<vmem>>, vector<1x2x128xf32>,
    return
  }
  func.func @transform_0(%arg0: i32) -> (i32, i32) {
    %c0_i32 = arith.constant 0 : i32
    %c0_i32_0 = arith.constant 0 : i32
    return %arg0, %c0_i32 : i32, i32
  }
  func.func @transform_1(%arg0: i32) -> (i32, i32) {
    %c0_i32 = arith.constant 0 : i32
    %c0_i32_0 = arith.constant 0 : i32
    %c0_i32_1 = arith.constant 0 : i32
    return %c0_i32, %c0_i32_0 : i32, i32
  }
  func.func @transform_2(%arg0: i32) -> (i32, i32) {
    %c0_i32 = arith.constant 0 : i32
    %c0_i32_0 = arith.constant 0 : i32
    return %arg0, %c0_i32 : i32, i32
  }
  func.func @transform_3(%arg0: i32) -> (i32, i32, i32) {
    %c0_i32 = arith.constant 0 : i32
    %c0_i32_0 = arith.constant 0 : i32
    %c0_i32_1 = arith.constant 0 : i32
    return %arg0, %c0_i32, %c0_i32_0 : i32, i32, i32
  }
}

module attributes {stable_mosaic.version = 11 : i64} {
  func.func @_conv3x3_block_kernel(%arg0: i32, %arg1: i32, %arg2: memref<1x16x16x128xbf16, #tpu.memory_space<vmem>>, %arg3: memref<1x128xf32, #tpu.memory_space<vmem>>, %arg4: memref<1x128xf32, #tpu.memory_space<vmem>>, %arg5: memref<3x384x128xbf16, #tpu.memory_space<vmem>>, %arg6: memref<1x16x16x128xbf16, #tpu.memory_space<vmem>>, %arg7: memref<1x1x2x128xf32, #tpu.memory_space<vmem>>) attributes {dimension_semantics = [#tpu.dimension_semantics<parallel>, #tpu.dimension_semantics<parallel>], iteration_bounds = array<i64: 2, 1>, scalar_prefetch = 0 : i64, scratch_operands = 0 : i64, tpu.core_type = #tpu.core_type<tc>, window_params = [{transform_indices = @transform_0, window_bounds = array<i64: 1, 16, 16, 128>}, {pipeline_mode = #tpu.pipeline_mode<synchronous>, transform_indices = @transform_1, window_bounds = array<i64: 1, 128>}, {pipeline_mode = #tpu.pipeline_mode<synchronous>, transform_indices = @transform_2, window_bounds = array<i64: 1, 128>}, {pipeline_mode = #tpu.pipeline_mode<synchronous>, transform_indices = @transform_3, window_bounds = array<i64: 3, 384, 128>}, {transform_indices = @transform_4, window_bounds = array<i64: 1, 16, 16, 128>}, {transform_indices = @transform_5, window_bounds = array<i64: 1, 1, 2, 128>}]} {
    %c16_i32 = arith.constant 16 : i32
    %0 = arith.muli %arg1, %c16_i32 : i32
    %c0 = arith.constant 0 : index
    %c0_0 = arith.constant 0 : index
    %1 = vector.load %arg3[%c0, %c0_0] : memref<1x128xf32, #tpu.memory_space<vmem>>, vector<1x128xf32>
    %2 = vector.shape_cast %1 : vector<1x128xf32> to vector<1x1x128xf32>
    %c0_1 = arith.constant 0 : index
    %c0_2 = arith.constant 0 : index
    %3 = vector.load %arg4[%c0_1, %c0_2] : memref<1x128xf32, #tpu.memory_space<vmem>>, vector<1x128xf32>
    %4 = vector.shape_cast %3 : vector<1x128xf32> to vector<1x1x128xf32>
    %c0_3 = arith.constant 0 : index
    %5 = arith.index_cast %0 : i32 to index
    %c0_4 = arith.constant 0 : index
    %c0_5 = arith.constant 0 : index
    %6 = vector.load %arg2[%c0_3, %5, %c0_4, %c0_5] : memref<1x16x16x128xbf16, #tpu.memory_space<vmem>>, vector<1x16x16x128xbf16>
    %7 = vector.shape_cast %6 : vector<1x16x16x128xbf16> to vector<16x16x128xbf16>
    %8 = arith.extf %7 : vector<16x16x128xbf16> to vector<16x16x128xf32>
    %9 = vector.broadcast %2 : vector<1x1x128xf32> to vector<16x16x128xf32>
    %10 = arith.mulf %8, %9 : vector<16x16x128xf32>
    %11 = vector.broadcast %4 : vector<1x1x128xf32> to vector<16x16x128xf32>
    %12 = arith.addf %10, %11 : vector<16x16x128xf32>
    %cst = arith.constant 0.000000e+00 : f32
    %13 = vector.broadcast %cst : f32 to vector<16x16x128xf32>
    %14 = arith.maximumf %12, %13 : vector<16x16x128xf32>
    %15 = arith.truncf %14 : vector<16x16x128xf32> to vector<16x16x128xbf16>
    %c0_i32 = arith.constant 0 : i32
    %16 = arith.cmpi sgt, %0, %c0_i32 : i32
    %17 = arith.extui %16 : i1 to i32
    %18 = arith.sitofp %17 : i32 to f32
    %c16_i32_6 = arith.constant 16 : i32
    %19 = arith.addi %0, %c16_i32_6 : i32
    %c16_i32_7 = arith.constant 16 : i32
    %20 = arith.cmpi slt, %19, %c16_i32_7 : i32
    %21 = arith.extui %20 : i1 to i32
    %22 = arith.sitofp %21 : i32 to f32
    %c1_i32 = arith.constant 1 : i32
    %23 = arith.subi %0, %c1_i32 : i32
    %c0_i32_8 = arith.constant 0 : i32
    %24 = arith.maxsi %23, %c0_i32_8 : i32
    %c0_9 = arith.constant 0 : index
    %25 = arith.index_cast %24 : i32 to index
    %c0_10 = arith.constant 0 : index
    %c0_11 = arith.constant 0 : index
    %26 = vector.load %arg2[%c0_9, %25, %c0_10, %c0_11] : memref<1x16x16x128xbf16, #tpu.memory_space<vmem>>, vector<1x1x16x128xbf16>
    %27 = vector.shape_cast %26 : vector<1x1x16x128xbf16> to vector<1x16x128xbf16>
    %28 = arith.extf %27 : vector<1x16x128xbf16> to vector<1x16x128xf32>
    %29 = vector.broadcast %2 : vector<1x1x128xf32> to vector<1x16x128xf32>
    %30 = arith.mulf %28, %29 : vector<1x16x128xf32>
    %31 = vector.broadcast %4 : vector<1x1x128xf32> to vector<1x16x128xf32>
    %32 = arith.addf %30, %31 : vector<1x16x128xf32>
    %cst_12 = arith.constant 0.000000e+00 : f32
    %33 = vector.broadcast %cst_12 : f32 to vector<1x16x128xf32>
    %34 = arith.maximumf %32, %33 : vector<1x16x128xf32>
    %35 = vector.broadcast %18 : f32 to vector<1x16x128xf32>
    %36 = arith.mulf %34, %35 : vector<1x16x128xf32>
    %37 = arith.truncf %36 : vector<1x16x128xf32> to vector<1x16x128xbf16>
    %c16_i32_13 = arith.constant 16 : i32
    %38 = arith.addi %0, %c16_i32_13 : i32
    %c15_i32 = arith.constant 15 : i32
    %39 = arith.minsi %38, %c15_i32 : i32
    %c0_14 = arith.constant 0 : index
    %40 = arith.index_cast %39 : i32 to index
    %c0_15 = arith.constant 0 : index
    %c0_16 = arith.constant 0 : index
    %41 = vector.load %arg2[%c0_14, %40, %c0_15, %c0_16] : memref<1x16x16x128xbf16, #tpu.memory_space<vmem>>, vector<1x1x16x128xbf16>
    %42 = vector.shape_cast %41 : vector<1x1x16x128xbf16> to vector<1x16x128xbf16>
    %43 = arith.extf %42 : vector<1x16x128xbf16> to vector<1x16x128xf32>
    %44 = vector.broadcast %2 : vector<1x1x128xf32> to vector<1x16x128xf32>
    %45 = arith.mulf %43, %44 : vector<1x16x128xf32>
    %46 = vector.broadcast %4 : vector<1x1x128xf32> to vector<1x16x128xf32>
    %47 = arith.addf %45, %46 : vector<1x16x128xf32>
    %cst_17 = arith.constant 0.000000e+00 : f32
    %48 = vector.broadcast %cst_17 : f32 to vector<1x16x128xf32>
    %49 = arith.maximumf %47, %48 : vector<1x16x128xf32>
    %50 = vector.broadcast %22 : f32 to vector<1x16x128xf32>
    %51 = arith.mulf %49, %50 : vector<1x16x128xf32>
    %52 = arith.truncf %51 : vector<1x16x128xf32> to vector<1x16x128xbf16>
    %53 = tpu.concatenate %37, %15 in 0 : vector<1x16x128xbf16>, vector<16x16x128xbf16> -> vector<17x16x128xbf16>
    %54 = vector.extract_strided_slice %53 {offsets = [0, 0, 0], sizes = [16, 16, 128], strides = [1, 1, 1]} : vector<17x16x128xbf16> to vector<16x16x128xbf16>
    %55 = tpu.concatenate %15, %52 in 0 : vector<16x16x128xbf16>, vector<1x16x128xbf16> -> vector<17x16x128xbf16>
    %56 = vector.extract_strided_slice %55 {offsets = [1, 0, 0], sizes = [16, 16, 128], strides = [1, 1, 1]} : vector<17x16x128xbf16> to vector<16x16x128xbf16>
    %cst_18 = arith.constant 0.000000e+00 : bf16
    %57 = vector.broadcast %cst_18 : bf16 to vector<16x1x128xbf16>
    %cst_19 = arith.constant 0.000000e+00 : f32
    %58 = vector.broadcast %cst_19 : f32 to vector<256x128xf32>
    %59 = vector.extract_strided_slice %54 {offsets = [0, 0, 0], sizes = [16, 15, 128], strides = [1, 1, 1]} : vector<16x16x128xbf16> to vector<16x15x128xbf16>
    %60 = tpu.concatenate %57, %59 in 1 : vector<16x1x128xbf16>, vector<16x15x128xbf16> -> vector<16x16x128xbf16>
    %61 = vector.extract_strided_slice %54 {offsets = [0, 1, 0], sizes = [16, 15, 128], strides = [1, 1, 1]} : vector<16x16x128xbf16> to vector<16x15x128xbf16>
    %62 = tpu.concatenate %61, %57 in 1 : vector<16x15x128xbf16>, vector<16x1x128xbf16> -> vector<16x16x128xbf16>
    %63 = tpu.concatenate %60, %54, %62 in 2 : vector<16x16x128xbf16>, vector<16x16x128xbf16>, vector<16x16x128xbf16> -> vector<16x16x384xbf16>
    %64 = vector.shape_cast %63 : vector<16x16x384xbf16> to vector<256x384xbf16>
    %c0_20 = arith.constant 0 : index
    %c0_21 = arith.constant 0 : index
    %c0_22 = arith.constant 0 : index
    %65 = vector.load %arg5[%c0_20, %c0_21, %c0_22] : memref<3x384x128xbf16, #tpu.memory_space<vmem>>, vector<1x384x128xbf16>
    %66 = vector.shape_cast %65 : vector<1x384x128xbf16> to vector<384x128xbf16>
    %cst_23 = arith.constant dense<0.000000e+00> : vector<256x128xf32>
    %67 = tpu.matmul %64, %66, %cst_23 {dimension_numbers = #tpu.dot_dimension_numbers<[1], [0], [0], [1], [0, 0, 1, 1], [], []>} : vector<256x384xbf16>, vector<384x128xbf16>, vector<256x128xf32> -> vector<256x128xf32>
    %68 = arith.addf %58, %67 : vector<256x128xf32>
    %69 = vector.extract_strided_slice %15 {offsets = [0, 0, 0], sizes = [16, 15, 128], strides = [1, 1, 1]} : vector<16x16x128xbf16> to vector<16x15x128xbf16>
    %70 = tpu.concatenate %57, %69 in 1 : vector<16x1x128xbf16>, vector<16x15x128xbf16> -> vector<16x16x128xbf16>
    %71 = vector.extract_strided_slice %15 {offsets = [0, 1, 0], sizes = [16, 15, 128], strides = [1, 1, 1]} : vector<16x16x128xbf16> to vector<16x15x128xbf16>
    %72 = tpu.concatenate %71, %57 in 1 : vector<16x15x128xbf16>, vector<16x1x128xbf16> -> vector<16x16x128xbf16>
    %73 = tpu.concatenate %70, %15, %72 in 2 : vector<16x16x128xbf16>, vector<16x16x128xbf16>, vector<16x16x128xbf16> -> vector<16x16x384xbf16>
    %74 = vector.shape_cast %73 : vector<16x16x384xbf16> to vector<256x384xbf16>
    %c1 = arith.constant 1 : index
    %c0_24 = arith.constant 0 : index
    %c0_25 = arith.constant 0 : index
    %75 = vector.load %arg5[%c1, %c0_24, %c0_25] : memref<3x384x128xbf16, #tpu.memory_space<vmem>>, vector<1x384x128xbf16>
    %76 = vector.shape_cast %75 : vector<1x384x128xbf16> to vector<384x128xbf16>
    %cst_26 = arith.constant dense<0.000000e+00> : vector<256x128xf32>
    %77 = tpu.matmul %74, %76, %cst_26 {dimension_numbers = #tpu.dot_dimension_numbers<[1], [0], [0], [1], [0, 0, 1, 1], [], []>} : vector<256x384xbf16>, vector<384x128xbf16>, vector<256x128xf32> -> vector<256x128xf32>
    %78 = arith.addf %68, %77 : vector<256x128xf32>
    %79 = vector.extract_strided_slice %56 {offsets = [0, 0, 0], sizes = [16, 15, 128], strides = [1, 1, 1]} : vector<16x16x128xbf16> to vector<16x15x128xbf16>
    %80 = tpu.concatenate %57, %79 in 1 : vector<16x1x128xbf16>, vector<16x15x128xbf16> -> vector<16x16x128xbf16>
    %81 = vector.extract_strided_slice %56 {offsets = [0, 1, 0], sizes = [16, 15, 128], strides = [1, 1, 1]} : vector<16x16x128xbf16> to vector<16x15x128xbf16>
    %82 = tpu.concatenate %81, %57 in 1 : vector<16x15x128xbf16>, vector<16x1x128xbf16> -> vector<16x16x128xbf16>
    %83 = tpu.concatenate %80, %56, %82 in 2 : vector<16x16x128xbf16>, vector<16x16x128xbf16>, vector<16x16x128xbf16> -> vector<16x16x384xbf16>
    %84 = vector.shape_cast %83 : vector<16x16x384xbf16> to vector<256x384xbf16>
    %c2 = arith.constant 2 : index
    %c0_27 = arith.constant 0 : index
    %c0_28 = arith.constant 0 : index
    %85 = vector.load %arg5[%c2, %c0_27, %c0_28] : memref<3x384x128xbf16, #tpu.memory_space<vmem>>, vector<1x384x128xbf16>
    %86 = vector.shape_cast %85 : vector<1x384x128xbf16> to vector<384x128xbf16>
    %cst_29 = arith.constant dense<0.000000e+00> : vector<256x128xf32>
    %87 = tpu.matmul %84, %86, %cst_29 {dimension_numbers = #tpu.dot_dimension_numbers<[1], [0], [0], [1], [0, 0, 1, 1], [], []>} : vector<256x384xbf16>, vector<384x128xbf16>, vector<256x128xf32> -> vector<256x128xf32>
    %88 = arith.addf %78, %87 : vector<256x128xf32>
    %89 = vector.shape_cast %88 : vector<256x128xf32> to vector<16x16x128xf32>
    %90 = arith.truncf %89 : vector<16x16x128xf32> to vector<16x16x128xbf16>
    %c0_30 = arith.constant 0 : index
    %c0_31 = arith.constant 0 : index
    %c0_32 = arith.constant 0 : index
    %c0_33 = arith.constant 0 : index
    %91 = vector.load %arg6[%c0_30, %c0_31, %c0_32, %c0_33] : memref<1x16x16x128xbf16, #tpu.memory_space<vmem>>, vector<1x16x16x128xbf16>
    %92 = vector.shape_cast %91 : vector<1x16x16x128xbf16> to vector<16x16x128xbf16>
    %93 = vector.shape_cast %90 : vector<16x16x128xbf16> to vector<1x16x16x128xbf16>
    tpu.vector_store %arg6[%c0_30, %c0_31, %c0_32, %c0_33], %93 {strides = array<i32>} : memref<1x16x16x128xbf16, #tpu.memory_space<vmem>>, vector<1x16x16x128xbf16>,
    %cst_34 = arith.constant dense<0.000000e+00> : vector<128xf32>
    %94 = vector.multi_reduction <add>, %88, %cst_34 [0] : vector<256x128xf32> to vector<128xf32>
    %95 = vector.shape_cast %94 : vector<128xf32> to vector<1x128xf32>
    %96 = arith.mulf %88, %88 : vector<256x128xf32>
    %cst_35 = arith.constant dense<0.000000e+00> : vector<128xf32>
    %97 = vector.multi_reduction <add>, %96, %cst_35 [0] : vector<256x128xf32> to vector<128xf32>
    %98 = vector.shape_cast %97 : vector<128xf32> to vector<1x128xf32>
    %99 = tpu.concatenate %95, %98 in 0 : vector<1x128xf32>, vector<1x128xf32> -> vector<2x128xf32>
    %c0_36 = arith.constant 0 : index
    %c0_37 = arith.constant 0 : index
    %c0_38 = arith.constant 0 : index
    %c0_39 = arith.constant 0 : index
    %100 = vector.load %arg7[%c0_36, %c0_37, %c0_38, %c0_39] : memref<1x1x2x128xf32, #tpu.memory_space<vmem>>, vector<1x1x2x128xf32>
    %101 = vector.shape_cast %100 : vector<1x1x2x128xf32> to vector<2x128xf32>
    %102 = vector.shape_cast %99 : vector<2x128xf32> to vector<1x1x2x128xf32>
    tpu.vector_store %arg7[%c0_36, %c0_37, %c0_38, %c0_39], %102 {strides = array<i32>} : memref<1x1x2x128xf32, #tpu.memory_space<vmem>>, vector<1x1x2x128xf32>,
    return
  }
  func.func @transform_0(%arg0: i32, %arg1: i32) -> (i32, i32, i32, i32) {
    %c0_i32 = arith.constant 0 : i32
    %c0_i32_0 = arith.constant 0 : i32
    %c0_i32_1 = arith.constant 0 : i32
    %c0_i32_2 = arith.constant 0 : i32
    return %arg0, %c0_i32, %c0_i32_0, %c0_i32_1 : i32, i32, i32, i32
  }
  func.func @transform_1(%arg0: i32, %arg1: i32) -> (i32, i32) {
    %c0_i32 = arith.constant 0 : i32
    %c0_i32_0 = arith.constant 0 : i32
    %c0_i32_1 = arith.constant 0 : i32
    return %c0_i32, %c0_i32_0 : i32, i32
  }
  func.func @transform_2(%arg0: i32, %arg1: i32) -> (i32, i32) {
    %c0_i32 = arith.constant 0 : i32
    %c0_i32_0 = arith.constant 0 : i32
    %c0_i32_1 = arith.constant 0 : i32
    return %c0_i32, %c0_i32_0 : i32, i32
  }
  func.func @transform_3(%arg0: i32, %arg1: i32) -> (i32, i32, i32) {
    %c0_i32 = arith.constant 0 : i32
    %c0_i32_0 = arith.constant 0 : i32
    %c0_i32_1 = arith.constant 0 : i32
    %c0_i32_2 = arith.constant 0 : i32
    return %c0_i32, %c0_i32_0, %c0_i32_1 : i32, i32, i32
  }
  func.func @transform_4(%arg0: i32, %arg1: i32) -> (i32, i32, i32, i32) {
    %c0_i32 = arith.constant 0 : i32
    %c0_i32_0 = arith.constant 0 : i32
    %c0_i32_1 = arith.constant 0 : i32
    return %arg0, %arg1, %c0_i32, %c0_i32_0 : i32, i32, i32, i32
  }
  func.func @transform_5(%arg0: i32, %arg1: i32) -> (i32, i32, i32, i32) {
    %c0_i32 = arith.constant 0 : i32
    %c0_i32_0 = arith.constant 0 : i32
    %c0_i32_1 = arith.constant 0 : i32
    return %arg0, %arg1, %c0_i32, %c0_i32_0 : i32, i32, i32, i32
  }
}

module attributes {stable_mosaic.version = 11 : i64} {
  func.func @_affine_relu_mm_stats_kernel(%arg0: i32, %arg1: memref<256x128xbf16, #tpu.memory_space<vmem>>, %arg2: memref<1x128xf32, #tpu.memory_space<vmem>>, %arg3: memref<1x128xf32, #tpu.memory_space<vmem>>, %arg4: memref<128x128xbf16, #tpu.memory_space<vmem>>, %arg5: memref<256x128xbf16, #tpu.memory_space<vmem>>, %arg6: memref<1x2x128xf32, #tpu.memory_space<vmem>>) attributes {dimension_semantics = [#tpu.dimension_semantics<parallel>], iteration_bounds = array<i64: 2>, scalar_prefetch = 0 : i64, scratch_operands = 0 : i64, tpu.core_type = #tpu.core_type<tc>, window_params = [{transform_indices = @transform_0, window_bounds = array<i64: 256, 128>}, {pipeline_mode = #tpu.pipeline_mode<synchronous>, transform_indices = @transform_1, window_bounds = array<i64: 1, 128>}, {pipeline_mode = #tpu.pipeline_mode<synchronous>, transform_indices = @transform_2, window_bounds = array<i64: 1, 128>}, {pipeline_mode = #tpu.pipeline_mode<synchronous>, transform_indices = @transform_3, window_bounds = array<i64: 128, 128>}, {transform_indices = @transform_4, window_bounds = array<i64: 256, 128>}, {transform_indices = @transform_5, window_bounds = array<i64: 1, 2, 128>}]} {
    %c0 = arith.constant 0 : index
    %c0_0 = arith.constant 0 : index
    %0 = vector.load %arg1[%c0, %c0_0] : memref<256x128xbf16, #tpu.memory_space<vmem>>, vector<256x128xbf16>
    %1 = arith.extf %0 : vector<256x128xbf16> to vector<256x128xf32>
    %c0_1 = arith.constant 0 : index
    %c0_2 = arith.constant 0 : index
    %2 = vector.load %arg2[%c0_1, %c0_2] : memref<1x128xf32, #tpu.memory_space<vmem>>, vector<1x128xf32>
    %3 = vector.broadcast %2 : vector<1x128xf32> to vector<256x128xf32>
    %4 = arith.mulf %1, %3 : vector<256x128xf32>
    %c0_3 = arith.constant 0 : index
    %c0_4 = arith.constant 0 : index
    %5 = vector.load %arg3[%c0_3, %c0_4] : memref<1x128xf32, #tpu.memory_space<vmem>>, vector<1x128xf32>
    %6 = vector.broadcast %5 : vector<1x128xf32> to vector<256x128xf32>
    %7 = arith.addf %4, %6 : vector<256x128xf32>
    %cst = arith.constant 0.000000e+00 : f32
    %8 = vector.broadcast %cst : f32 to vector<256x128xf32>
    %9 = arith.maximumf %7, %8 : vector<256x128xf32>
    %10 = arith.truncf %9 : vector<256x128xf32> to vector<256x128xbf16>
    %c0_5 = arith.constant 0 : index
    %c0_6 = arith.constant 0 : index
    %11 = vector.load %arg4[%c0_5, %c0_6] : memref<128x128xbf16, #tpu.memory_space<vmem>>, vector<128x128xbf16>
    %cst_7 = arith.constant dense<0.000000e+00> : vector<256x128xf32>
    %12 = tpu.matmul %10, %11, %cst_7 {dimension_numbers = #tpu.dot_dimension_numbers<[1], [0], [0], [1], [0, 0, 1, 1], [], []>} : vector<256x128xbf16>, vector<128x128xbf16>, vector<256x128xf32> -> vector<256x128xf32>
    %13 = arith.truncf %12 : vector<256x128xf32> to vector<256x128xbf16>
    %c0_8 = arith.constant 0 : index
    %c0_9 = arith.constant 0 : index
    %14 = vector.load %arg5[%c0_8, %c0_9] : memref<256x128xbf16, #tpu.memory_space<vmem>>, vector<256x128xbf16>
    tpu.vector_store %arg5[%c0_8, %c0_9], %13 {strides = array<i32>} : memref<256x128xbf16, #tpu.memory_space<vmem>>, vector<256x128xbf16>,
    %cst_10 = arith.constant dense<0.000000e+00> : vector<128xf32>
    %15 = vector.multi_reduction <add>, %12, %cst_10 [0] : vector<256x128xf32> to vector<128xf32>
    %16 = vector.shape_cast %15 : vector<128xf32> to vector<1x128xf32>
    %17 = arith.mulf %12, %12 : vector<256x128xf32>
    %cst_11 = arith.constant dense<0.000000e+00> : vector<128xf32>
    %18 = vector.multi_reduction <add>, %17, %cst_11 [0] : vector<256x128xf32> to vector<128xf32>
    %19 = vector.shape_cast %18 : vector<128xf32> to vector<1x128xf32>
    %20 = tpu.concatenate %16, %19 in 0 : vector<1x128xf32>, vector<1x128xf32> -> vector<2x128xf32>
    %c0_12 = arith.constant 0 : index
    %c0_13 = arith.constant 0 : index
    %c0_14 = arith.constant 0 : index
    %21 = vector.load %arg6[%c0_12, %c0_13, %c0_14] : memref<1x2x128xf32, #tpu.memory_space<vmem>>, vector<1x2x128xf32>
    %22 = vector.shape_cast %21 : vector<1x2x128xf32> to vector<2x128xf32>
    %23 = vector.shape_cast %20 : vector<2x128xf32> to vector<1x2x128xf32>
    tpu.vector_store %arg6[%c0_12, %c0_13, %c0_14], %23 {strides = array<i32>} : memref<1x2x128xf32, #tpu.memory_space<vmem>>, vector<1x2x128xf32>,
    return
  }
  func.func @transform_0(%arg0: i32) -> (i32, i32) {
    %c0_i32 = arith.constant 0 : i32
    %c0_i32_0 = arith.constant 0 : i32
    return %arg0, %c0_i32 : i32, i32
  }
  func.func @transform_1(%arg0: i32) -> (i32, i32) {
    %c0_i32 = arith.constant 0 : i32
    %c0_i32_0 = arith.constant 0 : i32
    %c0_i32_1 = arith.constant 0 : i32
    return %c0_i32, %c0_i32_0 : i32, i32
  }
  func.func @transform_2(%arg0: i32) -> (i32, i32) {
    %c0_i32 = arith.constant 0 : i32
    %c0_i32_0 = arith.constant 0 : i32
    %c0_i32_1 = arith.constant 0 : i32
    return %c0_i32, %c0_i32_0 : i32, i32
  }
  func.func @transform_3(%arg0: i32) -> (i32, i32) {
    %c0_i32 = arith.constant 0 : i32
    %c0_i32_0 = arith.constant 0 : i32
    %c0_i32_1 = arith.constant 0 : i32
    return %c0_i32, %c0_i32_0 : i32, i32
  }
  func.func @transform_4(%arg0: i32) -> (i32, i32) {
    %c0_i32 = arith.constant 0 : i32
    %c0_i32_0 = arith.constant 0 : i32
    return %arg0, %c0_i32 : i32, i32
  }
  func.func @transform_5(%arg0: i32) -> (i32, i32, i32) {
    %c0_i32 = arith.constant 0 : i32
    %c0_i32_0 = arith.constant 0 : i32
    %c0_i32_1 = arith.constant 0 : i32
    return %arg0, %c0_i32, %c0_i32_0 : i32, i32, i32
  }
}

module attributes {stable_mosaic.version = 11 : i64} {
  func.func @_affine_add_relu_kernel(%arg0: i32, %arg1: memref<256x128xbf16, #tpu.memory_space<vmem>>, %arg2: memref<1x128xf32, #tpu.memory_space<vmem>>, %arg3: memref<1x128xf32, #tpu.memory_space<vmem>>, %arg4: memref<256x128xbf16, #tpu.memory_space<vmem>>, %arg5: memref<256x128xf32, #tpu.memory_space<vmem>>) attributes {dimension_semantics = [#tpu.dimension_semantics<parallel>], iteration_bounds = array<i64: 2>, scalar_prefetch = 0 : i64, scratch_operands = 0 : i64, tpu.core_type = #tpu.core_type<tc>, window_params = [{transform_indices = @transform_0, window_bounds = array<i64: 256, 128>}, {pipeline_mode = #tpu.pipeline_mode<synchronous>, transform_indices = @transform_1, window_bounds = array<i64: 1, 128>}, {pipeline_mode = #tpu.pipeline_mode<synchronous>, transform_indices = @transform_2, window_bounds = array<i64: 1, 128>}, {transform_indices = @transform_3, window_bounds = array<i64: 256, 128>}, {transform_indices = @transform_4, window_bounds = array<i64: 256, 128>}]} {
    %c0 = arith.constant 0 : index
    %c0_0 = arith.constant 0 : index
    %0 = vector.load %arg1[%c0, %c0_0] : memref<256x128xbf16, #tpu.memory_space<vmem>>, vector<256x128xbf16>
    %1 = arith.extf %0 : vector<256x128xbf16> to vector<256x128xf32>
    %c0_1 = arith.constant 0 : index
    %c0_2 = arith.constant 0 : index
    %2 = vector.load %arg2[%c0_1, %c0_2] : memref<1x128xf32, #tpu.memory_space<vmem>>, vector<1x128xf32>
    %3 = vector.broadcast %2 : vector<1x128xf32> to vector<256x128xf32>
    %4 = arith.mulf %1, %3 : vector<256x128xf32>
    %c0_3 = arith.constant 0 : index
    %c0_4 = arith.constant 0 : index
    %5 = vector.load %arg3[%c0_3, %c0_4] : memref<1x128xf32, #tpu.memory_space<vmem>>, vector<1x128xf32>
    %6 = vector.broadcast %5 : vector<1x128xf32> to vector<256x128xf32>
    %7 = arith.addf %4, %6 : vector<256x128xf32>
    %c0_5 = arith.constant 0 : index
    %c0_6 = arith.constant 0 : index
    %8 = vector.load %arg4[%c0_5, %c0_6] : memref<256x128xbf16, #tpu.memory_space<vmem>>, vector<256x128xbf16>
    %9 = arith.extf %8 : vector<256x128xbf16> to vector<256x128xf32>
    %10 = arith.addf %7, %9 : vector<256x128xf32>
    %cst = arith.constant 0.000000e+00 : f32
    %11 = vector.broadcast %cst : f32 to vector<256x128xf32>
    %12 = arith.maximumf %10, %11 : vector<256x128xf32>
    %c0_7 = arith.constant 0 : index
    %c0_8 = arith.constant 0 : index
    %13 = vector.load %arg5[%c0_7, %c0_8] : memref<256x128xf32, #tpu.memory_space<vmem>>, vector<256x128xf32>
    tpu.vector_store %arg5[%c0_7, %c0_8], %12 {strides = array<i32>} : memref<256x128xf32, #tpu.memory_space<vmem>>, vector<256x128xf32>,
    return
  }
  func.func @transform_0(%arg0: i32) -> (i32, i32) {
    %c0_i32 = arith.constant 0 : i32
    %c0_i32_0 = arith.constant 0 : i32
    return %arg0, %c0_i32 : i32, i32
  }
  func.func @transform_1(%arg0: i32) -> (i32, i32) {
    %c0_i32 = arith.constant 0 : i32
    %c0_i32_0 = arith.constant 0 : i32
    %c0_i32_1 = arith.constant 0 : i32
    return %c0_i32, %c0_i32_0 : i32, i32
  }
  func.func @transform_2(%arg0: i32) -> (i32, i32) {
    %c0_i32 = arith.constant 0 : i32
    %c0_i32_0 = arith.constant 0 : i32
    %c0_i32_1 = arith.constant 0 : i32
    return %c0_i32, %c0_i32_0 : i32, i32
  }
  func.func @transform_3(%arg0: i32) -> (i32, i32) {
    %c0_i32 = arith.constant 0 : i32
    %c0_i32_0 = arith.constant 0 : i32
    return %arg0, %c0_i32 : i32, i32
  }
  func.func @transform_4(%arg0: i32) -> (i32, i32) {
    %c0_i32 = arith.constant 0 : i32
    %c0_i32_0 = arith.constant 0 : i32
    return %arg0, %c0_i32 : i32, i32
  }
}

</mosaic_0001>

<bundles_post_ra>
// kernel: bottleneck2_forward.5
= control target key start
LH: loop header
LB: loop body
LE: loop exit
PB: predicated region body
PF: predicated region fallthrough
CT: control target
= control target key end

     0   :  { %s1238_s12 = smov 0   ;;  %s1414_s0 = inlined_call_operand.vmem [shape: bf16[512,128], index: 0, kind: input, shape index: {}]   ;;  %s1415_s1 = inlined_call_operand.vmem [shape: bf16[128,128], index: 1, kind: input, shape index: {}]   ;;  %s1416_s2 = inlined_call_operand.vmem [shape: bf16[512,128], index: 2, kind: output, shape index: {0}]   ;;  %s1417_s3 = inlined_call_operand.vmem [shape: f32[2,2,128], index: 3, kind: output, shape index: {1}]  }
   0x1 LB: > { %s1244_s13 = sadd.s32 4294967295, %s1216_s12   ;;  %p899_p0 = scmp.ge.s32.totalorder %s1216_s12, 1  ;;  %s1216_s12 = sphi %s1238_s12, %s14_s12  }
   0x2   : > { %p141_p1 = scmp.lt.s32.totalorder %s1216_s12, 3 }
   0x4   : > { %p142_p2 = pnand %p899_p0, %p141_p1 }
   0x5   : > { %v1186_v0 = vld [vmem:[%s1415_s1] sm:$0xff] (!%p142_p2)   ;;  %s900_s16 = sshll.u32 (!%p142_p2), %s1244_s13, 5  ;;  %v1187_v1 = vld [vmem:[%s1415_s1 + $0x8] sm:$0xff] (!%p142_p2)   ;;  %v1188_v2 = vld [vmem:[%s1415_s1 + $0x10] sm:$0xff] (!%p142_p2)   ;;  %p181_p4 = scmp.lt.s32.totalorder (!%p142_p2), %s1244_s13, 1  ;;  %vm805_vm0 = vcmask (!%p142_p2), 1040384  }
   0x6   : > { %145 = sbr.rel (%p142_p2) target bundleno = 331 (0x14b), region = 28  ;;  %p170_p3 = scmp.lt.s32.totalorder (!%p142_p2), %s900_s16, 63  ;;  %1114 = vmatprep.subr.bf16.mxu0 (!%p142_p2), %v1186_v0  ;;  %1162 = vmatprep.subr.bf16.mxu1 (!%p142_p2), %v1186_v0  ;;  %v1189_v3 = vld [vmem:[%s1415_s1 + $0x18] sm:$0xff] (!%p142_p2)   ;;  %v1190_v5 = vld [vmem:[%s1415_s1 + $0x20] sm:$0xff] (!%p142_p2)   ;;  %v1191_v6 = vld [vmem:[%s1415_s1 + $0x28] sm:$0xff] (!%p142_p2)  }
   0x7   : > { %1115 = vmatpush3.bf16.msra.mxu0 (!%p142_p2), %v1186_v0  ;;  %1170 = vmatpush3.bf16.msra.mxu1 (!%p142_p2), %v1186_v0  ;;  %v1192_v8 = vld [vmem:[%s1415_s1 + $0x30] sm:$0xff] (!%p142_p2)   ;;  %v1193_v9 = vld [vmem:[%s1415_s1 + $0x38] sm:$0xff] (!%p142_p2)  }
   0x8   : > { %1116 = vmatprep.subr.bf16.mxu0 (!%p142_p2), %v1187_v1  ;;  %1163 = vmatprep.subr.bf16.mxu1 (!%p142_p2), %v1187_v1 }
   0xb   : > { %1117 = vmatpush3.bf16.msra.mxu0 (!%p142_p2), %v1187_v1  ;;  %1171 = vmatpush3.bf16.msra.mxu1 (!%p142_p2), %v1187_v1 }
   0xc   : > { %1118 = vmatprep.subr.bf16.mxu0 (!%p142_p2), %v1188_v2  ;;  %1164 = vmatprep.subr.bf16.mxu1 (!%p142_p2), %v1188_v2 }
   0xd   : > { %s1419_s16 = smov (!%p170_p3, %s900_s16), 63  ;;  %s1421_s13 = smov (!%p181_p4, %s1244_s13), 1 }
   0xe   : > { %s901_s21 = sshll.u32 %s1419_s16, 2  ;;  %s904_s11 = sshll.u32 %s1421_s13, 1 }
   0xf   : > { %s1266_s24 = scalar_lea.vmem %s1414_s0, %s901_s21  ;;  %1119 = vmatpush3.bf16.msra.mxu0 %v1188_v2  ;;  %1172 = vmatpush3.bf16.msra.mxu1 %v1188_v2  ;;  %s1308_s10 = scalar_lea.vmem %s1416_s2, %s901_s21 }
  0x10   : > { %v1194_v4 = vld [vmem:[%s1266_s24] sm:$0xff]   ;;  %1120 = vmatprep.subr.bf16.mxu0 %v1189_v3  ;;  %1165 = vmatprep.subr.bf16.mxu1 %v1189_v3  ;;  %v1195_v10 = vld [vmem:[%s1266_s24 + $0x8] sm:$0xff]   ;;  %v1196_v12 = vld [vmem:[%s1266_s24 + $0x10] sm:$0xff]   ;;  %s184_s16 = scalar_lea.vmem %s1417_s3, %s904_s11 }
  0x11   : > { %1130 = vmatprep.mubr.bf16.mxu0 %v1194_v4  ;;  %v1202_v7 = vld [vmem:[%s1266_s24 + $0x40] sm:$0xff]   ;;  %v1203_v11 = vld [vmem:[%s1266_s24 + $0x48] sm:$0xff]   ;;  %v1204_v13 = vld [vmem:[%s1266_s24 + $0x50] sm:$0xff]  }
  0x12   : > { %1146 = vmatprep.mubr.bf16.mxu1 %v1202_v7  ;;  %v1197_v14 = vld [vmem:[%s1266_s24 + $0x18] sm:$0xff]   ;;  %v1198_v16 = vld [vmem:[%s1266_s24 + $0x20] sm:$0xff]   ;;  %v1199_v18 = vld [vmem:[%s1266_s24 + $0x28] sm:$0xff]  }
  0x13   : > { %1121 = vmatpush3.bf16.msra.mxu0 %v1189_v3  ;;  %1173 = vmatpush3.bf16.msra.mxu1 %v1189_v3  ;;  %v1205_v15 = vld [vmem:[%s1266_s24 + $0x58] sm:$0xff]   ;;  %v1206_v17 = vld [vmem:[%s1266_s24 + $0x60] sm:$0xff]   ;;  %v1207_v19 = vld [vmem:[%s1266_s24 + $0x68] sm:$0xff]  }
  0x14   : > { %1122 = vmatprep.subr.bf16.mxu0 %v1190_v5  ;;  %1166 = vmatprep.subr.bf16.mxu1 %v1190_v5  ;;  %v1200_v20 = vld [vmem:[%s1266_s24 + $0x30] sm:$0xff]   ;;  %v1201_v22 = vld [vmem:[%s1266_s24 + $0x38] sm:$0xff]  }
  0x15   : > { %v1208_v21 = vld [vmem:[%s1266_s24 + $0x70] sm:$0xff]   ;;  %v1209_v23 = vld [vmem:[%s1266_s24 + $0x78] sm:$0xff]  }
  0x17   : > { %1123 = vmatpush3.bf16.msra.mxu0 %v1190_v5  ;;  %1174 = vmatpush3.bf16.msra.mxu1 %v1190_v5 }
  0x18   : > { %1124 = vmatprep.subr.bf16.mxu0 %v1191_v6  ;;  %1167 = vmatprep.subr.bf16.mxu1 %v1191_v6 }
  0x1b   : > { %1125 = vmatpush3.bf16.msra.mxu0 %v1191_v6  ;;  %1175 = vmatpush3.bf16.msra.mxu1 %v1191_v6 }
  0x1c   : > { %1126 = vmatprep.subr.bf16.mxu0 %v1192_v8  ;;  %1168 = vmatprep.subr.bf16.mxu1 %v1192_v8 }
  0x1f   : > { %1127 = vmatpush3.bf16.msra.mxu0 %v1192_v8  ;;  %1176 = vmatpush3.bf16.msra.mxu1 %v1192_v8 }
  0x20   : > { %1128 = vmatprep.subr.bf16.mxu0 %v1193_v9  ;;  %1169 = vmatprep.subr.bf16.mxu1 %v1193_v9 }
  0x23   : > { %1129 = vmatpush3.bf16.msra.mxu0 %v1193_v9  ;;  %1177 = vmatpush3.bf16.msra.mxu1 %v1193_v9 }
  0x26   : > { %1131 = vmatmul.mubr.bf16.vlgmr.msra.gmra.mrb[0].mxu0 %v1195_v10  ;;  %1147 = vmatmul.mubr.bf16.vlgmr.msra.gmra.mrb[0].mxu1 %v1203_v11 }
  0x27   : > { %1134 = vmatprep.mubr.bf16.mxu0 %v1196_v12  ;;  %1150 = vmatprep.mubr.bf16.mxu1 %v1204_v13 }
  0x2e   : > { %1135 = vmatmul.mubr.bf16.gmra.mrb[4].mxu0 %v1197_v14  ;;  %1151 = vmatmul.mubr.bf16.gmra.mrb[4].mxu1 %v1205_v15 }
  0x2f   : > { %1138 = vmatprep.mubr.bf16.mxu0 %v1198_v16  ;;  %1154 = vmatprep.mubr.bf16.mxu1 %v1206_v17 }
  0x36   : > { %1139 = vmatmul.mubr.bf16.gmra.mrb[8].mxu0 %v1199_v18  ;;  %1155 = vmatmul.mubr.bf16.gmra.mrb[8].mxu1 %v1207_v19 }
  0x37   : > { %1142 = vmatprep.mubr.bf16.mxu0 %v1200_v20  ;;  %1158 = vmatprep.mubr.bf16.mxu1 %v1208_v21 }
  0x3e   : > { %1143 = vmatmul.mubr.bf16.gmra.mrb[12].mxu0 %v1201_v22  ;;  %1159 = vmatmul.mubr.bf16.gmra.mrb[12].mxu1 %v1209_v23 }
  0xf9   : > { %v1132_v24 = vpop.f32.mrb[0].mxu0  ;;  %v1299_v25 = vpop.f32.mrb[0].mxu1 }
  0xfa   : > { %v412_v26 = vpop.f32.mrb[1].mxu0  ;;  %v1301_v27 = vpop.f32.mrb[1].mxu1  ;;  %v738_v39 = vmul.f32 %v1132_v24, %v1132_v24 }
  0xfb   : > { %v1133_v28 = vpop.f32.mrb[2].mxu0  ;;  %v1310_v29 = vpop.f32.mrb[2].mxu1  ;;  %v736_v30 = vmul.f32 %v412_v26, %v412_v26 }
  0xfc   : > { %v1003_v31 = vpack.c.bf16 %v1133_v28, %v1132_v24  ;;  %v415_v32 = vpop.f32.mrb[3].mxu0  ;;  %v1043_v33 = vpack.c.bf16 %v1310_v29, %v1299_v25  ;;  %v1314_v34 = vpop.f32.mrb[3].mxu1  ;;  %v739_v42 = vmul.f32 %v1133_v28, %v1133_v28 }
  0xfd   : > { %v998_v35 = vpack.c.bf16 %v415_v32, %v412_v26  ;;  %v699_v36 = vadd.f32 %v415_v32, %v412_v26  ;;  %v737_v37 = vmul.f32 %v415_v32, %v415_v32  ;;  %v1038_v38 = vpack.c.bf16 %v1314_v34, %v1301_v27 }
  0xfe   : > { %1075 = vst [vmem:[%s1308_s10 + $0x8] sm:$0xff] %v1003_v31   ;;  %1083 = vst [vmem:[%s1308_s10 + $0x48] sm:$0xff] %v1043_v33  }
  0xff   : > { %999 = vst [vmem:[%s1308_s10] sm:$0xff] %v998_v35   ;;  %v700_v40 = vadd.f32 %v1132_v24, %v699_v36  ;;  %v768_v41 = vadd.f32 %v737_v37, %v736_v30  ;;  %1082 = vst [vmem:[%s1308_s10 + $0x40] sm:$0xff] %v1038_v38  }
 0x101   : > { %v769_v43 = vadd.f32 %v768_v41, %v738_v39  ;;  %v1136_v44 = vpop.f32.mrb[4].mxu0  ;;  %v701_v45 = vadd.f32 %v1133_v28, %v700_v40  ;;  %v1322_v46 = vpop.f32.mrb[4].mxu1 }
 0x102   : > { %v428_v47 = vpop.f32.mrb[5].mxu0  ;;  %v1324_v48 = vpop.f32.mrb[5].mxu1  ;;  %v742_v63 = vmul.f32 %v1136_v44, %v1136_v44 }
 0x103   : > { %v702_v49 = vadd.f32 %v701_v45, %v428_v47  ;;  %v740_v50 = vmul.f32 %v428_v47, %v428_v47  ;;  %v770_v51 = vadd.f32 %v769_v43, %v739_v42  ;;  %v1137_v52 = vpop.f32.mrb[6].mxu0  ;;  %v1326_v53 = vpop.f32.mrb[6].mxu1 }
 0x104   : > { %v1013_v54 = vpack.c.bf16 %v1137_v52, %v1136_v44  ;;  %v431_v55 = vpop.f32.mrb[7].mxu0  ;;  %v1053_v56 = vpack.c.bf16 %v1326_v53, %v1322_v46  ;;  %v1330_v57 = vpop.f32.mrb[7].mxu1  ;;  %v743_v2 = vmul.f32 %v1137_v52, %v1137_v52 }
 0x105   : > { %v771_v58 = vadd.f32 %v770_v51, %v740_v50  ;;  %v1008_v59 = vpack.c.bf16 %v431_v55, %v428_v47  ;;  %v703_v60 = vadd.f32 %v702_v49, %v431_v55  ;;  %v741_v61 = vmul.f32 %v431_v55, %v431_v55 }
 0x106   : > { %1077 = vst [vmem:[%s1308_s10 + $0x18] sm:$0xff] %v1013_v54   ;;  %1085 = vst [vmem:[%s1308_s10 + $0x58] sm:$0xff] %v1053_v56   ;;  %v1048_v62 = vpack.c.bf16 %v1330_v57, %v1324_v48 }
 0x107   : > { %1076 = vst [vmem:[%s1308_s10 + $0x10] sm:$0xff] %v1008_v59   ;;  %v704_v0 = vadd.f32 %v1136_v44, %v703_v60  ;;  %v772_v1 = vadd.f32 %v771_v58, %v741_v61  ;;  %v752_v61 = vmul.f32 %v1301_v27, %v1301_v27 }
 0x108   : > { %1084 = vst [vmem:[%s1308_s10 + $0x50] sm:$0xff] %v1048_v62  }
 0x109   : > { %v773_v3 = vadd.f32 %v772_v1, %v742_v63  ;;  %v1140_v4 = vpop.f32.mrb[8].mxu0  ;;  %v705_v5 = vadd.f32 %v1137_v52, %v704_v0  ;;  %v1338_v6 = vpop.f32.mrb[8].mxu1 }
 0x10a   : > { %v444_v7 = vpop.f32.mrb[9].mxu0  ;;  %v1340_v8 = vpop.f32.mrb[9].mxu1  ;;  %v746_v23 = vmul.f32 %v1140_v4, %v1140_v4 }
 0x10b   : > { %v706_v9 = vadd.f32 %v705_v5, %v444_v7  ;;  %v744_v10 = vmul.f32 %v444_v7, %v444_v7  ;;  %v774_v11 = vadd.f32 %v773_v3, %v743_v2  ;;  %v1141_v12 = vpop.f32.mrb[10].mxu0  ;;  %v1342_v13 = vpop.f32.mrb[10].mxu1  ;;  %v753_v2 = vmul.f32 %v1314_v34, %v1314_v34 }
 0x10c   : > { %v1023_v14 = vpack.c.bf16 %v1141_v12, %v1140_v4  ;;  %v447_v15 = vpop.f32.mrb[11].mxu0  ;;  %v1063_v16 = vpack.c.bf16 %v1342_v13, %v1338_v6  ;;  %v1346_v17 = vpop.f32.mrb[11].mxu1  ;;  %v747_v28 = vmul.f32 %v1141_v12, %v1141_v12  ;;  %v754_v3 = vmul.f32 %v1299_v25, %v1299_v25 }
 0x10d   : > { %v775_v18 = vadd.f32 %v774_v11, %v744_v10  ;;  %v1018_v19 = vpack.c.bf16 %v447_v15, %v444_v7  ;;  %v707_v20 = vadd.f32 %v706_v9, %v447_v15  ;;  %v745_v21 = vmul.f32 %v447_v15, %v447_v15 }
 0x10e   : > { %1079 = vst [vmem:[%s1308_s10 + $0x28] sm:$0xff] %v1023_v14   ;;  %1087 = vst [vmem:[%s1308_s10 + $0x68] sm:$0xff] %v1063_v16   ;;  %v1058_v22 = vpack.c.bf16 %v1346_v17, %v1340_v8  ;;  %v755_v7 = vmul.f32 %v1310_v29, %v1310_v29  ;;  %v757_v15 = vmul.f32 %v1330_v57, %v1330_v57 }
 0x10f   : > { %1078 = vst [vmem:[%s1308_s10 + $0x20] sm:$0xff] %v1018_v19   ;;  %v708_v24 = vadd.f32 %v1140_v4, %v707_v20  ;;  %v776_v26 = vadd.f32 %v775_v18, %v745_v21 }
 0x110   : > { %1086 = vst [vmem:[%s1308_s10 + $0x60] sm:$0xff] %v1058_v22  }
 0x111   : > { %v777_v30 = vadd.f32 %v776_v26, %v746_v23  ;;  %v1144_v31 = vpop.f32.mrb[12].mxu0  ;;  %v709_v32 = vadd.f32 %v1141_v12, %v708_v24  ;;  %v1354_v33 = vpop.f32.mrb[12].mxu1  ;;  %v761_v24 = vmul.f32 %v1346_v17, %v1346_v17 }
 0x112   : > { %v460_v35 = vpop.f32.mrb[13].mxu0  ;;  %v524_v36 = vpop.f32.mrb[13].mxu1  ;;  %v750_v54 = vmul.f32 %v1144_v31, %v1144_v31 }
 0x113   : > { %v710_v37 = vadd.f32 %v709_v32, %v460_v35  ;;  %v748_v38 = vmul.f32 %v460_v35, %v460_v35  ;;  %v778_v39 = vadd.f32 %v777_v30, %v747_v28  ;;  %v1145_v40 = vpop.f32.mrb[14].mxu0  ;;  %v1356_v41 = vpop.f32.mrb[14].mxu1 }
 0x114   : > { %v1033_v42 = vpack.c.bf16 %v1145_v40, %v1144_v31  ;;  %v463_v43 = vpop.f32.mrb[15].mxu0  ;;  %v1073_v44 = vpack.c.bf16 %v1356_v41, %v1354_v33  ;;  %v527_v45 = vpop.f32.mrb[15].mxu1  ;;  %v751_v58 = vmul.f32 %v1145_v40, %v1145_v40 }
 0x115   : > { %v779_v47 = vadd.f32 %v778_v39, %v748_v38  ;;  %v1028_v49 = vpack.c.bf16 %v463_v43, %v460_v35  ;;  %v711_v50 = vadd.f32 %v710_v37, %v463_v43  ;;  %v749_v51 = vmul.f32 %v463_v43, %v463_v43 }
 0x116   : > { %1081 = vst [vmem:[%s1308_s10 + $0x38] sm:$0xff] %v1033_v42   ;;  %1089 = vst [vmem:[%s1308_s10 + $0x78] sm:$0xff] %v1073_v44   ;;  %v1068_v52 = vpack.c.bf16 %v527_v45, %v524_v36  ;;  %v766_v39 = vmul.f32 %v1354_v33, %v1354_v33  ;;  %v767_v42 = vmul.f32 %v1356_v41, %v1356_v41 }
 0x117   : > { %1080 = vst [vmem:[%s1308_s10 + $0x30] sm:$0xff] %v1028_v49   ;;  %v712_v55 = vadd.f32 %v1144_v31, %v711_v50  ;;  %v780_v56 = vadd.f32 %v779_v47, %v749_v51  ;;  %v764_v31 = vmul.f32 %v524_v36, %v524_v36 }
 0x118   : > { %1088 = vst [vmem:[%s1308_s10 + $0x70] sm:$0xff] %v1068_v52  }
 0x119   : > { %v781_v59 = vadd.f32 %v780_v56, %v750_v54  ;;  %v713_v60 = vadd.f32 %v1145_v40, %v712_v55 }
 0x11b   : > { %v714_v62 = vadd.f32 %v713_v60, %v1301_v27  ;;  %v782_v63 = vadd.f32 %v781_v59, %v751_v58  ;;  %v756_v27 = vmul.f32 %v1324_v48, %v1324_v48 }
 0x11d   : > { %v783_v0 = vadd.f32 %v782_v63, %v752_v61  ;;  %v715_v1 = vadd.f32 %v714_v62, %v1314_v34 }
 0x11f   : > { %v716_v4 = vadd.f32 %v1299_v25, %v715_v1  ;;  %v784_v5 = vadd.f32 %v783_v0, %v753_v2  ;;  %v758_v25 = vmul.f32 %v1322_v46, %v1322_v46 }
 0x121   : > { %v785_v9 = vadd.f32 %v784_v5, %v754_v3  ;;  %v717_v10 = vadd.f32 %v1310_v29, %v716_v4  ;;  %v759_v29 = vmul.f32 %v1326_v53, %v1326_v53 }
 0x123   : > { %v718_v11 = vadd.f32 %v717_v10, %v1324_v48  ;;  %v786_v12 = vadd.f32 %v785_v9, %v755_v7  ;;  %v760_v48 = vmul.f32 %v1340_v8, %v1340_v8 }
 0x125   : > { %v787_v14 = vadd.f32 %v786_v12, %v756_v27  ;;  %v719_v34 = vadd.f32 %v718_v11, %v1330_v57 }
 0x127   : > { %v720_v16 = vadd.f32 %v1322_v46, %v719_v34  ;;  %v788_v18 = vadd.f32 %v787_v14, %v757_v15  ;;  %v762_v46 = vmul.f32 %v1338_v6, %v1338_v6 }
 0x129   : > { %v789_v19 = vadd.f32 %v788_v18, %v758_v25  ;;  %v721_v20 = vadd.f32 %v1326_v53, %v720_v16  ;;  %v763_v53 = vmul.f32 %v1342_v13, %v1342_v13 }
 0x12b   : > { %v722_v21 = vadd.f32 %v721_v20, %v1340_v8  ;;  %v790_v22 = vadd.f32 %v789_v19, %v759_v29 }
 0x12d   : > { %v791_v23 = vadd.f32 %v790_v22, %v760_v48  ;;  %v723_v57 = vadd.f32 %v722_v21, %v1346_v17  ;;  %v765_v17 = vmul.f32 %v527_v45, %v527_v45 }
 0x12f   : > { %v724_v26 = vadd.f32 %v1338_v6, %v723_v57  ;;  %v792_v28 = vadd.f32 %v791_v23, %v761_v24 }
 0x131   : > { %v793_v30 = vadd.f32 %v792_v28, %v762_v46  ;;  %v725_v8 = vadd.f32 %v1342_v13, %v724_v26 }
 0x133   : > { %v726_v32 = vadd.f32 %v725_v8, %v524_v36  ;;  %v794_v35 = vadd.f32 %v793_v30, %v763_v53 }
 0x135   : > { %v795_v37 = vadd.f32 %v794_v35, %v764_v31  ;;  %v727_v38 = vadd.f32 %v726_v32, %v527_v45 }
 0x137   : > { %v728_v6 = vadd.f32 %v1354_v33, %v727_v38  ;;  %v796_v40 = vadd.f32 %v795_v37, %v765_v17 }
 0x139   : > { %v729_v43 = vadd.f32 %v1356_v41, %v728_v6  ;;  %v797_v44 = vadd.f32 %v796_v40, %v766_v39 }
 0x13b   : > { %v730_v13 = vrot.slane %v729_v43, 4  ;;  %v798_v47 = vadd.f32 %v797_v44, %v767_v42 }
 0x13d   : > { %v731_v36 = vadd.f32 %v730_v13, %v729_v43  ;;  %v799_v49 = vrot.slane %v798_v47, 4 }
 0x13f   : > { %v732_v50 = vrot.slane %v731_v36, 2  ;;  %v800_v51 = vadd.f32 %v799_v49, %v798_v47 }
 0x141   : > { %v733_v45 = vadd.f32 %v732_v50, %v731_v36  ;;  %v801_v52 = vrot.slane %v800_v51, 2 }
 0x143   : > { %v734_v54 = vrot.slane %v733_v45, 1  ;;  %v802_v55 = vadd.f32 %v801_v52, %v800_v51 }
 0x145   : > { %v803_v33 = vrot.slane %v802_v55, 1  ;;  %v735_v41 = vadd.f32 %v734_v54, %v733_v45 }
 0x147   : > { %v804_v56 = vadd.f32 %v803_v33, %v802_v55 }
 0x149   : > { %v806_v58 = vsel %vm805_vm0, %v735_v41, %v804_v56 }
 0x14a   : > { %807 = vst [vmem:[%s184_s16] sm:$0x3] %v806_v58 }
 0x14b PF: > { %s14_s12 = sadd.s32 1, %s1216_s12  }
 0x14c   : > { %p11_p5 = scmp.ge.s32.totalorder %s14_s12, 4  }
 0x14e   :  { %13 = sbr.rel (!%p11_p5) target bundleno = 1 (0x1), region = 70 }

// kernel: bottleneck2_forward.9
= control target key start
LH: loop header
LB: loop body
LE: loop exit
PB: predicated region body
PF: predicated region fallthrough
CT: control target
= control target key end

     0   :  { %s807_s15 = smov 0   ;;  %s975_s0 = inlined_call_operand.vmem [shape: bf16[512,128], index: 0, kind: input, shape index: {}]   ;;  %s976_s1 = inlined_call_operand.vmem [shape: f32[1,128], index: 1, kind: input, shape index: {}]   ;;  %s977_s2 = inlined_call_operand.vmem [shape: f32[1,128], index: 2, kind: input, shape index: {}]   ;;  %s978_s3 = inlined_call_operand.vmem [shape: bf16[512,128], index: 3, kind: input, shape index: {}]   ;;  %s979_s4 = inlined_call_operand.vmem [shape: f32[512,128], index: 4, kind: output, shape index: {}]  }
   0x1 LB: > { %s593_s16 = sadd.s32 4294967295, %s780_s15   ;;  %p597_p0 = scmp.ge.s32.totalorder %s780_s15, 1  ;;  %s780_s15 = sphi %s807_s15, %s14_s15  }
   0x2   : > { %p174_p1 = scmp.lt.s32.totalorder %s780_s15, 3 }
   0x4   : > { %p175_p2 = pnand %p597_p0, %p174_p1 }
   0x5   : > { %s598_s17 = sshll.u32 (!%p175_p2), %s593_s16, 5  ;;  %v831_v0 = vld [vmem:[%s976_s1] ss:$0 sm:$0xff] (!%p175_p2) }
   0x6   : > { %178 = sbr.rel (%p175_p2) target bundleno = 71 (0x47), region = 36  ;;  %p206_p3 = scmp.lt.s32.totalorder (!%p175_p2), %s598_s17, 63  ;;  %v842_v11 = vld [vmem:[%s977_s2] ss:$0 sm:$0xff] (!%p175_p2) }
   0xd   : > { %s981_s17 = smov (!%p206_p3, %s598_s17), 63 }
   0xe   : > { %s599_s18 = sshll.u32 %s981_s17, 2  ;;  %s603_s29 = sshll.u32 %s981_s17, 3 }
   0xf   : > { %s821_s21 = scalar_lea.vmem %s975_s0, %s599_s18  ;;  %s826_s24 = scalar_lea.vmem %s978_s3, %s599_s18 }
  0x10   : > { %v609_v1 = vld [vmem:[%s821_s21] sm:$0xff]   ;;  %v736_v3 = vld [vmem:[%s821_s21 + $0x8] sm:$0xff]   ;;  %v737_v9 = vld [vmem:[%s821_s21 + $0x10] sm:$0xff]   ;;  %s862_s6 = scalar_lea.vmem %s979_s4, %s603_s29 }
  0x11   : > { %v673_v2 = vld [vmem:[%s826_s24] sm:$0xff]   ;;  %v610_v4 = vunpack.c.l.bf16 %v609_v1  ;;  %v611_v6 = vunpack.c.h.bf16 %v609_v1  ;;  %v751_v8 = vld [vmem:[%s826_s24 + $0x8] sm:$0xff]   ;;  %v752_v10 = vld [vmem:[%s826_s24 + $0x10] sm:$0xff]   ;;  %v614_v12 = vunpack.c.l.bf16 %v736_v3  ;;  %v615_v14 = vunpack.c.h.bf16 %v736_v3 }
  0x12   : > { %v674_v5 = vunpack.c.l.bf16 %v673_v2  ;;  %v675_v7 = vunpack.c.h.bf16 %v673_v2  ;;  %v678_v13 = vunpack.c.l.bf16 %v751_v8  ;;  %v679_v15 = vunpack.c.h.bf16 %v751_v8  ;;  %v738_v16 = vld [vmem:[%s821_s21 + $0x18] sm:$0xff]   ;;  %v739_v42 = vld [vmem:[%s821_s21 + $0x20] sm:$0xff]   ;;  %v740_v52 = vld [vmem:[%s821_s21 + $0x28] sm:$0xff]  }
  0x13   : > { %v294_v17 = vmul.f32 %v610_v4, %v831_v0  ;;  %v295_v18 = vmul.f32 %v611_v6, %v831_v0  ;;  %v618_v19 = vunpack.c.l.bf16 %v737_v9  ;;  %v682_v20 = vunpack.c.l.bf16 %v752_v10  ;;  %v753_v21 = vld [vmem:[%s826_s24 + $0x18] sm:$0xff]   ;;  %v754_v47 = vld [vmem:[%s826_s24 + $0x20] sm:$0xff]   ;;  %v755_v57 = vld [vmem:[%s826_s24 + $0x28] sm:$0xff]  }
  0x14   : > { %v296_v22 = vmul.f32 %v614_v12, %v831_v0  ;;  %v297_v23 = vmul.f32 %v615_v14, %v831_v0  ;;  %v619_v24 = vunpack.c.h.bf16 %v737_v9  ;;  %v683_v25 = vunpack.c.h.bf16 %v752_v10  ;;  %v741_v62 = vld [vmem:[%s821_s21 + $0x30] sm:$0xff]   ;;  %v742_v14 = vld [vmem:[%s821_s21 + $0x38] sm:$0xff]  }
  0x15   : > { %v333_v26 = vadd.f32 %v842_v11, %v294_v17  ;;  %v334_v27 = vadd.f32 %v842_v11, %v295_v18  ;;  %v298_v28 = vmul.f32 %v618_v19, %v831_v0  ;;  %v622_v29 = vunpack.c.l.bf16 %v738_v16  ;;  %v756_v4 = vld [vmem:[%s826_s24 + $0x30] sm:$0xff]  }
  0x16   : > { %v335_v30 = vadd.f32 %v842_v11, %v296_v22  ;;  %v336_v31 = vadd.f32 %v842_v11, %v297_v23  ;;  %v299_v32 = vmul.f32 %v619_v24, %v831_v0  ;;  %v686_v33 = vunpack.c.l.bf16 %v753_v21  ;;  %v757_v23 = vld [vmem:[%s826_s24 + $0x38] sm:$0xff]  }
  0x17   : > { %v429_v34 = vadd.f32 %v674_v5, %v333_v26  ;;  %v430_v35 = vadd.f32 %v675_v7, %v334_v27  ;;  %v337_v36 = vadd.f32 %v842_v11, %v298_v28  ;;  %v300_v37 = vmul.f32 %v622_v29, %v831_v0 }
  0x18   : > { %v431_v38 = vadd.f32 %v678_v13, %v335_v30  ;;  %v432_v39 = vadd.f32 %v679_v15, %v336_v31  ;;  %v338_v40 = vadd.f32 %v842_v11, %v299_v32  ;;  %v623_v41 = vunpack.c.h.bf16 %v738_v16  ;;  %v743_v32 = vld [vmem:[%s821_s21 + $0x40] sm:$0xff]  }
  0x19   : > { %v461_v43 = vmax.f32 %v429_v34, 0.0  ;;  %v462_v44 = vmax.f32 %v430_v35, 0.0  ;;  %v433_v45 = vadd.f32 %v682_v20, %v337_v36  ;;  %v339_v46 = vadd.f32 %v842_v11, %v300_v37  ;;  %v758_v37 = vld [vmem:[%s826_s24 + $0x40] sm:$0xff]  }
  0x1a   : > { %v463_v48 = vmax.f32 %v431_v38, 0.0  ;;  %v464_v49 = vmax.f32 %v432_v39, 0.0  ;;  %v434_v50 = vadd.f32 %v683_v25, %v338_v40  ;;  %v301_v51 = vmul.f32 %v623_v41, %v831_v0 }
  0x1b   : > { %493 = vst [vmem:[%s862_s6] sm:$0xff] %v461_v43  ;;  %494 = vst [vmem:[%s862_s6 + $0x8] sm:$0xff] %v462_v44  ;;  %v465_v53 = vmax.f32 %v433_v45, 0.0  ;;  %v435_v54 = vadd.f32 %v686_v33, %v339_v46  ;;  %v687_v55 = vunpack.c.h.bf16 %v753_v21  ;;  %v626_v56 = vunpack.c.l.bf16 %v739_v42  ;;  %v744_v46 = vld [vmem:[%s821_s21 + $0x48] sm:$0xff]  }
  0x1c   : > { %495 = vst [vmem:[%s862_s6 + $0x10] sm:$0xff] %v463_v48  ;;  %496 = vst [vmem:[%s862_s6 + $0x18] sm:$0xff] %v464_v49  ;;  %v466_v58 = vmax.f32 %v434_v50, 0.0  ;;  %v340_v59 = vadd.f32 %v842_v11, %v301_v51  ;;  %v690_v60 = vunpack.c.l.bf16 %v754_v47  ;;  %v627_v61 = vunpack.c.h.bf16 %v739_v42 }
  0x1d   : > { %497 = vst [vmem:[%s862_s6 + $0x20] sm:$0xff] %v465_v53  ;;  %v467_v63 = vmax.f32 %v435_v54, 0.0  ;;  %v302_v1 = vmul.f32 %v626_v56, %v831_v0  ;;  %v691_v2 = vunpack.c.h.bf16 %v754_v47  ;;  %v630_v3 = vunpack.c.l.bf16 %v740_v52  ;;  %v759_v47 = vld [vmem:[%s826_s24 + $0x48] sm:$0xff]   ;;  %v745_v56 = vld [vmem:[%s821_s21 + $0x50] sm:$0xff]  }
  0x1e   : > { %498 = vst [vmem:[%s862_s6 + $0x28] sm:$0xff] %v466_v58  ;;  %v436_v5 = vadd.f32 %v687_v55, %v340_v59  ;;  %v303_v6 = vmul.f32 %v627_v61, %v831_v0  ;;  %v694_v7 = vunpack.c.l.bf16 %v755_v57  ;;  %v631_v8 = vunpack.c.h.bf16 %v740_v52  ;;  %v760_v61 = vld [vmem:[%s826_s24 + $0x50] sm:$0xff]  }
  0x1f   : > { %499 = vst [vmem:[%s862_s6 + $0x30] sm:$0xff] %v467_v63  ;;  %v341_v9 = vadd.f32 %v842_v11, %v302_v1  ;;  %v304_v10 = vmul.f32 %v630_v3, %v831_v0  ;;  %v695_v12 = vunpack.c.h.bf16 %v755_v57  ;;  %v634_v13 = vunpack.c.l.bf16 %v741_v62 }
  0x20   : > { %v468_v15 = vmax.f32 %v436_v5, 0.0  ;;  %v342_v16 = vadd.f32 %v842_v11, %v303_v6  ;;  %v305_v17 = vmul.f32 %v631_v8, %v831_v0  ;;  %v698_v18 = vunpack.c.l.bf16 %v756_v4 }
  0x21   : > { %v437_v19 = vadd.f32 %v690_v60, %v341_v9  ;;  %v343_v20 = vadd.f32 %v842_v11, %v304_v10  ;;  %v306_v21 = vmul.f32 %v634_v13, %v831_v0  ;;  %v635_v22 = vunpack.c.h.bf16 %v741_v62 }
  0x22   : > { %500 = vst [vmem:[%s862_s6 + $0x38] sm:$0xff] %v468_v15  ;;  %v438_v24 = vadd.f32 %v691_v2, %v342_v16  ;;  %v344_v25 = vadd.f32 %v842_v11, %v305_v17  ;;  %v699_v26 = vunpack.c.h.bf16 %v756_v4  ;;  %v638_v27 = vunpack.c.l.bf16 %v742_v14  ;;  %v761_v17 = vld [vmem:[%s826_s24 + $0x58] sm:$0xff]  }
  0x23   : > { %v469_v28 = vmax.f32 %v437_v19, 0.0  ;;  %v439_v29 = vadd.f32 %v694_v7, %v343_v20  ;;  %v345_v30 = vadd.f32 %v842_v11, %v306_v21  ;;  %v307_v31 = vmul.f32 %v635_v22, %v831_v0 }
  0x24   : > { %v470_v33 = vmax.f32 %v438_v24, 0.0  ;;  %v440_v34 = vadd.f32 %v695_v12, %v344_v25  ;;  %v308_v35 = vmul.f32 %v638_v27, %v831_v0  ;;  %v702_v36 = vunpack.c.l.bf16 %v757_v23  ;;  %v746_v12 = vld [vmem:[%s821_s21 + $0x58] sm:$0xff]  }
  0x25   : > { %501 = vst [vmem:[%s862_s6 + $0x40] sm:$0xff] %v469_v28  ;;  %v471_v38 = vmax.f32 %v439_v29, 0.0  ;;  %v441_v39 = vadd.f32 %v698_v18, %v345_v30  ;;  %v346_v40 = vadd.f32 %v842_v11, %v307_v31  ;;  %v639_v41 = vunpack.c.h.bf16 %v742_v14  ;;  %v762_v31 = vld [vmem:[%s826_s24 + $0x60] sm:$0xff]  }
  0x26   : > { %502 = vst [vmem:[%s862_s6 + $0x48] sm:$0xff] %v470_v33  ;;  %v472_v42 = vmax.f32 %v440_v34, 0.0  ;;  %v347_v43 = vadd.f32 %v842_v11, %v308_v35  ;;  %v703_v44 = vunpack.c.h.bf16 %v757_v23  ;;  %v642_v45 = vunpack.c.l.bf16 %v743_v32 }
  0x27   : > { %503 = vst [vmem:[%s862_s6 + $0x50] sm:$0xff] %v471_v38  ;;  %v473_v48 = vmax.f32 %v441_v39, 0.0  ;;  %v442_v49 = vadd.f32 %v699_v26, %v346_v40  ;;  %v309_v50 = vmul.f32 %v639_v41, %v831_v0  ;;  %v706_v51 = vunpack.c.l.bf16 %v758_v37  ;;  %v747_v26 = vld [vmem:[%s821_s21 + $0x60] sm:$0xff]   ;;  %v748_v40 = vld [vmem:[%s821_s21 + $0x68] sm:$0xff]  }
  0x28   : > { %504 = vst [vmem:[%s862_s6 + $0x58] sm:$0xff] %v472_v42  ;;  %v443_v52 = vadd.f32 %v702_v36, %v347_v43  ;;  %v310_v53 = vmul.f32 %v642_v45, %v831_v0  ;;  %v643_v54 = vunpack.c.h.bf16 %v743_v32  ;;  %v707_v55 = vunpack.c.h.bf16 %v758_v37  ;;  %v763_v41 = vld [vmem:[%s826_s24 + $0x68] sm:$0xff]  }
  0x29   : > { %505 = vst [vmem:[%s862_s6 + $0x60] sm:$0xff] %v473_v48  ;;  %v474_v57 = vmax.f32 %v442_v49, 0.0  ;;  %v348_v58 = vadd.f32 %v842_v11, %v309_v50  ;;  %v646_v59 = vunpack.c.l.bf16 %v744_v46  ;;  %v710_v60 = vunpack.c.l.bf16 %v759_v47  ;;  %v749_v50 = vld [vmem:[%s821_s21 + $0x70] sm:$0xff]  }
  0x2a   : > { %v475_v62 = vmax.f32 %v443_v52, 0.0  ;;  %v349_v63 = vadd.f32 %v842_v11, %v310_v53  ;;  %v311_v1 = vmul.f32 %v643_v54, %v831_v0  ;;  %v647_v2 = vunpack.c.h.bf16 %v744_v46 }
  0x2b   : > { %506 = vst [vmem:[%s862_s6 + $0x68] sm:$0xff] %v474_v57  ;;  %v444_v3 = vadd.f32 %v703_v44, %v348_v58  ;;  %v312_v4 = vmul.f32 %v646_v59, %v831_v0  ;;  %v711_v5 = vunpack.c.h.bf16 %v759_v47  ;;  %v650_v6 = vunpack.c.l.bf16 %v745_v56  ;;  %v764_v59 = vld [vmem:[%s826_s24 + $0x70] sm:$0xff]  }
  0x2c   : > { %507 = vst [vmem:[%s862_s6 + $0x70] sm:$0xff] %v475_v62  ;;  %v445_v7 = vadd.f32 %v706_v51, %v349_v63  ;;  %v350_v8 = vadd.f32 %v842_v11, %v311_v1  ;;  %v313_v9 = vmul.f32 %v647_v2, %v831_v0  ;;  %v714_v10 = vunpack.c.l.bf16 %v760_v61 }
  0x2d   : > { %v476_v13 = vmax.f32 %v444_v3, 0.0  ;;  %v351_v14 = vadd.f32 %v842_v11, %v312_v4  ;;  %v314_v15 = vmul.f32 %v650_v6, %v831_v0  ;;  %v651_v16 = vunpack.c.h.bf16 %v745_v56 }
  0x2e   : > { %v477_v18 = vmax.f32 %v445_v7, 0.0  ;;  %v446_v19 = vadd.f32 %v707_v55, %v350_v8  ;;  %v352_v20 = vadd.f32 %v842_v11, %v313_v9  ;;  %v715_v21 = vunpack.c.h.bf16 %v760_v61 }
  0x2f   : > { %508 = vst [vmem:[%s862_s6 + $0x78] sm:$0xff] %v476_v13  ;;  %v447_v22 = vadd.f32 %v710_v60, %v351_v14  ;;  %v353_v23 = vadd.f32 %v842_v11, %v314_v15  ;;  %v315_v24 = vmul.f32 %v651_v16, %v831_v0  ;;  %v654_v25 = vunpack.c.l.bf16 %v746_v12 }
  0x30   : > { %509 = vst [vmem:[%s862_s6 + $0x80] sm:$0xff] %v477_v18  ;;  %v478_v27 = vmax.f32 %v446_v19, 0.0  ;;  %v448_v28 = vadd.f32 %v711_v5, %v352_v20  ;;  %v718_v29 = vunpack.c.l.bf16 %v761_v17  ;;  %v655_v30 = vunpack.c.h.bf16 %v746_v12  ;;  %v750_v5 = vld [vmem:[%s821_s21 + $0x78] sm:$0xff]  }
  0x31   : > { %v479_v32 = vmax.f32 %v447_v22, 0.0  ;;  %v449_v33 = vadd.f32 %v714_v10, %v353_v23  ;;  %v354_v34 = vadd.f32 %v842_v11, %v315_v24  ;;  %v316_v35 = vmul.f32 %v654_v25, %v831_v0  ;;  %v765_v10 = vld [vmem:[%s826_s24 + $0x78] sm:$0xff]  }
  0x32   : > { %510 = vst [vmem:[%s862_s6 + $0x88] sm:$0xff] %v478_v27  ;;  %v480_v36 = vmax.f32 %v448_v28, 0.0  ;;  %v317_v37 = vmul.f32 %v655_v30, %v831_v0  ;;  %v719_v38 = vunpack.c.h.bf16 %v761_v17  ;;  %v658_v39 = vunpack.c.l.bf16 %v747_v26 }
  0x33   : > { %511 = vst [vmem:[%s862_s6 + $0x90] sm:$0xff] %v479_v32  ;;  %v481_v42 = vmax.f32 %v449_v33, 0.0  ;;  %v450_v43 = vadd.f32 %v715_v21, %v354_v34  ;;  %v355_v44 = vadd.f32 %v842_v11, %v316_v35  ;;  %v722_v45 = vunpack.c.l.bf16 %v762_v31 }
  0x34   : > { %512 = vst [vmem:[%s862_s6 + $0x98] sm:$0xff] %v480_v36  ;;  %v356_v46 = vadd.f32 %v842_v11, %v317_v37  ;;  %v318_v47 = vmul.f32 %v658_v39, %v831_v0  ;;  %v659_v48 = vunpack.c.h.bf16 %v747_v26  ;;  %v723_v49 = vunpack.c.h.bf16 %v762_v31 }
  0x35   : > { %513 = vst [vmem:[%s862_s6 + $0xa0] sm:$0xff] %v481_v42  ;;  %v482_v51 = vmax.f32 %v450_v43, 0.0  ;;  %v451_v52 = vadd.f32 %v718_v29, %v355_v44  ;;  %v662_v53 = vunpack.c.l.bf16 %v748_v40  ;;  %v726_v54 = vunpack.c.l.bf16 %v763_v41 }
  0x36   : > { %v452_v55 = vadd.f32 %v719_v38, %v356_v46  ;;  %v357_v56 = vadd.f32 %v842_v11, %v318_v47  ;;  %v319_v57 = vmul.f32 %v659_v48, %v831_v0  ;;  %v663_v58 = vunpack.c.h.bf16 %v748_v40 }
  0x37   : > { %514 = vst [vmem:[%s862_s6 + $0xa8] sm:$0xff] %v482_v51  ;;  %v483_v60 = vmax.f32 %v451_v52, 0.0  ;;  %v320_v61 = vmul.f32 %v662_v53, %v831_v0  ;;  %v727_v62 = vunpack.c.h.bf16 %v763_v41  ;;  %v666_v63 = vunpack.c.l.bf16 %v749_v50 }
  0x38   : > { %v484_v1 = vmax.f32 %v452_v55, 0.0  ;;  %v453_v2 = vadd.f32 %v722_v45, %v357_v56  ;;  %v358_v3 = vadd.f32 %v842_v11, %v319_v57  ;;  %v321_v4 = vmul.f32 %v663_v58, %v831_v0 }
  0x39   : > { %515 = vst [vmem:[%s862_s6 + $0xb0] sm:$0xff] %v483_v60  ;;  %v359_v6 = vadd.f32 %v842_v11, %v320_v61  ;;  %v322_v7 = vmul.f32 %v666_v63, %v831_v0  ;;  %v730_v8 = vunpack.c.l.bf16 %v764_v59  ;;  %v667_v9 = vunpack.c.h.bf16 %v749_v50 }
  0x3a   : > { %516 = vst [vmem:[%s862_s6 + $0xb8] sm:$0xff] %v484_v1  ;;  %v485_v12 = vmax.f32 %v453_v2, 0.0  ;;  %v454_v13 = vadd.f32 %v723_v49, %v358_v3  ;;  %v360_v14 = vadd.f32 %v842_v11, %v321_v4  ;;  %v731_v15 = vunpack.c.h.bf16 %v764_v59 }
  0x3b   : > { %v455_v16 = vadd.f32 %v726_v54, %v359_v6  ;;  %v361_v17 = vadd.f32 %v842_v11, %v322_v7  ;;  %v323_v18 = vmul.f32 %v667_v9, %v831_v0  ;;  %v670_v19 = vunpack.c.l.bf16 %v750_v5 }
  0x3c   : > { %517 = vst [vmem:[%s862_s6 + $0xc0] sm:$0xff] %v485_v12  ;;  %v486_v20 = vmax.f32 %v454_v13, 0.0  ;;  %v456_v21 = vadd.f32 %v727_v62, %v360_v14  ;;  %v734_v22 = vunpack.c.l.bf16 %v765_v10  ;;  %v671_v23 = vunpack.c.h.bf16 %v750_v5 }
  0x3d   : > { %v487_v24 = vmax.f32 %v455_v16, 0.0  ;;  %v457_v25 = vadd.f32 %v730_v8, %v361_v17  ;;  %v362_v26 = vadd.f32 %v842_v11, %v323_v18  ;;  %v324_v27 = vmul.f32 %v670_v19, %v831_v0 }
  0x3e   : > { %518 = vst [vmem:[%s862_s6 + $0xc8] sm:$0xff] %v486_v20  ;;  %v488_v28 = vmax.f32 %v456_v21, 0.0  ;;  %v325_v29 = vmul.f32 %v671_v23, %v831_v0  ;;  %v735_v30 = vunpack.c.h.bf16 %v765_v10 }
  0x3f   : > { %519 = vst [vmem:[%s862_s6 + $0xd0] sm:$0xff] %v487_v24  ;;  %v489_v31 = vmax.f32 %v457_v25, 0.0  ;;  %v458_v32 = vadd.f32 %v731_v15, %v362_v26  ;;  %v363_v33 = vadd.f32 %v842_v11, %v324_v27 }
  0x40   : > { %520 = vst [vmem:[%s862_s6 + $0xd8] sm:$0xff] %v488_v28  ;;  %v364_v34 = vadd.f32 %v842_v11, %v325_v29 }
  0x41   : > { %521 = vst [vmem:[%s862_s6 + $0xe0] sm:$0xff] %v489_v31  ;;  %v490_v35 = vmax.f32 %v458_v32, 0.0  ;;  %v459_v36 = vadd.f32 %v734_v22, %v363_v33 }
  0x42   : > { %v460_v37 = vadd.f32 %v735_v30, %v364_v34 }
  0x43   : > { %522 = vst [vmem:[%s862_s6 + $0xe8] sm:$0xff] %v490_v35  ;;  %v491_v38 = vmax.f32 %v459_v36, 0.0 }
  0x44   : > { %v492_v39 = vmax.f32 %v460_v37, 0.0 }
  0x45   : > { %523 = vst [vmem:[%s862_s6 + $0xf0] sm:$0xff] %v491_v38 }
  0x46   : > { %524 = vst [vmem:[%s862_s6 + $0xf8] sm:$0xff] %v492_v39 }
  0x47 PF: > { %s14_s15 = sadd.s32 1, %s780_s15  }
  0x48   : > { %p11_p4 = scmp.ge.s32.totalorder %s14_s15, 4  }
  0x4a   :  { %13 = sbr.rel (!%p11_p4) target bundleno = 1 (0x1), region = 69 }

// kernel: bottleneck2_forward.8
= control target key start
LH: loop header
LB: loop body
LE: loop exit
PB: predicated region body
PF: predicated region fallthrough
CT: control target
= control target key end

     0   :  { %s1413_s18 = smov 0   ;;  %s1681_s0 = inlined_call_operand.vmem [shape: bf16[512,128], index: 0, kind: input, shape index: {}]   ;;  %s1682_s1 = inlined_call_operand.vmem [shape: f32[1,128], index: 1, kind: input, shape index: {}]   ;;  %s1683_s2 = inlined_call_operand.vmem [shape: f32[1,128], index: 2, kind: input, shape index: {}]   ;;  %s1684_s3 = inlined_call_operand.vmem [shape: bf16[128,128], index: 3, kind: input, shape index: {}]   ;;  %s1685_s4 = inlined_call_operand.vmem [shape: bf16[512,128], index: 4, kind: output, shape index: {0}]   ;;  %s1686_s5 = inlined_call_operand.vmem [shape: f32[2,2,128], index: 5, kind: output, shape index: {1}]  }
   0x1 LB: > { %s1419_s19 = sadd.s32 4294967295, %s1381_s18   ;;  %p1015_p0 = scmp.ge.s32.totalorder %s1381_s18, 1  ;;  %s1381_s18 = sphi %s1413_s18, %s16_s18  }
   0x2   : > { %p191_p1 = scmp.lt.s32.totalorder %s1381_s18, 3 }
   0x4   : > { %p192_p2 = pnand %p1015_p0, %p191_p1 }
   0x5   : > { %v1367_v0 = vld [vmem:[%s1684_s3] sm:$0xff] (!%p192_p2)   ;;  %s1016_s22 = sshll.u32 (!%p192_p2), %s1419_s19, 5  ;;  %v1368_v1 = vld [vmem:[%s1684_s3 + $0x8] sm:$0xff] (!%p192_p2)   ;;  %v1369_v2 = vld [vmem:[%s1684_s3 + $0x10] sm:$0xff] (!%p192_p2)   ;;  %p235_p4 = scmp.lt.s32.totalorder (!%p192_p2), %s1419_s19, 1  ;;  %vm921_vm0 = vcmask (!%p192_p2), 1040384  }
   0x6   : > { %195 = sbr.rel (%p192_p2) target bundleno = 331 (0x14b), region = 36  ;;  %p224_p3 = scmp.lt.s32.totalorder (!%p192_p2), %s1016_s22, 63  ;;  %1295 = vmatprep.subr.bf16.mxu0 (!%p192_p2), %v1367_v0  ;;  %1343 = vmatprep.subr.bf16.mxu1 (!%p192_p2), %v1367_v0  ;;  %v1370_v3 = vld [vmem:[%s1684_s3 + $0x18] sm:$0xff] (!%p192_p2)   ;;  %v1450_v5 = vld [vmem:[%s1682_s1] ss:$0 sm:$0xff] (!%p192_p2)  ;;  %v1372_v34 = vld [vmem:[%s1684_s3 + $0x28] sm:$0xff] (!%p192_p2)  }
   0x7   : > { %1296 = vmatpush3.bf16.msra.mxu0 (!%p192_p2), %v1367_v0  ;;  %1351 = vmatpush3.bf16.msra.mxu1 (!%p192_p2), %v1367_v0  ;;  %v1458_v11 = vld [vmem:[%s1683_s2] ss:$0 sm:$0xff] (!%p192_p2)  ;;  %v1373_v49 = vld [vmem:[%s1684_s3 + $0x30] sm:$0xff] (!%p192_p2)   ;;  %v1374_v63 = vld [vmem:[%s1684_s3 + $0x38] sm:$0xff] (!%p192_p2)  }
   0x8   : > { %1297 = vmatprep.subr.bf16.mxu0 (!%p192_p2), %v1368_v1  ;;  %1344 = vmatprep.subr.bf16.mxu1 (!%p192_p2), %v1368_v1  ;;  %v1371_v20 = vld [vmem:[%s1684_s3 + $0x20] sm:$0xff] (!%p192_p2)  }
   0xb   : > { %1298 = vmatpush3.bf16.msra.mxu0 (!%p192_p2), %v1368_v1  ;;  %1352 = vmatpush3.bf16.msra.mxu1 (!%p192_p2), %v1368_v1 }
   0xc   : > { %1299 = vmatprep.subr.bf16.mxu0 (!%p192_p2), %v1369_v2  ;;  %1345 = vmatprep.subr.bf16.mxu1 (!%p192_p2), %v1369_v2 }
   0xd   : > { %s1688_s22 = smov (!%p224_p3, %s1016_s22), 63  ;;  %s1690_s19 = smov (!%p235_p4, %s1419_s19), 1 }
   0xe   : > { %s1017_s27 = sshll.u32 %s1688_s22, 2  ;;  %s1020_s22 = sshll.u32 %s1690_s19, 1 }
   0xf   : > { %s1441_s30 = scalar_lea.vmem %s1681_s0, %s1017_s27  ;;  %1300 = vmatpush3.bf16.msra.mxu0 %v1369_v2  ;;  %1353 = vmatpush3.bf16.msra.mxu1 %v1369_v2  ;;  %s1583_s25 = scalar_lea.vmem %s1685_s4, %s1017_s27 }
  0x10   : > { %v1098_v4 = vld [vmem:[%s1441_s30] sm:$0xff]   ;;  %v1241_v8 = vld [vmem:[%s1441_s30 + $0x8] sm:$0xff]   ;;  %v1242_v9 = vld [vmem:[%s1441_s30 + $0x10] sm:$0xff]   ;;  %1301 = vmatprep.subr.bf16.mxu0 %v1370_v3  ;;  %1346 = vmatprep.subr.bf16.mxu1 %v1370_v3  ;;  %s238_s28 = scalar_lea.vmem %s1686_s5, %s1020_s22 }
  0x11   : > { %v1099_v6 = vunpack.c.l.bf16 %v1098_v4  ;;  %v1100_v7 = vunpack.c.h.bf16 %v1098_v4  ;;  %v1243_v10 = vld [vmem:[%s1441_s30 + $0x18] sm:$0xff]   ;;  %v1103_v12 = vunpack.c.l.bf16 %v1241_v8  ;;  %v1104_v13 = vunpack.c.h.bf16 %v1241_v8  ;;  %v1244_v29 = vld [vmem:[%s1441_s30 + $0x20] sm:$0xff]   ;;  %v1245_v33 = vld [vmem:[%s1441_s30 + $0x28] sm:$0xff]  }
  0x12   : > { %v1107_v14 = vunpack.c.l.bf16 %v1242_v9  ;;  %v1108_v15 = vunpack.c.h.bf16 %v1242_v9  ;;  %v1111_v18 = vunpack.c.l.bf16 %v1243_v10  ;;  %v1112_v19 = vunpack.c.h.bf16 %v1243_v10  ;;  %v1246_v42 = vld [vmem:[%s1441_s30 + $0x30] sm:$0xff]   ;;  %v1487_v48 = vld [vmem:[%s1441_s30 + $0x38] sm:$0xff]   ;;  %v1248_v60 = vld [vmem:[%s1441_s30 + $0x40] sm:$0xff]  }
  0x13   : > { %v311_v16 = vmul.f32 %v1099_v6, %v1450_v5  ;;  %v312_v17 = vmul.f32 %v1100_v7, %v1450_v5  ;;  %v313_v21 = vmul.f32 %v1103_v12, %v1450_v5  ;;  %v314_v22 = vmul.f32 %v1104_v13, %v1450_v5  ;;  %1302 = vmatpush3.bf16.msra.mxu0 %v1370_v3  ;;  %v1250_v9 = vld [vmem:[%s1441_s30 + $0x50] sm:$0xff]  }
  0x14   : > { %v315_v23 = vmul.f32 %v1107_v14, %v1450_v5  ;;  %v316_v24 = vmul.f32 %v1108_v15, %v1450_v5  ;;  %v317_v27 = vmul.f32 %v1111_v18, %v1450_v5  ;;  %v318_v28 = vmul.f32 %v1112_v19, %v1450_v5  ;;  %1354 = vmatpush3.bf16.msra.mxu1 %v1370_v3  ;;  %v1249_v3 = vld [vmem:[%s1441_s30 + $0x48] sm:$0xff]   ;;  %v1251_v19 = vld [vmem:[%s1441_s30 + $0x58] sm:$0xff]  }
  0x15   : > { %v350_v25 = vadd.f32 %v1458_v11, %v311_v16  ;;  %v351_v26 = vadd.f32 %v1458_v11, %v312_v17  ;;  %v352_v32 = vadd.f32 %v1458_v11, %v313_v21  ;;  %1303 = vmatprep.subr.bf16.mxu0 %v1371_v20  ;;  %v353_v35 = vadd.f32 %v1458_v11, %v314_v22 }
  0x16   : > { %v354_v36 = vadd.f32 %v1458_v11, %v315_v23  ;;  %v355_v37 = vadd.f32 %v1458_v11, %v316_v24  ;;  %1347 = vmatprep.subr.bf16.mxu1 %v1371_v20  ;;  %v356_v39 = vadd.f32 %v1458_v11, %v317_v27  ;;  %v357_v40 = vadd.f32 %v1458_v11, %v318_v28 }
  0x17   : > { %v382_v30 = vmax.f32 %v350_v25, 0.0  ;;  %v383_v31 = vmax.f32 %v351_v26, 0.0  ;;  %v1115_v41 = vunpack.c.l.bf16 %v1244_v29  ;;  %v1116_v43 = vunpack.c.h.bf16 %v1244_v29  ;;  %1304 = vmatpush3.bf16.msra.mxu0 %v1371_v20 }
  0x18   : > { %v1119_v44 = vunpack.c.l.bf16 %v1245_v33  ;;  %v384_v45 = vmax.f32 %v352_v32, 0.0  ;;  %v1120_v47 = vunpack.c.h.bf16 %v1245_v33  ;;  %1305 = vmatprep.subr.bf16.mxu0 %v1372_v34  ;;  %v385_v50 = vmax.f32 %v353_v35, 0.0  ;;  %1355 = vmatpush3.bf16.msra.mxu1 %v1371_v20  ;;  %v1252_v32 = vld [vmem:[%s1441_s30 + $0x60] sm:$0xff]  }
  0x19   : > { %v414_v38 = vpack.c.bf16 %v383_v31, %v382_v30  ;;  %v319_v46 = vmul.f32 %v1115_v41, %v1450_v5  ;;  %v386_v51 = vmax.f32 %v354_v36, 0.0  ;;  %v387_v52 = vmax.f32 %v355_v37, 0.0  ;;  %1348 = vmatprep.subr.bf16.mxu1 %v1372_v34 }
  0x1a   : > { %v1123_v53 = vunpack.c.l.bf16 %v1246_v42  ;;  %v388_v54 = vmax.f32 %v356_v39, 0.0  ;;  %v389_v55 = vmax.f32 %v357_v40, 0.0  ;;  %v320_v56 = vmul.f32 %v1116_v43, %v1450_v5 }
  0x1b   : > { %1311 = vmatprep.mubr.bf16.mxu0 %v414_v38  ;;  %v321_v57 = vmul.f32 %v1119_v44, %v1450_v5  ;;  %v1124_v58 = vunpack.c.h.bf16 %v1246_v42  ;;  %v1127_v59 = vunpack.c.l.bf16 %v1487_v48  ;;  %1306 = vmatpush3.bf16.msra.mxu0 %v1372_v34  ;;  %v1497_v61 = vadd.f32 %v1458_v11, %v319_v46 }
  0x1c   : > { %v322_v62 = vmul.f32 %v1120_v47, %v1450_v5  ;;  %1307 = vmatprep.subr.bf16.mxu0 %v1373_v49  ;;  %v415_v0 = vpack.c.bf16 %v385_v50, %v384_v45  ;;  %v416_v1 = vpack.c.bf16 %v387_v52, %v386_v51  ;;  %1356 = vmatpush3.bf16.msra.mxu1 %v1372_v34  ;;  %v1128_v7 = vunpack.c.h.bf16 %v1487_v48  ;;  %v1253_v45 = vld [vmem:[%s1441_s30 + $0x68] sm:$0xff]  }
  0x1d   : > { %v323_v2 = vmul.f32 %v1123_v53, %v1450_v5  ;;  %v1505_v4 = vpack.c.bf16 %v389_v55, %v388_v54  ;;  %v1508_v6 = vadd.f32 %v1458_v11, %v320_v56  ;;  %1349 = vmatprep.subr.bf16.mxu1 %v1373_v49  ;;  %v1131_v8 = vunpack.c.l.bf16 %v1248_v60  ;;  %v1254_v55 = vld [vmem:[%s1441_s30 + $0x70] sm:$0xff]  }
  0x1e   : > { %v1513_v10 = vadd.f32 %v1458_v11, %v321_v57  ;;  %v1516_v12 = vmul.f32 %v1124_v58, %v1450_v5  ;;  %v1519_v13 = vmul.f32 %v1127_v59, %v1450_v5  ;;  %v1132_v14 = vunpack.c.h.bf16 %v1248_v60 }
  0x1f   : > { %1308 = vmatpush3.bf16.msra.mxu0 %v1373_v49  ;;  %v390_v15 = vmax.f32 %v1497_v61, 0.0  ;;  %v1523_v16 = vadd.f32 %v1458_v11, %v322_v62  ;;  %v327_v17 = vmul.f32 %v1131_v8, %v1450_v5  ;;  %v1135_v18 = vunpack.c.l.bf16 %v1249_v3 }
  0x20   : > { %1309 = vmatprep.subr.bf16.mxu0 %v1374_v63  ;;  %1357 = vmatpush3.bf16.msra.mxu1 %v1373_v49  ;;  %v1528_v20 = vadd.f32 %v1458_v11, %v323_v2  ;;  %v328_v21 = vmul.f32 %v1132_v14, %v1450_v5  ;;  %v1136_v22 = vunpack.c.h.bf16 %v1249_v3  ;;  %v1139_v23 = vunpack.c.l.bf16 %v1250_v9 }
  0x21   : > { %v391_v24 = vmax.f32 %v1508_v6, 0.0  ;;  %1350 = vmatprep.subr.bf16.mxu1 %v1374_v63  ;;  %v366_v25 = vadd.f32 %v1458_v11, %v327_v17  ;;  %v329_v26 = vmul.f32 %v1135_v18, %v1450_v5  ;;  %v1140_v27 = vunpack.c.h.bf16 %v1250_v9  ;;  %v1255_v17 = vld [vmem:[%s1441_s30 + $0x78] sm:$0xff]  }
  0x22   : > { %v367_v28 = vadd.f32 %v1458_v11, %v328_v21  ;;  %v330_v29 = vmul.f32 %v1136_v22, %v1450_v5  ;;  %v331_v30 = vmul.f32 %v1139_v23, %v1450_v5  ;;  %v1143_v31 = vunpack.c.l.bf16 %v1251_v19 }
  0x23   : > { %1310 = vmatpush3.bf16.msra.mxu0 %v1374_v63  ;;  %v398_v33 = vmax.f32 %v366_v25, 0.0  ;;  %v368_v34 = vadd.f32 %v1458_v11, %v329_v26  ;;  %v332_v35 = vmul.f32 %v1140_v27, %v1450_v5  ;;  %v1144_v36 = vunpack.c.h.bf16 %v1251_v19 }
  0x24   : > { %1358 = vmatpush3.bf16.msra.mxu1 %v1374_v63  ;;  %v399_v37 = vmax.f32 %v367_v28, 0.0  ;;  %v369_v38 = vadd.f32 %v1458_v11, %v330_v29  ;;  %v370_v39 = vadd.f32 %v1458_v11, %v331_v30  ;;  %v333_v40 = vmul.f32 %v1143_v31, %v1450_v5 }
  0x25   : > { %v400_v41 = vmax.f32 %v368_v34, 0.0  ;;  %v371_v42 = vadd.f32 %v1458_v11, %v332_v35  ;;  %v334_v43 = vmul.f32 %v1144_v36, %v1450_v5  ;;  %v1147_v44 = vunpack.c.l.bf16 %v1252_v32 }
  0x26   : > { %1312 = vmatmul.mubr.bf16.vlgmr.msra.gmra.mrb[0].mxu0 %v415_v0  ;;  %v422_v46 = vpack.c.bf16 %v399_v37, %v398_v33  ;;  %v401_v47 = vmax.f32 %v369_v38, 0.0  ;;  %v402_v49 = vmax.f32 %v370_v39, 0.0  ;;  %v372_v50 = vadd.f32 %v1458_v11, %v333_v40 }
  0x27   : > { %1315 = vmatprep.mubr.bf16.mxu0 %v416_v1  ;;  %v403_v51 = vmax.f32 %v371_v42, 0.0  ;;  %v373_v52 = vadd.f32 %v1458_v11, %v334_v43  ;;  %v1148_v53 = vunpack.c.h.bf16 %v1252_v32  ;;  %v335_v54 = vmul.f32 %v1147_v44, %v1450_v5 }
  0x28   : > { %1327 = vmatprep.mubr.bf16.mxu1 %v422_v46  ;;  %v423_v56 = vpack.c.bf16 %v401_v47, %v400_v41  ;;  %v404_v57 = vmax.f32 %v372_v50, 0.0  ;;  %v1151_v58 = vunpack.c.l.bf16 %v1253_v45  ;;  %v1152_v59 = vunpack.c.h.bf16 %v1253_v45 }
  0x29   : > { %v424_v60 = vpack.c.bf16 %v403_v51, %v402_v49  ;;  %v405_v61 = vmax.f32 %v373_v52, 0.0  ;;  %v336_v62 = vmul.f32 %v1148_v53, %v1450_v5  ;;  %v374_v63 = vadd.f32 %v1458_v11, %v335_v54 }
  0x2a   : > { %1328 = vmatmul.mubr.bf16.vlgmr.msra.gmra.mrb[0].mxu1 %v423_v56  ;;  %v337_v0 = vmul.f32 %v1151_v58, %v1450_v5  ;;  %v338_v1 = vmul.f32 %v1152_v59, %v1450_v5  ;;  %v1155_v2 = vunpack.c.l.bf16 %v1254_v55  ;;  %v1156_v3 = vunpack.c.h.bf16 %v1254_v55 }
  0x2b   : > { %v418_v6 = vpack.c.bf16 %v391_v24, %v390_v15  ;;  %v363_v8 = vadd.f32 %v1458_v11, %v1516_v12  ;;  %1331 = vmatprep.mubr.bf16.mxu1 %v424_v60  ;;  %v375_v9 = vadd.f32 %v1458_v11, %v336_v62  ;;  %v406_v14 = vmax.f32 %v374_v63, 0.0 }
  0x2c   : > { %v392_v18 = vmax.f32 %v1513_v10, 0.0  ;;  %v326_v19 = vmul.f32 %v1128_v7, %v1450_v5  ;;  %v339_v21 = vmul.f32 %v1155_v2, %v1450_v5  ;;  %v340_v22 = vmul.f32 %v1156_v3, %v1450_v5 }
  0x2d   : > { %v393_v15 = vmax.f32 %v1523_v16, 0.0  ;;  %v394_v23 = vmax.f32 %v1528_v20, 0.0  ;;  %v425_v12 = vpack.c.bf16 %v405_v61, %v404_v57  ;;  %v407_v24 = vmax.f32 %v375_v9, 0.0 }
  0x2e   : > { %1316 = vmatmul.mubr.bf16.gmra.mrb[4].mxu0 %v1505_v4  ;;  %v376_v25 = vadd.f32 %v1458_v11, %v337_v0  ;;  %v377_v10 = vadd.f32 %v1458_v11, %v338_v1  ;;  %v1159_v26 = vunpack.c.l.bf16 %v1255_v17  ;;  %v1160_v27 = vunpack.c.h.bf16 %v1255_v17 }
  0x2f   : > { %1319 = vmatprep.mubr.bf16.mxu0 %v418_v6  ;;  %v395_v48 = vmax.f32 %v363_v8, 0.0  ;;  %v426_v7 = vpack.c.bf16 %v407_v24, %v406_v14  ;;  %v378_v28 = vadd.f32 %v1458_v11, %v339_v21  ;;  %v379_v29 = vadd.f32 %v1458_v11, %v340_v22 }
  0x30   : > { %v419_v16 = vpack.c.bf16 %v393_v15, %v392_v18  ;;  %v364_v20 = vadd.f32 %v1458_v11, %v1519_v13  ;;  %v365_v30 = vadd.f32 %v1458_v11, %v326_v19  ;;  %v408_v4 = vmax.f32 %v376_v25, 0.0 }
  0x31   : > { %v409_v31 = vmax.f32 %v377_v10, 0.0  ;;  %v341_v32 = vmul.f32 %v1159_v26, %v1450_v5  ;;  %v342_v33 = vmul.f32 %v1160_v27, %v1450_v5  ;;  %v420_v34 = vpack.c.bf16 %v395_v48, %v394_v23 }
  0x32   : > { %1332 = vmatmul.mubr.bf16.gmra.mrb[4].mxu1 %v425_v12  ;;  %v410_v35 = vmax.f32 %v378_v28, 0.0  ;;  %v411_v36 = vmax.f32 %v379_v29, 0.0  ;;  %v396_v37 = vmax.f32 %v364_v20, 0.0  ;;  %v397_v38 = vmax.f32 %v365_v30, 0.0 }
  0x33   : > { %1335 = vmatprep.mubr.bf16.mxu1 %v426_v7  ;;  %v427_v39 = vpack.c.bf16 %v409_v31, %v408_v4  ;;  %v380_v13 = vadd.f32 %v1458_v11, %v341_v32  ;;  %v381_v40 = vadd.f32 %v1458_v11, %v342_v33 }
  0x34   : > { %v428_v41 = vpack.c.bf16 %v411_v36, %v410_v35  ;;  %v421_v42 = vpack.c.bf16 %v397_v38, %v396_v37 }
  0x35   : > { %v412_v43 = vmax.f32 %v380_v13, 0.0  ;;  %v413_v44 = vmax.f32 %v381_v40, 0.0 }
  0x36   : > { %1320 = vmatmul.mubr.bf16.gmra.mrb[8].mxu0 %v419_v16 }
  0x37   : > { %1323 = vmatprep.mubr.bf16.mxu0 %v420_v34  ;;  %v429_v5 = vpack.c.bf16 %v413_v44, %v412_v43 }
  0x3a   : > { %1336 = vmatmul.mubr.bf16.gmra.mrb[8].mxu1 %v427_v39 }
  0x3b   : > { %1339 = vmatprep.mubr.bf16.mxu1 %v428_v41 }
  0x3e   : > { %1324 = vmatmul.mubr.bf16.gmra.mrb[12].mxu0 %v421_v42 }
  0x42   : > { %1340 = vmatmul.mubr.bf16.gmra.mrb[12].mxu1 %v429_v5 }
  0xf9   : > { %v1313_v45 = vpop.f32.mrb[0].mxu0 }
  0xfa   : > { %v528_v46 = vpop.f32.mrb[1].mxu0  ;;  %v854_v56 = vmul.f32 %v1313_v45, %v1313_v45 }
  0xfb   : > { %v1314_v11 = vpop.f32.mrb[2].mxu0  ;;  %v852_v50 = vmul.f32 %v528_v46, %v528_v46 }
  0xfc   : > { %v1169_v47 = vpack.c.bf16 %v1314_v11, %v1313_v45  ;;  %v531_v49 = vpop.f32.mrb[3].mxu0  ;;  %v855_v62 = vmul.f32 %v1314_v11, %v1314_v11 }
  0xfd   : > { %v1164_v51 = vpack.c.bf16 %v531_v49, %v528_v46  ;;  %v815_v52 = vadd.f32 %v531_v49, %v528_v46  ;;  %v853_v53 = vmul.f32 %v531_v49, %v531_v49  ;;  %v1585_v54 = vpop.f32.mrb[0].mxu1 }
  0xfe   : > { %1256 = vst [vmem:[%s1583_s25 + $0x8] sm:$0xff] %v1169_v47   ;;  %v1588_v55 = vpop.f32.mrb[1].mxu1 }
  0xff   : > { %1165 = vst [vmem:[%s1583_s25] sm:$0xff] %v1164_v51   ;;  %v816_v57 = vadd.f32 %v1313_v45, %v815_v52  ;;  %v884_v58 = vadd.f32 %v853_v53, %v852_v50  ;;  %v1591_v59 = vpop.f32.mrb[2].mxu1 }
 0x100   : > { %v1209_v60 = vpack.c.bf16 %v1591_v59, %v1585_v54  ;;  %v1595_v61 = vpop.f32.mrb[3].mxu1 }
 0x101   : > { %v885_v63 = vadd.f32 %v884_v58, %v854_v56  ;;  %v1317_v0 = vpop.f32.mrb[4].mxu0  ;;  %v817_v1 = vadd.f32 %v1314_v11, %v816_v57  ;;  %v1204_v2 = vpack.c.bf16 %v1595_v61, %v1588_v55 }
 0x102   : > { %v544_v3 = vpop.f32.mrb[5].mxu0  ;;  %1264 = vst [vmem:[%s1583_s25 + $0x48] sm:$0xff] %v1209_v60   ;;  %v858_v24 = vmul.f32 %v1317_v0, %v1317_v0 }
 0x103   : > { %v818_v6 = vadd.f32 %v817_v1, %v544_v3  ;;  %v856_v8 = vmul.f32 %v544_v3, %v544_v3  ;;  %v886_v9 = vadd.f32 %v885_v63, %v855_v62  ;;  %v1318_v14 = vpop.f32.mrb[6].mxu0  ;;  %1263 = vst [vmem:[%s1583_s25 + $0x40] sm:$0xff] %v1204_v2  }
 0x104   : > { %v1179_v17 = vpack.c.bf16 %v1318_v14, %v1317_v0  ;;  %v547_v18 = vpop.f32.mrb[7].mxu0  ;;  %v859_v7 = vmul.f32 %v1318_v14, %v1318_v14 }
 0x105   : > { %v887_v19 = vadd.f32 %v886_v9, %v856_v8  ;;  %v1174_v21 = vpack.c.bf16 %v547_v18, %v544_v3  ;;  %v819_v22 = vadd.f32 %v818_v6, %v547_v18  ;;  %v857_v15 = vmul.f32 %v547_v18, %v547_v18  ;;  %v1601_v23 = vpop.f32.mrb[4].mxu1 }
 0x106   : > { %1258 = vst [vmem:[%s1583_s25 + $0x18] sm:$0xff] %v1179_v17   ;;  %v1604_v12 = vpop.f32.mrb[5].mxu1  ;;  %v868_v17 = vmul.f32 %v1588_v55, %v1588_v55 }
 0x107   : > { %1257 = vst [vmem:[%s1583_s25 + $0x10] sm:$0xff] %v1174_v21   ;;  %v820_v25 = vadd.f32 %v1317_v0, %v819_v22  ;;  %v888_v10 = vadd.f32 %v887_v19, %v857_v15  ;;  %v1607_v26 = vpop.f32.mrb[6].mxu1 }
 0x108   : > { %v1219_v27 = vpack.c.bf16 %v1607_v26, %v1601_v23  ;;  %v1611_v48 = vpop.f32.mrb[7].mxu1 }
 0x109   : > { %v889_v28 = vadd.f32 %v888_v10, %v858_v24  ;;  %v1321_v29 = vpop.f32.mrb[8].mxu0  ;;  %v821_v16 = vadd.f32 %v1318_v14, %v820_v25  ;;  %v1214_v20 = vpack.c.bf16 %v1611_v48, %v1604_v12 }
 0x10a   : > { %v560_v30 = vpop.f32.mrb[9].mxu0  ;;  %1266 = vst [vmem:[%s1583_s25 + $0x58] sm:$0xff] %v1219_v27   ;;  %v862_v41 = vmul.f32 %v1321_v29, %v1321_v29 }
 0x10b   : > { %v822_v4 = vadd.f32 %v821_v16, %v560_v30  ;;  %v860_v31 = vmul.f32 %v560_v30, %v560_v30  ;;  %v890_v32 = vadd.f32 %v889_v28, %v859_v7  ;;  %v1322_v33 = vpop.f32.mrb[10].mxu0  ;;  %1265 = vst [vmem:[%s1583_s25 + $0x50] sm:$0xff] %v1214_v20   ;;  %v869_v28 = vmul.f32 %v1595_v61, %v1595_v61 }
 0x10c   : > { %v1189_v34 = vpack.c.bf16 %v1322_v33, %v1321_v29  ;;  %v563_v35 = vpop.f32.mrb[11].mxu0  ;;  %v863_v46 = vmul.f32 %v1322_v33, %v1322_v33 }
 0x10d   : > { %v891_v36 = vadd.f32 %v890_v32, %v860_v31  ;;  %v1184_v37 = vpack.c.bf16 %v563_v35, %v560_v30  ;;  %v823_v38 = vadd.f32 %v822_v4, %v563_v35  ;;  %v861_v39 = vmul.f32 %v563_v35, %v563_v35  ;;  %v1617_v13 = vpop.f32.mrb[8].mxu1 }
 0x10e   : > { %1260 = vst [vmem:[%s1583_s25 + $0x28] sm:$0xff] %v1189_v34   ;;  %v1620_v40 = vpop.f32.mrb[9].mxu1  ;;  %v871_v30 = vmul.f32 %v1591_v59, %v1591_v59  ;;  %v872_v31 = vmul.f32 %v1604_v12, %v1604_v12  ;;  %v873_v35 = vmul.f32 %v1611_v48, %v1611_v48 }
 0x10f   : > { %1259 = vst [vmem:[%s1583_s25 + $0x20] sm:$0xff] %v1184_v37   ;;  %v824_v42 = vadd.f32 %v1321_v29, %v823_v38  ;;  %v892_v43 = vadd.f32 %v891_v36, %v861_v39  ;;  %v1623_v44 = vpop.f32.mrb[10].mxu1  ;;  %v870_v29 = vmul.f32 %v1585_v54, %v1585_v54 }
 0x110   : > { %v1229_v5 = vpack.c.bf16 %v1623_v44, %v1617_v13  ;;  %v1627_v45 = vpop.f32.mrb[11].mxu1 }
 0x111   : > { %v893_v11 = vadd.f32 %v892_v43, %v862_v41  ;;  %v1325_v47 = vpop.f32.mrb[12].mxu0  ;;  %v825_v49 = vadd.f32 %v1322_v33, %v824_v42  ;;  %v1224_v50 = vpack.c.bf16 %v1627_v45, %v1620_v40 }
 0x112   : > { %v576_v51 = vpop.f32.mrb[13].mxu0  ;;  %1268 = vst [vmem:[%s1583_s25 + $0x68] sm:$0xff] %v1229_v5   ;;  %v866_v6 = vmul.f32 %v1325_v47, %v1325_v47  ;;  %v877_v5 = vmul.f32 %v1627_v45, %v1627_v45 }
 0x113   : > { %v826_v52 = vadd.f32 %v825_v49, %v576_v51  ;;  %v864_v53 = vmul.f32 %v576_v51, %v576_v51  ;;  %v894_v56 = vadd.f32 %v893_v11, %v863_v46  ;;  %v1326_v57 = vpop.f32.mrb[14].mxu0  ;;  %1267 = vst [vmem:[%s1583_s25 + $0x60] sm:$0xff] %v1224_v50  }
 0x114   : > { %v1199_v58 = vpack.c.bf16 %v1326_v57, %v1325_v47  ;;  %v579_v60 = vpop.f32.mrb[15].mxu0  ;;  %v867_v21 = vmul.f32 %v1326_v57, %v1326_v57 }
 0x115   : > { %v895_v62 = vadd.f32 %v894_v56, %v864_v53  ;;  %v1194_v63 = vpack.c.bf16 %v579_v60, %v576_v51  ;;  %v827_v0 = vadd.f32 %v826_v52, %v579_v60  ;;  %v865_v1 = vmul.f32 %v579_v60, %v579_v60  ;;  %v1341_v2 = vpop.f32.mrb[12].mxu1 }
 0x116   : > { %1262 = vst [vmem:[%s1583_s25 + $0x38] sm:$0xff] %v1199_v58   ;;  %v640_v3 = vpop.f32.mrb[13].mxu1  ;;  %v882_v56 = vmul.f32 %v1341_v2, %v1341_v2 }
 0x117   : > { %1261 = vst [vmem:[%s1583_s25 + $0x30] sm:$0xff] %v1194_v63   ;;  %v828_v8 = vadd.f32 %v1325_v47, %v827_v0  ;;  %v896_v9 = vadd.f32 %v895_v62, %v865_v1  ;;  %v1342_v14 = vpop.f32.mrb[14].mxu1  ;;  %v880_v49 = vmul.f32 %v640_v3, %v640_v3 }
 0x118   : > { %v1239_v18 = vpack.c.bf16 %v1342_v14, %v1341_v2  ;;  %v643_v19 = vpop.f32.mrb[15].mxu1  ;;  %v883_v60 = vmul.f32 %v1342_v14, %v1342_v14 }
 0x119   : > { %v897_v22 = vadd.f32 %v896_v9, %v866_v6  ;;  %v829_v15 = vadd.f32 %v1326_v57, %v828_v8  ;;  %v1234_v24 = vpack.c.bf16 %v643_v19, %v640_v3 }
 0x11a   : > { %1270 = vst [vmem:[%s1583_s25 + $0x78] sm:$0xff] %v1239_v18  }
 0x11b   : > { %v830_v25 = vadd.f32 %v829_v15, %v1588_v55  ;;  %v898_v10 = vadd.f32 %v897_v22, %v867_v21  ;;  %1269 = vst [vmem:[%s1583_s25 + $0x70] sm:$0xff] %v1234_v24  }
 0x11d   : > { %v899_v27 = vadd.f32 %v898_v10, %v868_v17  ;;  %v831_v7 = vadd.f32 %v830_v25, %v1595_v61 }
 0x11f   : > { %v832_v16 = vadd.f32 %v1585_v54, %v831_v7  ;;  %v900_v20 = vadd.f32 %v899_v27, %v869_v28  ;;  %v874_v54 = vmul.f32 %v1601_v23, %v1601_v23 }
 0x121   : > { %v901_v4 = vadd.f32 %v900_v20, %v870_v29  ;;  %v833_v55 = vadd.f32 %v1591_v59, %v832_v16  ;;  %v875_v59 = vmul.f32 %v1607_v26, %v1607_v26 }
 0x123   : > { %v834_v32 = vadd.f32 %v833_v55, %v1604_v12  ;;  %v902_v33 = vadd.f32 %v901_v4, %v871_v30  ;;  %v876_v12 = vmul.f32 %v1620_v40, %v1620_v40 }
 0x125   : > { %v903_v34 = vadd.f32 %v902_v33, %v872_v31  ;;  %v835_v61 = vadd.f32 %v834_v32, %v1611_v48 }
 0x127   : > { %v836_v36 = vadd.f32 %v1601_v23, %v835_v61  ;;  %v904_v37 = vadd.f32 %v903_v34, %v873_v35  ;;  %v878_v23 = vmul.f32 %v1617_v13, %v1617_v13 }
 0x129   : > { %v905_v38 = vadd.f32 %v904_v37, %v874_v54  ;;  %v837_v39 = vadd.f32 %v1607_v26, %v836_v36  ;;  %v879_v26 = vmul.f32 %v1623_v44, %v1623_v44 }
 0x12b   : > { %v838_v41 = vadd.f32 %v837_v39, %v1620_v40  ;;  %v906_v42 = vadd.f32 %v905_v38, %v875_v59 }
 0x12d   : > { %v907_v43 = vadd.f32 %v906_v42, %v876_v12  ;;  %v839_v48 = vadd.f32 %v838_v41, %v1627_v45  ;;  %v881_v45 = vmul.f32 %v643_v19, %v643_v19 }
 0x12f   : > { %v840_v46 = vadd.f32 %v1617_v13, %v839_v48  ;;  %v908_v11 = vadd.f32 %v907_v43, %v877_v5 }
 0x131   : > { %v909_v47 = vadd.f32 %v908_v11, %v878_v23  ;;  %v841_v40 = vadd.f32 %v1623_v44, %v840_v46 }
 0x133   : > { %v842_v50 = vadd.f32 %v841_v40, %v640_v3  ;;  %v910_v51 = vadd.f32 %v909_v47, %v879_v26 }
 0x135   : > { %v911_v52 = vadd.f32 %v910_v51, %v880_v49  ;;  %v843_v53 = vadd.f32 %v842_v50, %v643_v19 }
 0x137   : > { %v844_v57 = vadd.f32 %v1341_v2, %v843_v53  ;;  %v912_v58 = vadd.f32 %v911_v52, %v881_v45 }
 0x139   : > { %v845_v13 = vadd.f32 %v1342_v14, %v844_v57  ;;  %v913_v62 = vadd.f32 %v912_v58, %v882_v56 }
 0x13b   : > { %v846_v63 = vrot.slane %v845_v13, 4  ;;  %v914_v0 = vadd.f32 %v913_v62, %v883_v60 }
 0x13d   : > { %v847_v1 = vadd.f32 %v846_v63, %v845_v13  ;;  %v915_v6 = vrot.slane %v914_v0, 4 }
 0x13f   : > { %v848_v8 = vrot.slane %v847_v1, 2  ;;  %v916_v44 = vadd.f32 %v915_v6, %v914_v0 }
 0x141   : > { %v849_v3 = vadd.f32 %v848_v8, %v847_v1  ;;  %v917_v9 = vrot.slane %v916_v44, 2 }
 0x143   : > { %v850_v17 = vrot.slane %v849_v3, 1  ;;  %v918_v18 = vadd.f32 %v917_v9, %v916_v44 }
 0x145   : > { %v919_v19 = vrot.slane %v918_v18, 1  ;;  %v851_v2 = vadd.f32 %v850_v17, %v849_v3 }
 0x147   : > { %v920_v14 = vadd.f32 %v919_v19, %v918_v18 }
 0x149   : > { %v922_v21 = vsel %vm921_vm0, %v851_v2, %v920_v14 }
 0x14a   : > { %923 = vst [vmem:[%s238_s28] sm:$0x3] %v922_v21 }
 0x14b PF: > { %s16_s18 = sadd.s32 1, %s1381_s18  }
 0x14c   : > { %p13_p5 = scmp.ge.s32.totalorder %s16_s18, 4  }
 0x14e   :  { %15 = sbr.rel (!%p13_p5) target bundleno = 1 (0x1), region = 78 }

// kernel: bottleneck2_forward.6
= control target key start
LH: loop header
LB: loop body
LE: loop exit
PB: predicated region body
PF: predicated region fallthrough
CT: control target
= control target key end

     0   :  { %s4042_s18 = smov 0   ;;  %s4044_s19 = smov 0   ;;  %s5303_s0 = inlined_call_operand.vmem [shape: bf16[2,16,16,128], index: 0, kind: input, shape index: {}]   ;;  %s5304_s1 = inlined_call_operand.vmem [shape: f32[1,128], index: 1, kind: input, shape index: {}]   ;;  %s5305_s2 = inlined_call_operand.vmem [shape: f32[1,128], index: 2, kind: input, shape index: {}]   ;;  %s5306_s3 = inlined_call_operand.vmem [shape: bf16[3,384,128], index: 3, kind: input, shape index: {}]   ;;  %s5307_s4 = inlined_call_operand.vmem [shape: bf16[2,16,16,128], index: 4, kind: output, shape index: {0}]   ;;  %s5308_s5 = inlined_call_operand.vmem [shape: f32[2,1,2,128], index: 5, kind: output, shape index: {1}]  }
   0x1   :  { %s4046_s20 = smov 0  }
   0x2 LB: > { %s28_s21 = sadd.s32 1, %s4006_s19  ;;  %p2733_p0 = scmp.ge.s32.totalorder %s4010_s20, 1  ;;  %s4010_s20 = sphi %s4046_s20, %s16_s20   ;;  %s4006_s19 = sphi %s4044_s19, %s5338_s19   ;;  %s4002_s18 = sphi %s4042_s18, %s5337_s18  }
   0x3   : > { %p30_p1 = scmp.ge.s32.totalorder %s28_s21, 2  ;;  %p206_p2 = scmp.lt.s32.totalorder %s4010_s20, 3 }
   0x5   : > { %s5340_s21 = smov (%p30_p1, %s28_s21), 0  ;;  %p207_p3 = pnand %p2733_p0, %p206_p2 }
   0x6   : > { %v3914_v0 = vld [vmem:[%s5306_s3 + $0x100] sm:$0xff] (!%p207_p3)   ;;  %v3917_v3 = vld [vmem:[%s5306_s3 + $0x108] sm:$0xff] (!%p207_p3)   ;;  %v3920_v6 = vld [vmem:[%s5306_s3 + $0x110] sm:$0xff] (!%p207_p3)   ;;  %p246_p4 = scmp.lt.s32.totalorder (!%p207_p3), %s4002_s18, 1  ;;  %vm705_vm0 = vcmask (!%p207_p3), 1047552   ;;  %vm638_vm2 = vcmask (!%p207_p3), 1040384  }
   0x7   : > { %210 = sbr.rel (%p207_p3) target bundleno = 568 (0x238), region = 36  ;;  %v4068_v1 = vld [vmem:[%s5306_s3 + $0x140] sm:$0xff] (!%p207_p3)   ;;  %3162 = vmatprep.subr.bf16.mxu0 (!%p207_p3), %v3914_v0  ;;  %v4081_v4 = vld [vmem:[%s5306_s3 + $0x148] sm:$0xff] (!%p207_p3)   ;;  %v4093_v7 = vld [vmem:[%s5306_s3 + $0x150] sm:$0xff] (!%p207_p3)   ;;  %vm706_vm1 = vsmask.f32 (!%p207_p3), 7424 }
   0x8   : > { %v3916_v2 = vld [vmem:[%s5306_s3 + $0xc0] sm:$0xff] (!%p207_p3)   ;;  %3714 = vmatprep.subr.bf16.mxu1 (!%p207_p3), %v4068_v1  ;;  %v3919_v5 = vld [vmem:[%s5306_s3 + $0xc8] sm:$0xff] (!%p207_p3)   ;;  %v3922_v8 = vld [vmem:[%s5306_s3 + $0xd0] sm:$0xff] (!%p207_p3)   ;;  %vm639_vm3 = vsmask.f32 (!%p207_p3), 256 }
   0x9   : > { %3163 = vmatpush3.bf16.msra.mxu0 (!%p207_p3), %v3916_v2  ;;  %3722 = vmatpush3.bf16.msra.mxu1 (!%p207_p3), %v4068_v1  ;;  %v3923_v9 = vld [vmem:[%s5306_s3 + $0x118] sm:$0xff] (!%p207_p3)   ;;  %v3926_v12 = vld [vmem:[%s5306_s3 + $0x120] sm:$0xff] (!%p207_p3)   ;;  %v3929_v15 = vld [vmem:[%s5306_s3 + $0x128] sm:$0xff] (!%p207_p3)  }
   0xa   : > { %3164 = vmatprep.subr.bf16.mxu0 (!%p207_p3), %v3917_v3  ;;  %3715 = vmatprep.subr.bf16.mxu1 (!%p207_p3), %v4081_v4  ;;  %v4106_v10 = vld [vmem:[%s5306_s3 + $0x158] sm:$0xff] (!%p207_p3)   ;;  %v4120_v13 = vld [vmem:[%s5306_s3 + $0x160] sm:$0xff] (!%p207_p3)   ;;  %v4136_v16 = vld [vmem:[%s5306_s3 + $0x168] sm:$0xff] (!%p207_p3)  }
   0xb   : > { %v3925_v11 = vld [vmem:[%s5306_s3 + $0xd8] sm:$0xff] (!%p207_p3)   ;;  %v3928_v14 = vld [vmem:[%s5306_s3 + $0xe0] sm:$0xff] (!%p207_p3)   ;;  %v3931_v17 = vld [vmem:[%s5306_s3 + $0xe8] sm:$0xff] (!%p207_p3)  }
   0xc   : > { %v3932_v18 = vld [vmem:[%s5306_s3 + $0x130] sm:$0xff] (!%p207_p3)   ;;  %v3935_v21 = vld [vmem:[%s5306_s3 + $0x138] sm:$0xff] (!%p207_p3)   ;;  %v4169_v22 = vld [vmem:[%s5304_s1] ss:$0 sm:$0xff] (!%p207_p3) }
   0xd   : > { %3165 = vmatpush3.bf16.msra.mxu0 (!%p207_p3), %v3919_v5  ;;  %3723 = vmatpush3.bf16.msra.mxu1 (!%p207_p3), %v4081_v4  ;;  %v4150_v19 = vld [vmem:[%s5306_s3 + $0x170] sm:$0xff] (!%p207_p3)   ;;  %v4176_v24 = vld [vmem:[%s5306_s3 + $0x178] sm:$0xff] (!%p207_p3)   ;;  %v4183_v29 = vld [vmem:[%s5305_s2] ss:$0 sm:$0xff] (!%p207_p3) }
   0xe   : > { %3166 = vmatprep.subr.bf16.mxu0 %v3920_v6  ;;  %3716 = vmatprep.subr.bf16.mxu1 %v4093_v7  ;;  %s5342_s18 = smov (!%p246_p4, %s4002_s18), 1  ;;  %v3934_v20 = vld [vmem:[%s5306_s3 + $0xf0] sm:$0xff]   ;;  %v3937_v34 = vld [vmem:[%s5306_s3 + $0xf8] sm:$0xff]   ;;  %v3938_v43 = vld [vmem:[%s5306_s3 + $0x40] sm:$0xff]  }
   0xf   : > { %s2945_s10 = sshll.u32 %s5342_s18, 7  ;;  %vm4244_vm4 = vmand %vm638_vm2, %vm639_vm3 }
  0x10   : > { %s4157_s23 = scalar_lea.vmem %s5303_s0, %s2945_s10  ;;  %vm4252_vm5 = vmand %vm705_vm0, %vm706_vm1  ;;  %s5221_s22 = scalar_lea.vmem %s5307_s4, %s2945_s10 }
  0x11   : > { %3167 = vmatpush3.bf16.msra.mxu0 %v3922_v8  ;;  %3724 = vmatpush3.bf16.msra.mxu1 %v4093_v7  ;;  %v2980_v23 = vld [vmem:[%s4157_s23] sm:$0xff]   ;;  %v3139_v28 = vld [vmem:[%s4157_s23 + $0x48] sm:$0xff]   ;;  %v3140_v52 = vld [vmem:[%s4157_s23 + $0x50] sm:$0xff]   ;;  %s2738_s10 = sshll.u32 %s5342_s18, 1 }
  0x12   : > { %3168 = vmatprep.subr.bf16.mxu0 %v3923_v9  ;;  %3717 = vmatprep.subr.bf16.mxu1 %v4106_v10  ;;  %v2981_v25 = vunpack.c.l.bf16 %v2980_v23  ;;  %v2982_v26 = vunpack.c.h.bf16 %v2980_v23  ;;  %v3138_v27 = vld [vmem:[%s4157_s23 + $0x40] sm:$0xff]   ;;  %v3017_v32 = vunpack.c.l.bf16 %v3139_v28  ;;  %v3018_v33 = vunpack.c.h.bf16 %v3139_v28  ;;  %v3131_v47 = vld [vmem:[%s4157_s23 + $0x8] sm:$0xff]   ;;  %v3141_v53 = vld [vmem:[%s4157_s23 + $0x58] sm:$0xff]   ;;  %s268_s26 = scalar_lea.vmem %s5308_s5, %s2738_s10 }
  0x13   : > { %v3013_v30 = vunpack.c.l.bf16 %v3138_v27  ;;  %v3014_v31 = vunpack.c.h.bf16 %v3138_v27  ;;  %v2985_v51 = vunpack.c.l.bf16 %v3131_v47  ;;  %v2986_v57 = vunpack.c.h.bf16 %v3131_v47  ;;  %v3940_v47 = vld [vmem:[%s5306_s3 + $0x48] sm:$0xff]  }
  0x14   : > { %v346_v35 = vmul.f32 %v2981_v25, %v4169_v22  ;;  %v347_v36 = vmul.f32 %v2982_v26, %v4169_v22  ;;  %v364_v39 = vmul.f32 %v3017_v32, %v4169_v22  ;;  %v365_v42 = vmul.f32 %v3018_v33, %v4169_v22 }
  0x15   : > { %3169 = vmatpush3.bf16.msra.mxu0 %v3925_v11  ;;  %3725 = vmatpush3.bf16.msra.mxu1 %v4106_v10  ;;  %v362_v37 = vmul.f32 %v3013_v30, %v4169_v22  ;;  %v363_v38 = vmul.f32 %v3014_v31, %v4169_v22  ;;  %v348_v60 = vmul.f32 %v2985_v51, %v4169_v22  ;;  %v3021_v61 = vunpack.c.l.bf16 %v3140_v52 }
  0x16   : > { %3170 = vmatprep.subr.bf16.mxu0 %v3926_v12  ;;  %3718 = vmatprep.subr.bf16.mxu1 %v4120_v13  ;;  %v4196_v40 = vadd.f32 %v4183_v29, %v346_v35  ;;  %v4199_v41 = vadd.f32 %v4183_v29, %v347_v36  ;;  %v402_v46 = vadd.f32 %v4183_v29, %v364_v39  ;;  %v3022_v0 = vunpack.c.h.bf16 %v3140_v52 }
  0x17   : > { %v400_v44 = vadd.f32 %v4183_v29, %v362_v37  ;;  %v401_v45 = vadd.f32 %v4183_v29, %v363_v38  ;;  %v403_v50 = vadd.f32 %v4183_v29, %v365_v42  ;;  %v349_v63 = vmul.f32 %v2986_v57, %v4169_v22  ;;  %v3132_v38 = vld [vmem:[%s4157_s23 + $0x10] sm:$0xff]  }
  0x18   : > { %v416_v48 = vmax.f32 %v4196_v40, 0.0  ;;  %v417_v49 = vmax.f32 %v4199_v41, 0.0  ;;  %v434_v56 = vmax.f32 %v402_v46, 0.0  ;;  %v3025_v2 = vunpack.c.l.bf16 %v3141_v53  ;;  %v3961_v41 = vld [vmem:[%s5306_s3 + $0x1c0] sm:$0xff]  }
  0x19   : > { %3171 = vmatpush3.bf16.msra.mxu0 %v3928_v14  ;;  %3726 = vmatpush3.bf16.msra.mxu1 %v4120_v13  ;;  %v432_v54 = vmax.f32 %v400_v44, 0.0  ;;  %v433_v55 = vmax.f32 %v401_v45, 0.0  ;;  %v435_v59 = vmax.f32 %v403_v50, 0.0  ;;  %v386_v8 = vadd.f32 %v4183_v29, %v348_v60 }
  0x1a   : > { %3172 = vmatprep.subr.bf16.mxu0 %v3929_v15  ;;  %3719 = vmatprep.subr.bf16.mxu1 %v4136_v16  ;;  %v4219_v58 = vpack.c.bf16 %v417_v49, %v416_v48  ;;  %v387_v12 = vadd.f32 %v4183_v29, %v349_v63  ;;  %v366_v14 = vmul.f32 %v3021_v61, %v4169_v22  ;;  %v3026_v32 = vunpack.c.h.bf16 %v3141_v53  ;;  %v3142_v53 = vld [vmem:[%s4157_s23 + $0x60] sm:$0xff]  }
  0x1b   : > { %v4223_v62 = vpack.c.bf16 %v433_v55, %v432_v54  ;;  %v4229_v6 = vpack.c.bf16 %v435_v59, %v434_v56  ;;  %v367_v26 = vmul.f32 %v3022_v0, %v4169_v22  ;;  %v368_v33 = vmul.f32 %v3025_v2, %v4169_v22  ;;  %v3941_v59 = vld [vmem:[%s5306_s3 + $0x8] sm:$0xff]  }
  0x1c   : > { %1010 = vmatprep.mubr.bf16.mxu0 %v4219_v58  ;;  %v5314_v3 = vshrl.u32 %v4219_v58, 16  ;;  %v5317_v5 = vshll.u32 %v4219_v58, 16  ;;  %v419_v25 = vmax.f32 %v387_v12, 0.0  ;;  %v404_v27 = vadd.f32 %v4183_v29, %v366_v14  ;;  %v3143_v12 = vld [vmem:[%s4157_s23 + $0x68] sm:$0xff]  }
  0x1d   : > { %3173 = vmatpush3.bf16.msra.mxu0 %v3931_v17  ;;  %3727 = vmatpush3.bf16.msra.mxu1 %v4136_v16  ;;  %v574_v9 = vshrl.u32 %v4223_v62, 16  ;;  %v577_v11 = vshll.u32 %v4223_v62, 16  ;;  %v581_v17 = vshrl.u32 %v4229_v6, 16  ;;  %v405_v36 = vadd.f32 %v4183_v29, %v367_v26 }
  0x1e   : > { %3174 = vmatprep.subr.bf16.mxu0 %v3932_v18  ;;  %3720 = vmatprep.subr.bf16.mxu1 %v4150_v19  ;;  %v520_v15 = vrot.slane %v5314_v3, 7  ;;  %v584_v18 = vshll.u32 %v4229_v6, 16  ;;  %v436_v37 = vmax.f32 %v404_v27, 0.0  ;;  %v369_v44 = vmul.f32 %v3026_v32, %v4169_v22  ;;  %v3133_v32 = vld [vmem:[%s4157_s23 + $0x18] sm:$0xff]  }
  0x1f   : > { %v406_v45 = vadd.f32 %v4183_v29, %v368_v33  ;;  %v437_v50 = vmax.f32 %v405_v36, 0.0  ;;  %v2989_v57 = vunpack.c.l.bf16 %v3132_v38  ;;  %v2990_v63 = vunpack.c.h.bf16 %v3132_v38 }
  0x20   : > { %v523_v30 = vor.u32 %v5317_v5, %v520_v15  ;;  %v677_v31 = vrot.slane %v584_v18, 1  ;;  %v407_v55 = vadd.f32 %v4183_v29, %v369_v44  ;;  %v3029_v2 = vunpack.c.l.bf16 %v3142_v53 }
  0x21   : > { %3175 = vmatpush3.bf16.msra.mxu0 %v3934_v20  ;;  %3728 = vmatpush3.bf16.msra.mxu1 %v4150_v19  ;;  %v418_v20 = vmax.f32 %v386_v8, 0.0  ;;  %v438_v56 = vmax.f32 %v406_v45, 0.0  ;;  %v4301_v60 = vpack.c.bf16 %v437_v50, %v436_v37  ;;  %v350_v0 = vmul.f32 %v2989_v57, %v4169_v22  ;;  %v3945_v57 = vld [vmem:[%s5306_s3 + $0x18] sm:$0xff]  }
  0x22   : > { %3176 = vmatprep.subr.bf16.mxu0 %v3935_v21  ;;  %3721 = vmatprep.subr.bf16.mxu1 %v4176_v24  ;;  %v675_v21 = vrot.slane %v577_v11, 1  ;;  %v4269_v39 = vsel %vm4244_vm4, 0, %v523_v30  ;;  %v678_v42 = vor.u32 %v677_v31, %v581_v17  ;;  %v3030_v8 = vunpack.c.h.bf16 %v3142_v53 }
  0x23   : > { %v4263_v35 = vpack.c.bf16 %v419_v25, %v418_v20  ;;  %v588_v14 = vshrl.u32 %v4301_v60, 16  ;;  %v591_v15 = vshll.u32 %v4301_v60, 16  ;;  %v351_v25 = vmul.f32 %v2990_v63, %v4169_v22 }
  0x24   : > { %v4292_v54 = vsel %vm4252_vm5, %v678_v42, 0  ;;  %v388_v27 = vadd.f32 %v4183_v29, %v350_v0  ;;  %v370_v30 = vmul.f32 %v3029_v2, %v4169_v22  ;;  %v371_v31 = vmul.f32 %v3030_v8, %v4169_v22 }
  0x25   : > { %3177 = vmatpush3.bf16.msra.mxu0 %v3937_v34  ;;  %3729 = vmatpush3.bf16.msra.mxu1 %v4176_v24  ;;  %v676_v34 = vor.u32 %v675_v21, %v574_v9  ;;  %v5313_v51 = vshrl.u32 %v4263_v35, 16  ;;  %v528_v52 = vshll.u32 %v4263_v35, 16  ;;  %v3942_v21 = vld [vmem:[%s5306_s3 + $0x50] sm:$0xff]   ;;  %v679_v33 = vrot.slane %v591_v15, 1 }
  0x26   : > { %3570 = vmatprep.subr.bf16.mxu0 %v4068_v1  ;;  %3298 = vmatprep.subr.bf16.mxu1 %v3938_v43  ;;  %v3939_v43 = vld [vmem:[%s5306_s3] sm:$0xff]   ;;  %v389_v36 = vadd.f32 %v4183_v29, %v351_v25  ;;  %v3033_v37 = vunpack.c.l.bf16 %v3143_v12  ;;  %v408_v44 = vadd.f32 %v4183_v29, %v370_v30  ;;  %v409_v53 = vadd.f32 %v4183_v29, %v371_v31 }
  0x27   : > { %v4280_v46 = vsel %vm4252_vm5, %v676_v34, 0  ;;  %v527_v61 = vrot.slane %v5313_v51, 7  ;;  %v680_v45 = vor.u32 %v679_v33, %v588_v14  ;;  %v2993_v63 = vunpack.c.l.bf16 %v3133_v32 }
  0x28   : > { %1011 = vmatmul.mubr.bf16.vlgmr.msra.gmra.mrb[0].mxu0 %v4269_v39  ;;  %3602 = vmatprep.mubr.bf16.mxu1 %v4280_v46  ;;  %v421_v50 = vmax.f32 %v389_v36, 0.0  ;;  %v441_v2 = vmax.f32 %v409_v53, 0.0  ;;  %v3144_v36 = vld [vmem:[%s4157_s23 + $0x70] sm:$0xff]  }
  0x29   : > { %3571 = vmatpush3.bf16.msra.mxu0 %v4068_v1  ;;  %3603 = vmatmul.mubr.bf16.vlgmr.msra.gmra.mrb[0].mxu1 %v4292_v54  ;;  %v439_v1 = vmax.f32 %v407_v55, 0.0  ;;  %v530_v20 = vor.u32 %v528_v52, %v527_v61  ;;  %v3034_v55 = vunpack.c.h.bf16 %v3143_v12  ;;  %v372_v61 = vmul.f32 %v3033_v37, %v4169_v22  ;;  %v3145_v37 = vld [vmem:[%s4157_s23 + $0x78] sm:$0xff]  }
  0x2a   : > { %1018 = vmatprep.mubr.bf16.mxu0 %v4263_v35  ;;  %3299 = vmatpush3.bf16.msra.mxu1 %v3939_v43  ;;  %v420_v43 = vmax.f32 %v388_v27, 0.0  ;;  %v352_v25 = vmul.f32 %v2993_v63, %v4169_v22  ;;  %v3038_v63 = vunpack.c.h.bf16 %v3144_v36 }
  0x2b   : > { %3572 = vmatprep.subr.bf16.mxu0 %v4081_v4  ;;  %3300 = vmatprep.subr.bf16.mxu1 %v3940_v47  ;;  %v4316_v26 = vpack.c.bf16 %v439_v1, %v438_v56  ;;  %v4327_v34 = vsel %vm4244_vm4, 0, %v530_v20  ;;  %v3944_v47 = vld [vmem:[%s5306_s3 + $0x58] sm:$0xff]   ;;  %v4353_v1 = vsel %vm4252_vm5, %v680_v45, 0  ;;  %v373_v8 = vmul.f32 %v3034_v55, %v4169_v22  ;;  %v3946_v20 = vld [vmem:[%s5306_s3 + $0x60] sm:$0xff]  }
  0x2c   : > { %v4355_v0 = vpack.c.bf16 %v421_v50, %v420_v43  ;;  %3606 = vmatprep.mubr.bf16.mxu1 %v4353_v1  ;;  %v3947_v43 = vld [vmem:[%s5306_s3 + $0x20] sm:$0xff]   ;;  %v390_v45 = vadd.f32 %v4183_v29, %v352_v25 }
  0x2d   : > { %3573 = vmatpush3.bf16.msra.mxu0 %v4081_v4  ;;  %v595_v38 = vshrl.u32 %v4316_v26, 16  ;;  %v598_v42 = vshll.u32 %v4316_v26, 16  ;;  %v3943_v4 = vld [vmem:[%s5306_s3 + $0x10] sm:$0xff]   ;;  %v411_v33 = vadd.f32 %v4183_v29, %v373_v8 }
  0x2e   : > { %3574 = vmatprep.subr.bf16.mxu0 %v4093_v7  ;;  %3301 = vmatpush3.bf16.msra.mxu1 %v3941_v59  ;;  %v440_v59 = vmax.f32 %v408_v44, 0.0  ;;  %v5309_v30 = vshrl.u32 %v4355_v0, 16  ;;  %v5310_v31 = vshll.u32 %v4355_v0, 16 }
  0x2f   : > { %3302 = vmatprep.subr.bf16.mxu1 %v3942_v21  ;;  %v681_v56 = vrot.slane %v598_v42, 1  ;;  %v2994_v21 = vunpack.c.h.bf16 %v3133_v32  ;;  %v443_v55 = vmax.f32 %v411_v33, 0.0  ;;  %v375_v33 = vmul.f32 %v3038_v63, %v4169_v22 }
  0x30   : > { %1019 = vmatmul.mubr.bf16.gmra.mrb[4].mxu0 %v4327_v34  ;;  %v4368_v27 = vpack.c.bf16 %v441_v2, %v440_v59  ;;  %v534_v53 = vrot.slane %v5309_v30, 7  ;;  %v422_v59 = vmax.f32 %v390_v45, 0.0 }
  0x31   : > { %3575 = vmatpush3.bf16.msra.mxu0 %v4093_v7  ;;  %v682_v12 = vor.u32 %v681_v56, %v595_v38  ;;  %v410_v7 = vadd.f32 %v4183_v29, %v372_v61  ;;  %1026 = vmatprep.mubr.bf16.mxu0 %v4355_v0  ;;  %v353_v44 = vmul.f32 %v2994_v21, %v4169_v22  ;;  %v3948_v56 = vld [vmem:[%s5306_s3 + $0x68] sm:$0xff]   ;;  %v3037_v61 = vunpack.c.l.bf16 %v3144_v36 }
  0x32   : > { %3576 = vmatprep.subr.bf16.mxu0 %v4106_v10  ;;  %3303 = vmatpush3.bf16.msra.mxu1 %v3943_v4  ;;  %v605_v50 = vshll.u32 %v4368_v27, 16  ;;  %v537_v8 = vor.u32 %v5310_v31, %v534_v53  ;;  %v3949_v53 = vld [vmem:[%s5306_s3 + $0x28] sm:$0xff]  }
  0x33   : > { %3304 = vmatprep.subr.bf16.mxu1 %v3944_v47  ;;  %v4377_v4 = vsel %vm4252_vm5, %v682_v12, 0  ;;  %v442_v32 = vmax.f32 %v410_v7, 0.0  ;;  %v602_v47 = vshrl.u32 %v4368_v27, 16  ;;  %v3041_v7 = vunpack.c.l.bf16 %v3145_v37 }
  0x34   : > { %3607 = vmatmul.mubr.bf16.gmra.mrb[4].mxu1 %v4377_v4  ;;  %v683_v2 = vrot.slane %v605_v50, 1  ;;  %v374_v25 = vmul.f32 %v3037_v61, %v4169_v22  ;;  %v4409_v45 = vsel %vm4244_vm4, 0, %v537_v8 }
  0x35   : > { %3577 = vmatpush3.bf16.msra.mxu0 %v4106_v10  ;;  %v391_v10 = vadd.f32 %v4183_v29, %v353_v44  ;;  %v4399_v12 = vpack.c.bf16 %v443_v55, %v442_v32  ;;  %v3042_v44 = vunpack.c.h.bf16 %v3145_v37  ;;  %v413_v55 = vadd.f32 %v4183_v29, %v375_v33 }
  0x36   : > { %3578 = vmatprep.subr.bf16.mxu0 %v4120_v13  ;;  %3305 = vmatpush3.bf16.msra.mxu1 %v3945_v57  ;;  %v3134_v57 = vld [vmem:[%s4157_s23 + $0x20] sm:$0xff]   ;;  %v684_v36 = vor.u32 %v683_v2, %v602_v47  ;;  %v412_v37 = vadd.f32 %v4183_v29, %v374_v25 }
  0x37   : > { %3306 = vmatprep.subr.bf16.mxu1 %v3946_v20  ;;  %v423_v21 = vmax.f32 %v391_v10, 0.0  ;;  %v609_v32 = vshrl.u32 %v4399_v12, 16  ;;  %v612_v20 = vshll.u32 %v4399_v12, 16  ;;  %v3950_v10 = vld [vmem:[%s5306_s3 + $0x70] sm:$0xff]   ;;  %v2997_v61 = vunpack.c.l.bf16 %v3134_v57 }
  0x38   : > { %1027 = vmatmul.mubr.bf16.gmra.mrb[8].mxu0 %v4409_v45  ;;  %v4427_v63 = vsel %vm4252_vm5, %v684_v36, 0  ;;  %v444_v8 = vmax.f32 %v412_v37, 0.0  ;;  %v2998_v30 = vunpack.c.h.bf16 %v3134_v57 }
  0x39   : > { %3579 = vmatpush3.bf16.msra.mxu0 %v4120_v13  ;;  %v4418_v13 = vpack.c.bf16 %v423_v21, %v422_v59  ;;  %v685_v2 = vrot.slane %v612_v20, 1  ;;  %v377_v59 = vmul.f32 %v3042_v44, %v4169_v22  ;;  %3610 = vmatprep.mubr.bf16.mxu1 %v4427_v63  ;;  %v445_v21 = vmax.f32 %v413_v55, 0.0  ;;  %v3951_v55 = vld [vmem:[%s5306_s3 + $0x30] sm:$0xff]  }
  0x3a   : > { %3580 = vmatprep.subr.bf16.mxu0 %v4136_v16  ;;  %3307 = vmatpush3.bf16.msra.mxu1 %v3947_v43  ;;  %v376_v43 = vmul.f32 %v3041_v7, %v4169_v22  ;;  %v354_v31 = vmul.f32 %v2997_v61, %v4169_v22  ;;  %v355_v61 = vmul.f32 %v2998_v30, %v4169_v22  ;;  %v489_v30 = vmul.f32 0.0, %v417_v49 }
  0x3b   : > { %3308 = vmatprep.subr.bf16.mxu1 %v3948_v56  ;;  %1034 = vmatprep.mubr.bf16.mxu0 %v4418_v13  ;;  %v5311_v25 = vshrl.u32 %v4418_v13, 16  ;;  %v5312_v33 = vshll.u32 %v4418_v13, 16  ;;  %v686_v36 = vor.u32 %v685_v2, %v609_v32  ;;  %v415_v7 = vadd.f32 %v4183_v29, %v377_v59  ;;  %v3952_v59 = vld [vmem:[%s5306_s3 + $0x78] sm:$0xff]  }
  0x3c   : > { %v414_v56 = vadd.f32 %v4183_v29, %v376_v43  ;;  %v4442_v44 = vpack.c.bf16 %v445_v21, %v444_v8  ;;  %v488_v2 = vmul.f32 0.0, %v416_v48  ;;  %v3135_v43 = vld [vmem:[%s4157_s23 + $0x28] sm:$0xff]   ;;  %v3953_v21 = vld [vmem:[%s5306_s3 + $0x38] sm:$0xff]  }
  0x3d   : > { %3581 = vmatpush3.bf16.msra.mxu0 %v4136_v16  ;;  %v541_v37 = vrot.slane %v5311_v25, 7  ;;  %v4456_v16 = vsel %vm4252_vm5, %v686_v36, 0  ;;  %v3136_v25 = vld [vmem:[%s4157_s23 + $0x30] sm:$0xff]  }
  0x3e   : > { %3309 = vmatpush3.bf16.msra.mxu1 %v3949_v53  ;;  %3582 = vmatprep.subr.bf16.mxu0 %v4150_v19  ;;  %v446_v57 = vmax.f32 %v414_v56, 0.0  ;;  %v447_v53 = vmax.f32 %v415_v7, 0.0  ;;  %v616_v40 = vshrl.u32 %v4442_v44, 16  ;;  %v5315_v48 = vshll.u32 %v4442_v44, 16 }
  0x3f   : > { %3310 = vmatprep.subr.bf16.mxu1 %v3950_v10  ;;  %3611 = vmatmul.mubr.bf16.gmra.mrb[8].mxu1 %v4456_v16  ;;  %v544_v8 = vor.u32 %v5312_v33, %v541_v37  ;;  %v392_v10 = vadd.f32 %v4183_v29, %v354_v31  ;;  %v393_v56 = vadd.f32 %v4183_v29, %v355_v61  ;;  %v3001_v7 = vunpack.c.l.bf16 %v3135_v43 }
  0x40   : > { %v4471_v36 = vpack.c.bf16 %v447_v53, %v446_v57  ;;  %v687_v37 = vrot.slane %v5315_v48, 1  ;;  %v3002_v57 = vunpack.c.h.bf16 %v3135_v43  ;;  %v4491_v61 = vpack.c.bf16 %v489_v30, %v488_v2  ;;  %v3137_v48 = vld [vmem:[%s4157_s23 + $0x38] sm:$0xff]  }
  0x41   : > { %3583 = vmatpush3.bf16.msra.mxu0 %v4150_v19  ;;  %v4482_v33 = vsel %vm4244_vm4, 0, %v544_v8  ;;  %v424_v31 = vmax.f32 %v392_v10, 0.0  ;;  %v425_v53 = vmax.f32 %v393_v56, 0.0  ;;  %v356_v8 = vmul.f32 %v3001_v7, %v4169_v22 }
  0x42   : > { %3311 = vmatpush3.bf16.msra.mxu1 %v3951_v55  ;;  %3584 = vmatprep.subr.bf16.mxu0 %v4176_v24  ;;  %v773_v19 = vshrl.u32 %v4471_v36, 16  ;;  %v5316_v49 = vshll.u32 %v4471_v36, 16  ;;  %v4496_v55 = vld [vmem:[%s5306_s3 + $0x80] sm:$0xff]   ;;  %v688_v43 = vor.u32 %v687_v37, %v616_v40  ;;  %v357_v10 = vmul.f32 %v3002_v57, %v4169_v22 }
  0x43   : > { %1035 = vmatmul.mubr.bf16.gmra.mrb[12].mxu0 %v4482_v33  ;;  %3312 = vmatprep.subr.bf16.mxu1 %v3952_v59  ;;  %v3005_v51 = vunpack.c.l.bf16 %v3136_v25  ;;  %v4504_v56 = vpack.c.bf16 %v425_v53, %v424_v31  ;;  %v5318_v2 = vshrl.u32 %v4491_v61, 16  ;;  %v514_v30 = vshll.u32 %v4491_v61, 16 }
  0x44   : > { %v781_v59 = vrot.slane %v5316_v49, 1  ;;  %v4511_v3 = vsel %vm4252_vm5, %v688_v43, 0  ;;  %v394_v7 = vadd.f32 %v4183_v29, %v356_v8  ;;  %v395_v37 = vadd.f32 %v4183_v29, %v357_v10 }
  0x45   : > { %3585 = vmatpush3.bf16.msra.mxu0 %v4176_v24  ;;  %v3006_v57 = vunpack.c.h.bf16 %v3136_v25  ;;  %3614 = vmatprep.mubr.bf16.mxu1 %v4511_v3  ;;  %v5319_v24 = vshrl.u32 %v4504_v56, 16  ;;  %v5320_v53 = vshll.u32 %v4504_v56, 16  ;;  %v3009_v49 = vunpack.c.l.bf16 %v3137_v48 }
  0x46   : > { %3313 = vmatpush3.bf16.msra.mxu1 %v3953_v21  ;;  %3434 = vmatprep.subr.bf16.mxu0 %v3961_v41  ;;  %v782_v31 = vor.u32 %v781_v59, %v773_v19  ;;  %v513_v21 = vrot.slane %v5318_v2, 7  ;;  %v426_v43 = vmax.f32 %v394_v7, 0.0  ;;  %v427_v25 = vmax.f32 %v395_v37, 0.0 }
  0x47   : > { %1042 = vmatprep.mubr.bf16.mxu0 %v4504_v56  ;;  %3618 = vmatprep.subr.bf16.mxu1 %v4496_v55  ;;  %v358_v41 = vmul.f32 %v3005_v51, %v4169_v22  ;;  %v359_v8 = vmul.f32 %v3006_v57, %v4169_v22  ;;  %v548_v59 = vrot.slane %v5319_v24, 7  ;;  %v3010_v37 = vunpack.c.h.bf16 %v3137_v48 }
  0x48   : > { %v4529_v10 = vsel %vm4252_vm5, %v782_v31, 0  ;;  %v4534_v5 = vpack.c.bf16 %v427_v25, %v426_v43  ;;  %v516_v57 = vor.u32 %v514_v30, %v513_v21  ;;  %v360_v31 = vmul.f32 %v3009_v49, %v4169_v22 }
  0x49   : > { %3615 = vmatmul.mubr.bf16.gmra.mrb[12].mxu1 %v4529_v10  ;;  %v396_v2 = vadd.f32 %v4183_v29, %v358_v41  ;;  %v397_v7 = vadd.f32 %v4183_v29, %v359_v8  ;;  %v551_v51 = vor.u32 %v5320_v53, %v548_v59  ;;  %v576_v24 = vrot.slane %v574_v9, 7 }
  0x4a   : > { %1476 = vmatprep.mubr.bf16.mxu1 %v4491_v61  ;;  %v553_v43 = vshrl.u32 %v4534_v5, 16  ;;  %v556_v25 = vshll.u32 %v4534_v5, 16  ;;  %v361_v59 = vmul.f32 %v3010_v37, %v4169_v22  ;;  %v398_v53 = vadd.f32 %v4183_v29, %v360_v31 }
  0x4b   : > { %v428_v41 = vmax.f32 %v396_v2, 0.0  ;;  %v429_v8 = vmax.f32 %v397_v7, 0.0  ;;  %v4550_v48 = vsel %vm4244_vm4, 0, %v551_v51  ;;  %v4556_v49 = vor.u32 %v577_v11, %v576_v24 }
  0x4c   : > { %1043 = vmatmul.mubr.bf16.gmra.mrb[16].mxu0 %v4550_v48  ;;  %v555_v9 = vrot.slane %v553_v43, 7  ;;  %v583_v2 = vrot.slane %v581_v17, 7  ;;  %v590_v7 = vrot.slane %v588_v14, 7  ;;  %v641_v22 = vsel %vm4244_vm4, 0, %v516_v57  ;;  %v3955_v17 = vld [vmem:[%s5306_s3 + $0x88] sm:$0xff]  }
  0x4d   : > { %v4561_v21 = vpack.c.bf16 %v429_v8, %v428_v41  ;;  %1050 = vmatprep.mubr.bf16.mxu0 %v4534_v5  ;;  %v399_v11 = vadd.f32 %v4183_v29, %v361_v59  ;;  %v430_v24 = vmax.f32 %v398_v53, 0.0  ;;  %v597_v37 = vrot.slane %v595_v38, 7 }
  0x4e   : > { %v558_v51 = vor.u32 %v556_v25, %v555_v9  ;;  %v4579_v14 = vor.u32 %v584_v18, %v583_v2  ;;  %v4583_v41 = vor.u32 %v591_v15, %v590_v7  ;;  %v604_v38 = vrot.slane %v602_v47, 7 }
  0x4f   : > { %v560_v31 = vshrl.u32 %v4561_v21, 16  ;;  %v431_v57 = vmax.f32 %v399_v11, 0.0  ;;  %v4587_v29 = vor.u32 %v598_v42, %v597_v37  ;;  %v661_v53 = vrot.slane %v528_v52, 1  ;;  %v3956_v52 = vld [vmem:[%s5306_s3 + $0x90] sm:$0xff]  }
  0x50   : > { %v563_v18 = vshll.u32 %v4561_v21, 16  ;;  %v611_v59 = vrot.slane %v609_v32, 7  ;;  %v4600_v15 = vsel %vm4244_vm4, 0, %v558_v51  ;;  %v4609_v47 = vor.u32 %v605_v50, %v604_v38 }
  0x51   : > { %1477 = vmatmul.mubr.bf16.vlgmr.msra.gmra.mrb[16].mxu1 %v641_v22  ;;  %v562_v8 = vrot.slane %v560_v31, 7  ;;  %v4602_v42 = vpack.c.bf16 %v431_v57, %v430_v24  ;;  %v775_v9 = vrot.slane %v773_v19, 7  ;;  %v5325_v2 = vshll.u32 %v4219_v58, 16 }
  0x52   : > { %3619 = vmatpush3.bf16.msra.mxu1 %v4496_v55  ;;  %1484 = vmatprep.mubr.bf16.mxu1 %v4219_v58  ;;  %v4613_v32 = vor.u32 %v612_v20, %v611_v59  ;;  %v618_v55 = vrot.slane %v616_v40, 7  ;;  %v5326_v50 = vshll.u32 %v4442_v44, 16  ;;  %v5327_v24 = vshll.u32 %v4471_v36, 16  ;;  %v3957_v59 = vld [vmem:[%s5306_s3 + $0x98] sm:$0xff]  }
  0x53   : > { %3620 = vmatprep.subr.bf16.mxu1 %v3955_v17  ;;  %v659_v7 = vrot.slane %v5325_v2, 1  ;;  %v565_v22 = vor.u32 %v563_v18, %v562_v8  ;;  %v567_v40 = vshrl.u32 %v4602_v42, 16  ;;  %v5328_v19 = vshrl.u32 %v4219_v58, 16 }
  0x54   : > { %1051 = vmatmul.mubr.bf16.gmra.mrb[20].mxu0 %v4600_v15  ;;  %v4624_v11 = vor.u32 %v5326_v50, %v618_v55  ;;  %v4628_v20 = vor.u32 %v5327_v24, %v775_v9  ;;  %v5329_v51 = vshrl.u32 %v4263_v35, 16  ;;  %v5330_v38 = vshll.u32 %v4355_v0, 16 }
  0x55   : > { %1058 = vmatprep.mubr.bf16.mxu0 %v4561_v21  ;;  %v4634_v37 = vor.u32 %v659_v7, %v5328_v19  ;;  %v5332_v9 = vshll.u32 %v4504_v56, 16  ;;  %v570_v2 = vshll.u32 %v4602_v42, 16  ;;  %v5333_v7 = vshrl.u32 %v4355_v0, 16 }
  0x56   : > { %3621 = vmatpush3.bf16.msra.mxu1 %v3955_v17  ;;  %v4638_v57 = vor.u32 %v661_v53, %v5329_v51  ;;  %v663_v8 = vrot.slane %v5330_v38, 1  ;;  %v5331_v17 = vshll.u32 %v4418_v13, 16  ;;  %v5334_v50 = vshrl.u32 %v4418_v13, 16 }
  0x57   : > { %3622 = vmatprep.subr.bf16.mxu1 %v3956_v52  ;;  %v667_v58 = vrot.slane %v5332_v9, 1  ;;  %v5335_v19 = vshrl.u32 %v4504_v56, 16  ;;  %v669_v38 = vrot.slane %v556_v25, 1  ;;  %v4666_v9 = vsel %vm4244_vm4, 0, %v565_v22 }
  0x58   : > { %v665_v55 = vrot.slane %v5331_v17, 1  ;;  %v4652_v53 = vor.u32 %v663_v8, %v5333_v7  ;;  %v671_v17 = vrot.slane %v563_v18, 1  ;;  %v569_v8 = vrot.slane %v567_v40, 7 }
  0x59   : > { %1485 = vmatmul.mubr.bf16.gmra.mrb[20].mxu1 %v4269_v39  ;;  %v4661_v51 = vor.u32 %v667_v58, %v5335_v19  ;;  %v673_v7 = vrot.slane %v570_v2, 1  ;;  %v657_v39 = vrot.slane %v514_v30, 1  ;;  %v4675_v25 = vor.u32 %v669_v38, %v553_v43  ;;  %v3959_v43 = vld [vmem:[%s5306_s3 + $0xa8] sm:$0xff]  }
  0x5a   : > { %v4657_v24 = vor.u32 %v665_v55, %v5334_v50  ;;  %1492 = vmatprep.mubr.bf16.mxu1 %v4263_v35  ;;  %3623 = vmatpush3.bf16.msra.mxu1 %v3956_v52  ;;  %v3958_v55 = vld [vmem:[%s5306_s3 + $0xa0] sm:$0xff]   ;;  %v4677_v18 = vor.u32 %v671_v17, %v560_v31  ;;  %v5336_v22 = vshrl.u32 %v4491_v61, 16  ;;  %v572_v30 = vor.u32 %v570_v2, %v569_v8  ;;  %v3960_v31 = vld [vmem:[%s5306_s3 + $0xb0] sm:$0xff]  }
  0x5b   : > { %3624 = vmatprep.subr.bf16.mxu1 %v3957_v59  ;;  %v4679_v58 = vor.u32 %v673_v7, %v567_v40  ;;  %v3969_v40 = vld [vmem:[%s5306_s3 + $0xb8] sm:$0xff]   ;;  %v4714_v2 = vld [vmem:[%s5306_s3 + $0x200] sm:$0xff]   ;;  %v4733_v50 = vsel %vm4244_vm4, 0, %v4583_v41  ;;  %v4751_v41 = vsel %vm4244_vm4, 0, %v4609_v47  ;;  %v4769_v47 = vsel %vm4244_vm4, 0, %v4624_v11  ;;  %v3965_v17 = vld [vmem:[%s5306_s3 + $0x1d0] sm:$0xff]  }
  0x5c   : > { %v4683_v52 = vor.u32 %v657_v39, %v5336_v22  ;;  %1059 = vmatmul.mubr.bf16.gmra.mrb[24].mxu0 %v4666_v9  ;;  %v4694_v61 = vsel %vm4244_vm4, 0, %v572_v30  ;;  %v709_v19 = vsel %vm4252_vm5, %v4634_v37, 0  ;;  %v4789_v11 = vsel %vm4252_vm5, %v4638_v57, 0  ;;  %v3963_v37 = vld [vmem:[%s5306_s3 + $0x1c8] sm:$0xff]   ;;  %v3966_v8 = vld [vmem:[%s5306_s3 + $0x190] sm:$0xff]   ;;  %v3967_v7 = vld [vmem:[%s5306_s3 + $0x1d8] sm:$0xff]  }
  0x5d   : > { %1066 = vmatprep.mubr.bf16.mxu0 %v4602_v42  ;;  %v4800_v38 = vsel %vm4252_vm5, %v4652_v53, 0  ;;  %v3964_v57 = vld [vmem:[%s5306_s3 + $0x188] sm:$0xff]   ;;  %v4815_v53 = vsel %vm4252_vm5, %v4657_v24, 0  ;;  %v4826_v39 = vsel %vm4252_vm5, %v4661_v51, 0  ;;  %v3968_v24 = vld [vmem:[%s5306_s3 + $0x198] sm:$0xff]   ;;  %v4841_v51 = vsel %vm4252_vm5, %v4675_v25, 0 }
  0x5e   : > { %3625 = vmatpush3.bf16.msra.mxu1 %v3957_v59  ;;  %v4709_v59 = vsel %vm4244_vm4, 0, %v4556_v49  ;;  %v4724_v49 = vsel %vm4244_vm4, 0, %v4579_v14  ;;  %v4742_v14 = vsel %vm4244_vm4, 0, %v4587_v29  ;;  %v4760_v29 = vsel %vm4244_vm4, 0, %v4613_v32  ;;  %v3971_v22 = vld [vmem:[%s5306_s3 + $0x1a0] sm:$0xff]   ;;  %v3972_v30 = vld [vmem:[%s5306_s3 + $0x1e8] sm:$0xff]  }
  0x5f   : > { %3626 = vmatprep.subr.bf16.mxu1 %v3958_v55  ;;  %v4778_v32 = vsel %vm4244_vm4, 0, %v4628_v20  ;;  %v3962_v20 = vld [vmem:[%s5306_s3 + $0x180] sm:$0xff]   ;;  %v3973_v25 = vld [vmem:[%s5306_s3 + $0x1a8] sm:$0xff]  }
  0x61   : > { %1493 = vmatmul.mubr.bf16.gmra.mrb[24].mxu1 %v4327_v34 }
  0x62   : > { %1500 = vmatprep.mubr.bf16.mxu1 %v4355_v0  ;;  %3627 = vmatpush3.bf16.msra.mxu1 %v3958_v55  ;;  %v3970_v55 = vld [vmem:[%s5306_s3 + $0x1e0] sm:$0xff]  }
  0x63   : > { %3628 = vmatprep.subr.bf16.mxu1 %v3959_v43 }
  0x64   : > { %1067 = vmatmul.mubr.bf16.gmra.mrb[28].mxu0 %v4694_v61 }
  0x65   : > { %1074 = vmatprep.mubr.bf16.mxu0 %v4223_v62 }
  0x66   : > { %3629 = vmatpush3.bf16.msra.mxu1 %v3959_v43  ;;  %v4852_v43 = vsel %vm4252_vm5, %v4677_v18, 0  ;;  %v4867_v18 = vsel %vm4252_vm5, %v4679_v58, 0  ;;  %v708_v58 = vsel %vm4252_vm5, %v4683_v52, 0 }
  0x67   : > { %3630 = vmatprep.subr.bf16.mxu1 %v3960_v31 }
  0x69   : > { %1501 = vmatmul.mubr.bf16.gmra.mrb[28].mxu1 %v4409_v45 }
  0x6a   : > { %1508 = vmatprep.mubr.bf16.mxu1 %v4418_v13  ;;  %3631 = vmatpush3.bf16.msra.mxu1 %v3960_v31  ;;  %v3974_v31 = vld [vmem:[%s5306_s3 + $0x1f0] sm:$0xff]  }
  0x6b   : > { %3632 = vmatprep.subr.bf16.mxu1 %v3969_v40 }
  0x6c   : > { %1075 = vmatmul.mubr.bf16.gmra.mrb[32].mxu0 %v4709_v59 }
  0x6d   : > { %1082 = vmatprep.mubr.bf16.mxu0 %v4229_v6 }
  0x6e   : > { %3633 = vmatpush3.bf16.msra.mxu1 %v3969_v40  ;;  %v3975_v40 = vld [vmem:[%s5306_s3 + $0x1b0] sm:$0xff]  }
  0x6f   : > { %3666 = vmatprep.subr.bf16.mxu1 %v4714_v2 }
  0x71   : > { %1509 = vmatmul.mubr.bf16.gmra.mrb[32].mxu1 %v4482_v33 }
  0x72   : > { %1516 = vmatprep.mubr.bf16.mxu1 %v4504_v56 }
  0x74   : > { %1083 = vmatmul.mubr.bf16.gmra.mrb[36].mxu0 %v4724_v49 }
  0x75   : > { %1090 = vmatprep.mubr.bf16.mxu0 %v4301_v60 }
  0x79   : > { %1517 = vmatmul.mubr.bf16.gmra.mrb[36].mxu1 %v4550_v48 }
  0x7a   : > { %1524 = vmatprep.mubr.bf16.mxu1 %v4534_v5 }
  0x7c   : > { %1091 = vmatmul.mubr.bf16.gmra.mrb[40].mxu0 %v4733_v50 }
  0x7d   : > { %1098 = vmatprep.mubr.bf16.mxu0 %v4316_v26 }
  0x81   : > { %1525 = vmatmul.mubr.bf16.gmra.mrb[40].mxu1 %v4600_v15 }
  0x82   : > { %1532 = vmatprep.mubr.bf16.mxu1 %v4561_v21 }
  0x84   : > { %1099 = vmatmul.mubr.bf16.gmra.mrb[44].mxu0 %v4742_v14 }
  0x85   : > { %1106 = vmatprep.mubr.bf16.mxu0 %v4368_v27 }
  0x89   : > { %1533 = vmatmul.mubr.bf16.gmra.mrb[44].mxu1 %v4666_v9 }
  0x8a   : > { %1540 = vmatprep.mubr.bf16.mxu1 %v4602_v42 }
  0x8c   : > { %1107 = vmatmul.mubr.bf16.gmra.mrb[48].mxu0 %v4751_v41 }
  0x8d   : > { %1114 = vmatprep.mubr.bf16.mxu0 %v4399_v12 }
  0x91   : > { %1541 = vmatmul.mubr.bf16.gmra.mrb[48].mxu1 %v4694_v61 }
  0x92   : > { %1548 = vmatprep.mubr.bf16.mxu1 %v4223_v62 }
  0x94   : > { %1115 = vmatmul.mubr.bf16.gmra.mrb[52].mxu0 %v4760_v29 }
  0x95   : > { %1122 = vmatprep.mubr.bf16.mxu0 %v4442_v44 }
  0x99   : > { %1549 = vmatmul.mubr.bf16.gmra.mrb[52].mxu1 %v4709_v59 }
  0x9a   : > { %1556 = vmatprep.mubr.bf16.mxu1 %v4229_v6 }
  0x9c   : > { %1123 = vmatmul.mubr.bf16.gmra.mrb[56].mxu0 %v4769_v47 }
  0x9d   : > { %1130 = vmatprep.mubr.bf16.mxu0 %v4471_v36 }
  0xa1   : > { %1557 = vmatmul.mubr.bf16.gmra.mrb[56].mxu1 %v4724_v49 }
  0xa2   : > { %1564 = vmatprep.mubr.bf16.mxu1 %v4301_v60 }
  0xa4   : > { %1131 = vmatmul.mubr.bf16.gmra.mrb[60].mxu0 %v4778_v32 }
  0xa5   : > { %3586 = vmatprep.mubr.bf16.mxu0 %v709_v19 }
  0xa9   : > { %1565 = vmatmul.mubr.bf16.gmra.mrb[60].mxu1 %v4733_v50 }
  0xaa   : > { %1572 = vmatprep.mubr.bf16.mxu1 %v4316_v26 }
  0xac   : > { %3587 = vmatmul.mubr.bf16.vlgmr.msra.gmra.mrb[64].mxu0 %v4789_v11 }
  0xad   : > { %3435 = vmatpush3.bf16.msra.mxu0 %v3962_v20  ;;  %3590 = vmatprep.mubr.bf16.mxu0 %v4800_v38  ;;  %v3976_v20 = vld [vmem:[%s5306_s3 + $0x1f8] sm:$0xff]  }
  0xae   : > { %3436 = vmatprep.subr.bf16.mxu0 %v3963_v37  ;;  %v3977_v37 = vld [vmem:[%s5306_s3 + $0x1b8] sm:$0xff]  }
  0xb1   : > { %1573 = vmatmul.mubr.bf16.gmra.mrb[64].mxu1 %v4742_v14  ;;  %3437 = vmatpush3.bf16.msra.mxu0 %v3964_v57  ;;  %v3979_v57 = vld [vmem:[%s5306_s3 + $0x208] sm:$0xff]  }
  0xb2   : > { %1580 = vmatprep.mubr.bf16.mxu1 %v4368_v27  ;;  %3438 = vmatprep.subr.bf16.mxu0 %v3965_v17 }
  0xb4   : > { %3591 = vmatmul.mubr.bf16.gmra.mrb[68].mxu0 %v4815_v53 }
  0xb5   : > { %3439 = vmatpush3.bf16.msra.mxu0 %v3966_v8  ;;  %3594 = vmatprep.mubr.bf16.mxu0 %v4826_v39 }
  0xb6   : > { %3440 = vmatprep.subr.bf16.mxu0 %v3967_v7 }
  0xb9   : > { %1581 = vmatmul.mubr.bf16.gmra.mrb[68].mxu1 %v4751_v41  ;;  %3441 = vmatpush3.bf16.msra.mxu0 %v3968_v24 }
  0xba   : > { %1588 = vmatprep.mubr.bf16.mxu1 %v4399_v12  ;;  %3442 = vmatprep.subr.bf16.mxu0 %v3970_v55 }
  0xbc   : > { %3595 = vmatmul.mubr.bf16.gmra.mrb[72].mxu0 %v4841_v51 }
  0xbd   : > { %3443 = vmatpush3.bf16.msra.mxu0 %v3971_v22  ;;  %3598 = vmatprep.mubr.bf16.mxu0 %v4852_v43 }
  0xbe   : > { %3444 = vmatprep.subr.bf16.mxu0 %v3972_v30 }
  0xc1   : > { %1589 = vmatmul.mubr.bf16.gmra.mrb[72].mxu1 %v4760_v29  ;;  %3445 = vmatpush3.bf16.msra.mxu0 %v3973_v25  ;;  %v3146_v25 = vld [vmem:[%s4157_s23 + $0x78] sm:$0xff]  }
  0xc2   : > { %1596 = vmatprep.mubr.bf16.mxu1 %v4442_v44  ;;  %3446 = vmatprep.subr.bf16.mxu0 %v3974_v31 }
  0xc4   : > { %3599 = vmatmul.mubr.bf16.gmra.mrb[76].mxu0 %v4867_v18 }
  0xc5   : > { %3447 = vmatpush3.bf16.msra.mxu0 %v3975_v40  ;;  %2004 = vmatprep.mubr.bf16.mxu0 %v4263_v35  ;;  %v3980_v35 = vld [vmem:[%s5306_s3 + $0x210] sm:$0xff]  }
  0xc6   : > { %3448 = vmatprep.subr.bf16.mxu0 %v3976_v20 }
  0xc9   : > { %1597 = vmatmul.mubr.bf16.gmra.mrb[76].mxu1 %v4769_v47  ;;  %3449 = vmatpush3.bf16.msra.mxu0 %v3977_v37 }
  0xca   : > { %3634 = vmatprep.mubr.bf16.mxu1 %v708_v58 }
  0xcc   : > { %2005 = vmatmul.mubr.bf16.vlgmr.msra.gmra.mrb[80].mxu0 %v4327_v34  ;;  %v3981_v34 = vld [vmem:[%s5306_s3 + $0x218] sm:$0xff]  }
  0xcd   : > { %2012 = vmatprep.mubr.bf16.mxu0 %v4355_v0  ;;  %v3982_v0 = vld [vmem:[%s5306_s3 + $0x220] sm:$0xff]  }
  0xd1   : > { %3635 = vmatmul.mubr.bf16.vlgmr.msra.gmra.mrb[80].mxu1 %v709_v19 }
  0xd2   : > { %3667 = vmatpush3.bf16.msra.mxu1 %v4714_v2  ;;  %3638 = vmatprep.mubr.bf16.mxu1 %v4789_v11 }
  0xd3   : > { %3668 = vmatprep.subr.bf16.mxu1 %v3979_v57 }
  0xd4   : > { %2013 = vmatmul.mubr.bf16.gmra.mrb[84].mxu0 %v4409_v45  ;;  %v3983_v45 = vld [vmem:[%s5306_s3 + $0x228] sm:$0xff]  }
  0xd5   : > { %2020 = vmatprep.mubr.bf16.mxu0 %v4418_v13  ;;  %v3984_v13 = vld [vmem:[%s5306_s3 + $0x230] sm:$0xff]  }
  0xd6   : > { %3669 = vmatpush3.bf16.msra.mxu1 %v3979_v57 }
  0xd7   : > { %3670 = vmatprep.subr.bf16.mxu1 %v3980_v35 }
  0xd9   : > { %3639 = vmatmul.mubr.bf16.gmra.mrb[84].mxu1 %v4800_v38 }
  0xda   : > { %3642 = vmatprep.mubr.bf16.mxu1 %v4815_v53  ;;  %3671 = vmatpush3.bf16.msra.mxu1 %v3980_v35 }
  0xdb   : > { %3672 = vmatprep.subr.bf16.mxu1 %v3981_v34 }
  0xdc   : > { %2021 = vmatmul.mubr.bf16.gmra.mrb[88].mxu0 %v4482_v33  ;;  %v3985_v33 = vld [vmem:[%s5306_s3 + $0x238] sm:$0xff]  }
  0xdd   : > { %2028 = vmatprep.mubr.bf16.mxu0 %v4504_v56 }
  0xde   : > { %3673 = vmatpush3.bf16.msra.mxu1 %v3981_v34 }
  0xdf   : > { %3674 = vmatprep.subr.bf16.mxu1 %v3982_v0 }
  0xe1   : > { %3643 = vmatmul.mubr.bf16.gmra.mrb[88].mxu1 %v4826_v39 }
  0xe2   : > { %3646 = vmatprep.mubr.bf16.mxu1 %v4841_v51  ;;  %3675 = vmatpush3.bf16.msra.mxu1 %v3982_v0 }
  0xe3   : > { %3676 = vmatprep.subr.bf16.mxu1 %v3983_v45 }
  0xe4   : > { %2029 = vmatmul.mubr.bf16.gmra.mrb[92].mxu0 %v4550_v48 }
  0xe5   : > { %2036 = vmatprep.mubr.bf16.mxu0 %v4534_v5 }
  0xe6   : > { %3677 = vmatpush3.bf16.msra.mxu1 %v3983_v45 }
  0xe7   : > { %3678 = vmatprep.subr.bf16.mxu1 %v3984_v13 }
  0xe9   : > { %3647 = vmatmul.mubr.bf16.gmra.mrb[92].mxu1 %v4852_v43 }
  0xea   : > { %3650 = vmatprep.mubr.bf16.mxu1 %v4867_v18  ;;  %3679 = vmatpush3.bf16.msra.mxu1 %v3984_v13 }
  0xeb   : > { %3680 = vmatprep.subr.bf16.mxu1 %v3985_v33 }
  0xec   : > { %2037 = vmatmul.mubr.bf16.gmra.mrb[96].mxu0 %v4600_v15 }
  0xed   : > { %2044 = vmatprep.mubr.bf16.mxu0 %v4561_v21 }
  0xee   : > { %3681 = vmatpush3.bf16.msra.mxu1 %v3985_v33 }
  0xf1   : > { %3651 = vmatmul.mubr.bf16.gmra.mrb[0].mxu1 %v4280_v46 }
  0xf2   : > { %3654 = vmatprep.mubr.bf16.mxu1 %v4292_v54 }
  0xf4   : > { %2045 = vmatmul.mubr.bf16.gmra.mrb[100].mxu0 %v4666_v9 }
  0xf5   : > { %2052 = vmatprep.mubr.bf16.mxu0 %v4602_v42 }
  0xf9   : > { %3655 = vmatmul.mubr.bf16.gmra.mrb[4].mxu1 %v4353_v1 }
  0xfa   : > { %3658 = vmatprep.mubr.bf16.mxu1 %v4377_v4 }
  0xfb   : > { %v3178_v5 = vpop.f32.mrb[0].mxu0 }
  0xfc   : > { %v3179_v56 = vpop.f32.mrb[1].mxu0  ;;  %2053 = vmatmul.mubr.bf16.gmra.mrb[104].mxu0 %v4694_v61 }
  0xfd   : > { %v4929_v48 = vadd.f32 %v3179_v56, %v3178_v5  ;;  %v3181_v15 = vpop.f32.mrb[2].mxu0  ;;  %2060 = vmatprep.mubr.bf16.mxu0 %v4223_v62 }
  0xfe   : > { %v3182_v52 = vpop.f32.mrb[3].mxu0 }
  0xff   : > { %v4932_v21 = vadd.f32 %v3182_v52, %v3181_v15 }
 0x101   : > { %3659 = vmatmul.mubr.bf16.gmra.mrb[8].mxu1 %v4427_v63 }
 0x102   : > { %3662 = vmatprep.mubr.bf16.mxu1 %v4456_v16 }
 0x103   : > { %v3184_v9 = vpop.f32.mrb[4].mxu0 }
 0x104   : > { %v3185_v42 = vpop.f32.mrb[5].mxu0  ;;  %2061 = vmatmul.mubr.bf16.gmra.mrb[108].mxu0 %v4709_v59 }
 0x105   : > { %v4937_v2 = vadd.f32 %v3185_v42, %v3184_v9  ;;  %v3187_v19 = vpop.f32.mrb[6].mxu0  ;;  %2068 = vmatprep.mubr.bf16.mxu0 %v4229_v6 }
 0x106   : > { %v3188_v17 = vpop.f32.mrb[7].mxu0 }
 0x107   : > { %v4940_v8 = vadd.f32 %v3188_v17, %v3187_v19 }
 0x109   : > { %3663 = vmatmul.mubr.bf16.gmra.mrb[12].mxu1 %v4511_v3 }
 0x10a   : > { %3682 = vmatprep.mubr.bf16.mxu1 %v4789_v11 }
 0x10b   : > { %v3190_v62 = vpop.f32.mrb[8].mxu0 }
 0x10c   : > { %2069 = vmatmul.mubr.bf16.gmra.mrb[112].mxu0 %v4724_v49  ;;  %v3191_v61 = vpop.f32.mrb[9].mxu0 }
 0x10d   : > { %v4946_v7 = vadd.f32 %v3191_v61, %v3190_v62  ;;  %v3193_v24 = vpop.f32.mrb[10].mxu0  ;;  %2076 = vmatprep.mubr.bf16.mxu0 %v4301_v60 }
 0x10e   : > { %v3194_v55 = vpop.f32.mrb[11].mxu0 }
 0x10f   : > { %v4949_v59 = vadd.f32 %v3194_v55, %v3193_v24 }
 0x111   : > { %3683 = vmatmul.mubr.bf16.vlgmr.msra.gmra.mrb[80].mxu1 %v4800_v38  ;;  %v3050_v38 = vunpack.c.h.bf16 %v3146_v25 }
 0x112   : > { %3686 = vmatprep.mubr.bf16.mxu1 %v4815_v53 }
 0x114   : > { %2077 = vmatmul.mubr.bf16.gmra.mrb[116].mxu0 %v4733_v50  ;;  %v3049_v50 = vunpack.c.l.bf16 %v3146_v25 }
 0x115   : > { %2084 = vmatprep.mubr.bf16.mxu0 %v4316_v26 }
 0x116   : > { %v3196_v6 = vpop.f32.mrb[12].mxu0 }
 0x117   : > { %v3197_v11 = vpop.f32.mrb[13].mxu0 }
 0x118   : > { %v4955_v49 = vadd.f32 %v3197_v11, %v3196_v6  ;;  %v3199_v22 = vpop.f32.mrb[14].mxu0 }
 0x119   : > { %v3200_v30 = vpop.f32.mrb[15].mxu0  ;;  %3687 = vmatmul.mubr.bf16.gmra.mrb[84].mxu1 %v4826_v39  ;;  %v3986_v39 = vld [vmem:[%s5304_s1] ss:$0 sm:$0xff] }
 0x11a   : > { %v4958_v60 = vadd.f32 %v3200_v30, %v3199_v22  ;;  %3690 = vmatprep.mubr.bf16.mxu1 %v4841_v51  ;;  %v500_v51 = vmul.f32 %v3986_v39, %v3049_v50  ;;  %v501_v20 = vmul.f32 %v3986_v39, %v3050_v38 }
 0x11c   : > { %2085 = vmatmul.mubr.bf16.gmra.mrb[120].mxu0 %v4742_v14 }
 0x11d   : > { %2092 = vmatprep.mubr.bf16.mxu0 %v4368_v27 }
 0x11f   : > { %v3202_v53 = vpop.f32.mrb[16].mxu0 }
 0x120   : > { %v3203_v26 = vpop.f32.mrb[17].mxu0 }
 0x121   : > { %3691 = vmatmul.mubr.bf16.gmra.mrb[88].mxu1 %v4852_v43  ;;  %v4965_v31 = vadd.f32 %v3203_v26, %v3202_v53  ;;  %v3205_v40 = vpop.f32.mrb[18].mxu0 }
 0x122   : > { %3694 = vmatprep.mubr.bf16.mxu1 %v4867_v18  ;;  %v3206_v14 = vpop.f32.mrb[19].mxu0  ;;  %v3987_v18 = vld [vmem:[%s5305_s2] ss:$0 sm:$0xff] }
 0x123   : > { %v4971_v27 = vadd.f32 %v3206_v14, %v3205_v40  ;;  %v502_v35 = vadd.f32 %v3987_v18, %v500_v51  ;;  %v503_v34 = vadd.f32 %v3987_v18, %v501_v20 }
 0x124   : > { %v3314_v37 = vpop.f32.mrb[16].mxu1  ;;  %2093 = vmatmul.mubr.bf16.gmra.mrb[124].mxu0 %v4751_v41 }
 0x125   : > { %v3315_v58 = vpop.f32.mrb[17].mxu1  ;;  %2100 = vmatprep.mubr.bf16.mxu0 %v4399_v12  ;;  %v504_v56 = vmax.f32 %v502_v35, 0.0  ;;  %v505_v12 = vmax.f32 %v503_v34, 0.0 }
 0x126   : > { %v4974_v43 = vadd.f32 %v3315_v58, %v3314_v37  ;;  %v3317_v57 = vpop.f32.mrb[18].mxu1 }
 0x127   : > { %v3318_v0 = vpop.f32.mrb[19].mxu1  ;;  %v3208_v13 = vpop.f32.mrb[20].mxu0  ;;  %v508_v62 = vmul.f32 0.0, %v505_v12 }
 0x128   : > { %v4980_v45 = vadd.f32 %v3318_v0, %v3317_v57  ;;  %v3209_v33 = vpop.f32.mrb[21].mxu0 }
 0x129   : > { %3695 = vmatmul.mubr.bf16.gmra.mrb[92].mxu1 %v4280_v46  ;;  %v4983_v5 = vadd.f32 %v3209_v33, %v3208_v13  ;;  %v3211_v41 = vpop.f32.mrb[22].mxu0  ;;  %v507_v46 = vmul.f32 0.0, %v504_v56 }
 0x12a   : > { %3698 = vmatprep.mubr.bf16.mxu1 %v4292_v54  ;;  %v3212_v15 = vpop.f32.mrb[23].mxu0 }
 0x12b   : > { %v4986_v9 = vadd.f32 %v3212_v15, %v3211_v41 }
 0x12c   : > { %v3320_v52 = vpop.f32.mrb[20].mxu1  ;;  %2101 = vmatmul.mubr.bf16.gmra.mrb[128].mxu0 %v4760_v29  ;;  %v509_v29 = vpack.c.bf16 %v508_v62, %v507_v46 }
 0x12d   : > { %v3321_v42 = vpop.f32.mrb[21].mxu1  ;;  %2108 = vmatprep.mubr.bf16.mxu0 %v4442_v44 }
 0x12e   : > { %v4989_v19 = vadd.f32 %v3321_v42, %v3320_v52  ;;  %v3323_v17 = vpop.f32.mrb[22].mxu1 }
 0x12f   : > { %v3324_v61 = vpop.f32.mrb[23].mxu1  ;;  %v3214_v54 = vpop.f32.mrb[24].mxu0 }
 0x130   : > { %v4992_v24 = vadd.f32 %v3324_v61, %v3323_v17  ;;  %v3215_v55 = vpop.f32.mrb[25].mxu0 }
 0x131   : > { %3699 = vmatmul.mubr.bf16.gmra.mrb[0].mxu1 %v4353_v1  ;;  %v4995_v6 = vadd.f32 %v3215_v55, %v3214_v54  ;;  %v3217_v11 = vpop.f32.mrb[26].mxu0  ;;  %v1767_v1 = vshrl.u32 %v509_v29, 16 }
 0x132   : > { %3702 = vmatprep.mubr.bf16.mxu1 %v4377_v4  ;;  %v3218_v22 = vpop.f32.mrb[27].mxu0 }
 0x133   : > { %v4998_v25 = vadd.f32 %v3218_v22, %v3217_v11  ;;  %v1769_v20 = vrot.slane %v1767_v1, 7 }
 0x134   : > { %v3326_v30 = vpop.f32.mrb[24].mxu1  ;;  %2109 = vmatmul.mubr.bf16.gmra.mrb[132].mxu0 %v4769_v47  ;;  %v1770_v47 = vshll.u32 %v509_v29, 16 }
 0x135   : > { %v3327_v44 = vpop.f32.mrb[25].mxu1  ;;  %2116 = vmatprep.mubr.bf16.mxu0 %v4471_v36 }
 0x136   : > { %v5001_v50 = vadd.f32 %v3327_v44, %v3326_v30  ;;  %v3329_v38 = vpop.f32.mrb[26].mxu1  ;;  %v1775_v35 = vrot.slane %v1770_v47, 1 }
 0x137   : > { %v3330_v53 = vpop.f32.mrb[27].mxu1  ;;  %v3220_v40 = vpop.f32.mrb[28].mxu0 }
 0x138   : > { %v5004_v26 = vadd.f32 %v3330_v53, %v3329_v38  ;;  %v3221_v4 = vpop.f32.mrb[29].mxu0  ;;  %v1776_v56 = vor.u32 %v1775_v35, %v1767_v1 }
 0x139   : > { %3703 = vmatmul.mubr.bf16.gmra.mrb[4].mxu1 %v4427_v63  ;;  %v5007_v39 = vadd.f32 %v3221_v4, %v3220_v40  ;;  %v3223_v51 = vpop.f32.mrb[30].mxu0  ;;  %v1772_v63 = vor.u32 %v1770_v47, %v1769_v20 }
 0x13a   : > { %3706 = vmatprep.mubr.bf16.mxu1 %v4456_v16  ;;  %v3224_v14 = vpop.f32.mrb[31].mxu0 }
 0x13b   : > { %v5010_v58 = vadd.f32 %v3224_v14, %v3223_v51 }
 0x13c   : > { %v3332_v37 = vpop.f32.mrb[28].mxu1  ;;  %2117 = vmatmul.mubr.bf16.gmra.mrb[136].mxu0 %v4778_v32  ;;  %v1774_v32 = vsel %vm4244_vm4, 0, %v1772_v63 }
 0x13d   : > { %v3333_v36 = vpop.f32.mrb[29].mxu1  ;;  %2124 = vmatprep.mubr.bf16.mxu0 %v509_v29 }
 0x13e   : > { %v5013_v57 = vadd.f32 %v3333_v36, %v3332_v37  ;;  %v3335_v18 = vpop.f32.mrb[30].mxu1 }
 0x13f   : > { %v3336_v34 = vpop.f32.mrb[31].mxu1  ;;  %v3226_v13 = vpop.f32.mrb[32].mxu0 }
 0x140   : > { %v5015_v0 = vadd.f32 %v3336_v34, %v3335_v18  ;;  %v3227_v16 = vpop.f32.mrb[33].mxu0 }
 0x141   : > { %3707 = vmatmul.mubr.bf16.gmra.mrb[8].mxu1 %v4511_v3  ;;  %v5018_v33 = vadd.f32 %v3227_v16, %v3226_v13  ;;  %v3229_v41 = vpop.f32.mrb[34].mxu0  ;;  %v1778_v3 = vsel %vm4252_vm5, %v1776_v56, 0 }
 0x142   : > { %3710 = vmatprep.mubr.bf16.mxu1 %v4529_v10  ;;  %v3230_v12 = vpop.f32.mrb[35].mxu0 }
 0x143   : > { %v3231_v52 = vadd.f32 %v3230_v12, %v3229_v41 }
 0x144   : > { %v3338_v15 = vpop.f32.mrb[32].mxu1  ;;  %2125 = vmatmul.mubr.bf16.gmra.mrb[140].mxu0 %v1774_v32 }
 0x145   : > { %v3339_v42 = vpop.f32.mrb[33].mxu1 }
 0x146   : > { %v5023_v17 = vadd.f32 %v3339_v42, %v3338_v15  ;;  %v3341_v46 = vpop.f32.mrb[34].mxu1 }
 0x147   : > { %v3342_v62 = vpop.f32.mrb[35].mxu1  ;;  %v3232_v54 = vpop.f32.mrb[36].mxu0 }
 0x148   : > { %v5027_v61 = vadd.f32 %v3342_v62, %v3341_v46  ;;  %v3233_v10 = vpop.f32.mrb[37].mxu0 }
 0x149   : > { %3711 = vmatmul.mubr.bf16.gmra.mrb[12].mxu1 %v1778_v3  ;;  %v3234_v23 = vadd.f32 %v3233_v10, %v3232_v54  ;;  %v3235_v55 = vpop.f32.mrb[38].mxu0 }
 0x14a   : > { %v3236_v11 = vpop.f32.mrb[39].mxu0 }
 0x14b   : > { %v3237_v22 = vadd.f32 %v3236_v11, %v3235_v55 }
 0x14c   : > { %v3344_v29 = vpop.f32.mrb[36].mxu1 }
 0x14d   : > { %v3345_v30 = vpop.f32.mrb[37].mxu1 }
 0x14e   : > { %v5029_v44 = vadd.f32 %v3345_v30, %v3344_v29  ;;  %v3347_v38 = vpop.f32.mrb[38].mxu1 }
 0x14f   : > { %v3348_v1 = vpop.f32.mrb[39].mxu1  ;;  %v3238_v28 = vpop.f32.mrb[40].mxu0 }
 0x150   : > { %v5031_v53 = vadd.f32 %v3348_v1, %v3347_v38  ;;  %v3239_v40 = vpop.f32.mrb[41].mxu0 }
 0x151   : > { %v3240_v4 = vadd.f32 %v3239_v40, %v3238_v28  ;;  %v3241_v51 = vpop.f32.mrb[42].mxu0 }
 0x152   : > { %v3242_v20 = vpop.f32.mrb[43].mxu0 }
 0x153   : > { %v3243_v14 = vadd.f32 %v3242_v20, %v3241_v51 }
 0x154   : > { %v3350_v47 = vpop.f32.mrb[40].mxu1 }
 0x155   : > { %v3351_v37 = vpop.f32.mrb[41].mxu1 }
 0x156   : > { %v5033_v36 = vadd.f32 %v3351_v37, %v3350_v47  ;;  %v3353_v18 = vpop.f32.mrb[42].mxu1 }
 0x157   : > { %v3354_v63 = vpop.f32.mrb[43].mxu1  ;;  %v3244_v34 = vpop.f32.mrb[44].mxu0 }
 0x158   : > { %v5035_v35 = vadd.f32 %v3354_v63, %v3353_v18  ;;  %v3245_v13 = vpop.f32.mrb[45].mxu0 }
 0x159   : > { %v5037_v16 = vadd.f32 %v3245_v13, %v3244_v34  ;;  %v3247_v41 = vpop.f32.mrb[46].mxu0 }
 0x15a   : > { %v3248_v32 = vpop.f32.mrb[47].mxu0 }
 0x15b   : > { %v5039_v12 = vadd.f32 %v3248_v32, %v3247_v41 }
 0x15c   : > { %v3356_v56 = vpop.f32.mrb[44].mxu1 }
 0x15d   : > { %v3357_v15 = vpop.f32.mrb[45].mxu1 }
 0x15e   : > { %v5041_v42 = vadd.f32 %v3357_v15, %v3356_v56  ;;  %v3359_v46 = vpop.f32.mrb[46].mxu1 }
 0x15f   : > { %v3360_v3 = vpop.f32.mrb[47].mxu1  ;;  %v3250_v54 = vpop.f32.mrb[48].mxu0 }
 0x160   : > { %v5043_v62 = vadd.f32 %v3360_v3, %v3359_v46  ;;  %v3251_v10 = vpop.f32.mrb[49].mxu0 }
 0x161   : > { %v5045_v55 = vadd.f32 %v3251_v10, %v3250_v54  ;;  %v3253_v11 = vpop.f32.mrb[50].mxu0 }
 0x162   : > { %v3254_v29 = vpop.f32.mrb[51].mxu0 }
 0x163   : > { %v5047_v38 = vadd.f32 %v3254_v29, %v3253_v11 }
 0x164   : > { %v3362_v30 = vpop.f32.mrb[48].mxu1 }
 0x165   : > { %v3363_v1 = vpop.f32.mrb[49].mxu1 }
 0x166   : > { %v3364_v28 = vadd.f32 %v3363_v1, %v3362_v30  ;;  %v3365_v40 = vpop.f32.mrb[50].mxu1 }
 0x167   : > { %v3366_v51 = vpop.f32.mrb[51].mxu1  ;;  %v3256_v37 = vpop.f32.mrb[52].mxu0 }
 0x168   : > { %v5050_v20 = vadd.f32 %v3364_v28, %v5018_v33  ;;  %v3367_v47 = vadd.f32 %v3366_v51, %v3365_v40  ;;  %v3257_v18 = vpop.f32.mrb[53].mxu0 }
 0x169   : > { %v5054_v34 = vadd.f32 %v3257_v18, %v3256_v37  ;;  %v3259_v13 = vpop.f32.mrb[54].mxu0 }
 0x16a   : > { %v5052_v63 = vadd.f32 %v3367_v47, %v3231_v52  ;;  %v3260_v41 = vpop.f32.mrb[55].mxu0 }
 0x16b   : > { %v5056_v56 = vadd.f32 %v3260_v41, %v3259_v13 }
 0x16c   : > { %v3368_v32 = vpop.f32.mrb[52].mxu1 }
 0x16d   : > { %v3369_v15 = vpop.f32.mrb[53].mxu1 }
 0x16e   : > { %v3370_v46 = vadd.f32 %v3369_v15, %v3368_v32  ;;  %v3371_v3 = vpop.f32.mrb[54].mxu1 }
 0x16f   : > { %v3372_v54 = vpop.f32.mrb[55].mxu1  ;;  %v3262_v11 = vpop.f32.mrb[56].mxu0 }
 0x170   : > { %v5058_v10 = vadd.f32 %v3370_v46, %v3234_v23  ;;  %v3373_v33 = vadd.f32 %v3372_v54, %v3371_v3  ;;  %v3263_v29 = vpop.f32.mrb[57].mxu0 }
 0x171   : > { %v5062_v52 = vadd.f32 %v3263_v29, %v3262_v11  ;;  %v3265_v1 = vpop.f32.mrb[58].mxu0 }
 0x172   : > { %v5060_v30 = vadd.f32 %v3373_v33, %v3237_v22  ;;  %v3266_v28 = vpop.f32.mrb[59].mxu0 }
 0x173   : > { %v5064_v51 = vadd.f32 %v3266_v28, %v3265_v1 }
 0x174   : > { %v3374_v40 = vpop.f32.mrb[56].mxu1 }
 0x175   : > { %v3375_v47 = vpop.f32.mrb[57].mxu1 }
 0x176   : > { %v3376_v37 = vadd.f32 %v3375_v47, %v3374_v40  ;;  %v3377_v18 = vpop.f32.mrb[58].mxu1 }
 0x177   : > { %v3378_v13 = vpop.f32.mrb[59].mxu1  ;;  %v3268_v32 = vpop.f32.mrb[60].mxu0 }
 0x178   : > { %v5066_v41 = vadd.f32 %v3376_v37, %v3240_v4  ;;  %v3379_v23 = vadd.f32 %v3378_v13, %v3377_v18  ;;  %v3269_v15 = vpop.f32.mrb[61].mxu0 }
 0x179   : > { %v5070_v22 = vadd.f32 %v3269_v15, %v3268_v32  ;;  %v3271_v3 = vpop.f32.mrb[62].mxu0 }
 0x17a   : > { %v5068_v46 = vadd.f32 %v3379_v23, %v3243_v14  ;;  %v3272_v54 = vpop.f32.mrb[63].mxu0 }
 0x17b   : > { %v5072_v11 = vadd.f32 %v3272_v54, %v3271_v3 }
 0x17c   : > { %v3380_v33 = vpop.f32.mrb[60].mxu1 }
 0x17d   : > { %v3381_v29 = vpop.f32.mrb[61].mxu1 }
 0x17e   : > { %v3382_v1 = vadd.f32 %v3381_v29, %v3380_v33  ;;  %v3383_v28 = vpop.f32.mrb[62].mxu1 }
 0x17f   : > { %v3384_v40 = vpop.f32.mrb[63].mxu1  ;;  %v3588_v37 = vpop.f32.mrb[64].mxu0 }
 0x180   : > { %v5075_v47 = vadd.f32 %v3382_v1, %v5037_v16  ;;  %v3385_v4 = vadd.f32 %v3384_v40, %v3383_v28  ;;  %v1182_v18 = vadd.f32 %v3588_v37, %v4937_v2  ;;  %v1173_v14 = vpop.f32.mrb[65].mxu0 }
 0x181   : > { %v1174_v23 = vadd.f32 %v4929_v48, %v1173_v14  ;;  %v3589_v32 = vpop.f32.mrb[66].mxu0 }
 0x182   : > { %v5079_v13 = vadd.f32 %v3385_v4, %v5039_v12  ;;  %v5083_v15 = vadd.f32 %v4989_v19, %v1182_v18  ;;  %v1185_v3 = vadd.f32 %v3589_v32, %v4940_v8  ;;  %v1176_v54 = vpop.f32.mrb[67].mxu0 }
 0x183   : > { %v5087_v16 = vadd.f32 %v4974_v43, %v1174_v23  ;;  %v1177_v29 = vadd.f32 %v4932_v21, %v1176_v54 }
 0x184   : > { %v3386_v33 = vpop.f32.mrb[64].mxu1  ;;  %v5091_v1 = vadd.f32 %v4992_v24, %v1185_v3 }
 0x185   : > { %v3387_v2 = vpop.f32.mrb[65].mxu1  ;;  %v5094_v48 = vadd.f32 %v4980_v45, %v1177_v29 }
 0x186   : > { %v3388_v12 = vadd.f32 %v3387_v2, %v3386_v33  ;;  %v3389_v28 = vpop.f32.mrb[66].mxu1 }
 0x187   : > { %v3390_v19 = vpop.f32.mrb[67].mxu1  ;;  %v3592_v4 = vpop.f32.mrb[68].mxu0 }
 0x188   : > { %v5097_v40 = vadd.f32 %v3388_v12, %v5045_v55  ;;  %v3391_v8 = vadd.f32 %v3390_v19, %v3389_v28  ;;  %v1198_v43 = vadd.f32 %v3592_v4, %v4955_v49  ;;  %v1189_v37 = vpop.f32.mrb[69].mxu0 }
 0x189   : > { %v1190_v24 = vadd.f32 %v4946_v7, %v1189_v37  ;;  %v3593_v18 = vpop.f32.mrb[70].mxu0 }
 0x18a   : > { %v5101_v21 = vadd.f32 %v3391_v8, %v5047_v38  ;;  %v5105_v14 = vadd.f32 %v5013_v57, %v1198_v43  ;;  %v1201_v45 = vadd.f32 %v3593_v18, %v4958_v60  ;;  %v1192_v23 = vpop.f32.mrb[71].mxu0 }
 0x18b   : > { %v5109_v55 = vadd.f32 %v5001_v50, %v1190_v24  ;;  %v1193_v3 = vadd.f32 %v4949_v59, %v1192_v23 }
 0x18c   : > { %v3392_v32 = vpop.f32.mrb[68].mxu1  ;;  %v5113_v54 = vadd.f32 %v5015_v0, %v1201_v45 }
 0x18d   : > { %v3393_v49 = vpop.f32.mrb[69].mxu1  ;;  %v5116_v7 = vadd.f32 %v5004_v26, %v1193_v3 }
 0x18e   : > { %v3394_v38 = vadd.f32 %v3393_v49, %v3392_v32  ;;  %v3395_v33 = vpop.f32.mrb[70].mxu1 }
 0x18f   : > { %v3396_v57 = vpop.f32.mrb[71].mxu1  ;;  %v3596_v2 = vpop.f32.mrb[72].mxu0 }
 0x190   : > { %v5119_v29 = vadd.f32 %v3394_v38, %v5054_v34  ;;  %v3397_v60 = vadd.f32 %v3396_v57, %v3395_v33  ;;  %v1214_v50 = vadd.f32 %v3596_v2, %v4983_v5  ;;  %v1205_v12 = vpop.f32.mrb[73].mxu0 }
 0x191   : > { %v1206_v0 = vadd.f32 %v4965_v31, %v1205_v12  ;;  %v3597_v28 = vpop.f32.mrb[74].mxu0 }
 0x192   : > { %v5123_v59 = vadd.f32 %v3397_v60, %v5056_v56  ;;  %v5127_v19 = vadd.f32 %v5029_v44, %v1214_v50  ;;  %v1217_v26 = vadd.f32 %v3597_v28, %v4986_v9  ;;  %v1208_v8 = vpop.f32.mrb[75].mxu0 }
 0x193   : > { %v5131_v34 = vadd.f32 %v5023_v17, %v1206_v0  ;;  %v1209_v43 = vadd.f32 %v4971_v27, %v1208_v8 }
 0x194   : > { %v3398_v4 = vpop.f32.mrb[72].mxu1  ;;  %v5135_v37 = vadd.f32 %v5031_v53, %v1217_v26 }
 0x195   : > { %v3399_v5 = vpop.f32.mrb[73].mxu1  ;;  %v5138_v31 = vadd.f32 %v5027_v61, %v1209_v43 }
 0x196   : > { %v3400_v56 = vadd.f32 %v3399_v5, %v3398_v4  ;;  %v3401_v24 = vpop.f32.mrb[74].mxu1 }
 0x197   : > { %v3402_v44 = vpop.f32.mrb[75].mxu1  ;;  %v3600_v45 = vpop.f32.mrb[76].mxu0 }
 0x198   : > { %v5141_v18 = vadd.f32 %v3400_v56, %v5062_v52  ;;  %v3403_v9 = vadd.f32 %v3402_v44, %v3401_v24  ;;  %v1230_v17 = vadd.f32 %v3600_v45, %v5007_v39  ;;  %v1221_v23 = vpop.f32.mrb[77].mxu0 }
 0x199   : > { %v1222_v53 = vadd.f32 %v4995_v6, %v1221_v23  ;;  %v3601_v32 = vpop.f32.mrb[78].mxu0 }
 0x19a   : > { %v5145_v27 = vadd.f32 %v3403_v9, %v5064_v51  ;;  %v5149_v3 = vadd.f32 %v5041_v42, %v1230_v17  ;;  %v1233_v61 = vadd.f32 %v3601_v32, %v5010_v58  ;;  %v1224_v49 = vpop.f32.mrb[79].mxu0 }
 0x19b   : > { %v5153_v52 = vadd.f32 %v5033_v36, %v1222_v53  ;;  %v1225_v33 = vadd.f32 %v4998_v25, %v1224_v49 }
 0x19c   : > { %v3404_v38 = vpop.f32.mrb[76].mxu1  ;;  %v5157_v57 = vadd.f32 %v5043_v62, %v1233_v61 }
 0x19d   : > { %v3405_v39 = vpop.f32.mrb[77].mxu1  ;;  %v1530_v6 = vadd.f32 %v5035_v35, %v1225_v33 }
 0x19e   : > { %v3406_v51 = vadd.f32 %v3405_v39, %v3404_v38  ;;  %v3407_v60 = vpop.f32.mrb[78].mxu1 }
 0x19f   : > { %v3408_v2 = vpop.f32.mrb[79].mxu1  ;;  %v3450_v50 = vpop.f32.mrb[80].mxu0 }
 0x1a0   : > { %v5161_v42 = vadd.f32 %v3406_v51, %v5070_v22  ;;  %v3409_v58 = vadd.f32 %v3408_v2, %v3407_v60  ;;  %v3451_v12 = vpop.f32.mrb[81].mxu0 }
 0x1a1   : > { %v3452_v0 = vadd.f32 %v3451_v12, %v3450_v50  ;;  %v3453_v25 = vpop.f32.mrb[82].mxu0 }
 0x1a2   : > { %v5164_v36 = vadd.f32 %v3409_v58, %v5072_v11  ;;  %v3454_v28 = vpop.f32.mrb[83].mxu0 }
 0x1a3   : > { %v3455_v26 = vadd.f32 %v3454_v28, %v3453_v25  ;;  %v5167_v62 = vadd.f32 %v3452_v0, %v5087_v16 }
 0x1a5   : > { %v5170_v8 = vadd.f32 %v3455_v26, %v5094_v48 }
 0x1a7   : > { %v3456_v35 = vpop.f32.mrb[84].mxu0 }
 0x1a8   : > { %v3457_v4 = vpop.f32.mrb[85].mxu0 }
 0x1a9   : > { %v3458_v22 = vadd.f32 %v3457_v4, %v3456_v35  ;;  %v3459_v43 = vpop.f32.mrb[86].mxu0 }
 0x1aa   : > { %v3460_v5 = vpop.f32.mrb[87].mxu0 }
 0x1ab   : > { %v3461_v56 = vadd.f32 %v3460_v5, %v3459_v43  ;;  %v3732_v24 = vadd.f32 %v3458_v22, %v5083_v15 }
 0x1ad   : > { %v3740_v11 = vadd.f32 %v3461_v56, %v5091_v1 }
 0x1af   : > { %v3462_v44 = vpop.f32.mrb[88].mxu0 }
 0x1b0   : > { %v3463_v9 = vpop.f32.mrb[89].mxu0 }
 0x1b1   : > { %v3464_v45 = vadd.f32 %v3463_v9, %v3462_v44  ;;  %v3465_v17 = vpop.f32.mrb[90].mxu0 }
 0x1b2   : > { %v3466_v23 = vpop.f32.mrb[91].mxu0 }
 0x1b3   : > { %v3467_v16 = vadd.f32 %v3466_v23, %v3465_v17  ;;  %v5175_v53 = vadd.f32 %v3464_v45, %v5109_v55 }
 0x1b5   : > { %v5178_v48 = vadd.f32 %v3467_v16, %v5116_v7 }
 0x1b7   : > { %v3468_v32 = vpop.f32.mrb[92].mxu0 }
 0x1b8   : > { %v3469_v61 = vpop.f32.mrb[93].mxu0 }
 0x1b9   : > { %v3470_v49 = vadd.f32 %v3469_v61, %v3468_v32  ;;  %v3471_v38 = vpop.f32.mrb[94].mxu0 }
 0x1ba   : > { %v3472_v33 = vpop.f32.mrb[95].mxu0 }
 0x1bb   : > { %v3473_v15 = vadd.f32 %v3472_v33, %v3471_v38  ;;  %v5181_v1 = vadd.f32 %v3470_v49, %v5105_v14 }
 0x1bd   : > { %v5184_v39 = vadd.f32 %v3473_v15, %v5113_v54 }
 0x1bf   : > { %v3474_v51 = vpop.f32.mrb[96].mxu0 }
 0x1c0   : > { %v3475_v60 = vpop.f32.mrb[97].mxu0 }
 0x1c1   : > { %v3476_v2 = vadd.f32 %v3475_v60, %v3474_v51  ;;  %v3477_v55 = vpop.f32.mrb[98].mxu0 }
 0x1c2   : > { %v3478_v58 = vpop.f32.mrb[99].mxu0 }
 0x1c3   : > { %v3479_v50 = vadd.f32 %v3478_v58, %v3477_v55  ;;  %v5187_v7 = vadd.f32 %v3476_v2, %v5131_v34 }
 0x1c5   : > { %v5190_v12 = vadd.f32 %v3479_v50, %v5138_v31 }
 0x1c7   : > { %v3480_v0 = vpop.f32.mrb[100].mxu0 }
 0x1c8   : > { %v3481_v25 = vpop.f32.mrb[101].mxu0 }
 0x1c9   : > { %v3482_v28 = vadd.f32 %v3481_v25, %v3480_v0  ;;  %v3483_v14 = vpop.f32.mrb[102].mxu0 }
 0x1ca   : > { %v3484_v26 = vpop.f32.mrb[103].mxu0 }
 0x1cb   : > { %v3485_v35 = vadd.f32 %v3484_v26, %v3483_v14  ;;  %v5193_v54 = vadd.f32 %v3482_v28, %v5127_v19 }
 0x1cd   : > { %v5196_v4 = vadd.f32 %v3485_v35, %v5135_v37 }
 0x1cf   : > { %v3486_v22 = vpop.f32.mrb[104].mxu0 }
 0x1d0   : > { %v3487_v43 = vpop.f32.mrb[105].mxu0 }
 0x1d1   : > { %v3488_v5 = vadd.f32 %v3487_v43, %v3486_v22  ;;  %v3489_v34 = vpop.f32.mrb[106].mxu0 }
 0x1d2   : > { %v3490_v56 = vpop.f32.mrb[107].mxu0 }
 0x1d3   : > { %v3491_v44 = vadd.f32 %v3490_v56, %v3489_v34  ;;  %v5199_v31 = vadd.f32 %v3488_v5, %v5153_v52 }
 0x1d5   : > { %v5201_v9 = vadd.f32 %v3491_v44, %v1530_v6 }
 0x1d7   : > { %v3492_v45 = vpop.f32.mrb[108].mxu0 }
 0x1d8   : > { %v3493_v17 = vpop.f32.mrb[109].mxu0 }
 0x1d9   : > { %v3494_v23 = vadd.f32 %v3493_v17, %v3492_v45  ;;  %v3495_v16 = vpop.f32.mrb[110].mxu0 }
 0x1da   : > { %v3496_v19 = vpop.f32.mrb[111].mxu0 }
 0x1db   : > { %v3497_v32 = vadd.f32 %v3496_v19, %v3495_v16  ;;  %v5204_v37 = vadd.f32 %v3494_v23, %v5149_v3 }
 0x1dd   : > { %v5207_v61 = vadd.f32 %v3497_v32, %v5157_v57 }
 0x1df   : > { %v3498_v49 = vpop.f32.mrb[112].mxu0 }
 0x1e0   : > { %v3499_v38 = vpop.f32.mrb[113].mxu0 }
 0x1e1   : > { %v3500_v33 = vadd.f32 %v3499_v38, %v3498_v49  ;;  %v3501_v52 = vpop.f32.mrb[114].mxu0 }
 0x1e2   : > { %v3502_v15 = vpop.f32.mrb[115].mxu0 }
 0x1e3   : > { %v3503_v51 = vadd.f32 %v3502_v15, %v3501_v52  ;;  %v5210_v60 = vadd.f32 %v5050_v20, %v3500_v33 }
 0x1e4   : > { %v3684_v6 = vpop.f32.mrb[80].mxu1 }
 0x1e5   : > { %v3733_v2 = vadd.f32 %v3732_v24, %v3684_v6  ;;  %v2167_v55 = vpop.f32.mrb[81].mxu1  ;;  %v5214_v50 = vadd.f32 %v5052_v63, %v3503_v51 }
 0x1e6   : > { %v3737_v58 = vadd.f32 %v5167_v62, %v2167_v55  ;;  %v3685_v3 = vpop.f32.mrb[82].mxu1 }
 0x1e7   : > { %v3741_v57 = vadd.f32 %v3740_v11, %v3685_v3  ;;  %v2170_v0 = vpop.f32.mrb[83].mxu1  ;;  %v3504_v24 = vpop.f32.mrb[116].mxu0  ;;  %v2525_v22 = vmul.f32 %v3733_v2, %v3733_v2 }
 0x1e8   : > { %v3745_v20 = vadd.f32 %v5170_v8, %v2170_v0  ;;  %v2523_v25 = vmul.f32 %v3737_v58, %v3737_v58  ;;  %v3505_v62 = vpop.f32.mrb[117].mxu0 }
 0x1e9   : > { %v3059_v28 = vpack.c.bf16 %v3741_v57, %v3733_v2  ;;  %v3506_v35 = vadd.f32 %v3505_v62, %v3504_v24  ;;  %v3507_v11 = vpop.f32.mrb[118].mxu0  ;;  %v2526_v8 = vmul.f32 %v3741_v57, %v3741_v57 }
 0x1ea   : > { %v3054_v14 = vpack.c.bf16 %v3745_v20, %v3737_v58  ;;  %v2486_v26 = vadd.f32 %v3745_v20, %v3737_v58  ;;  %v2524_v63 = vmul.f32 %v3745_v20, %v3745_v20  ;;  %v3508_v43 = vpop.f32.mrb[119].mxu0 }
 0x1eb   : > { %3147 = vst [vmem:[%s5221_s22 + $0x8] sm:$0xff] %v3059_v28   ;;  %v3509_v44 = vadd.f32 %v3508_v43, %v3507_v11  ;;  %v5227_v45 = vadd.f32 %v5058_v10, %v3506_v35 }
 0x1ec   : > { %3055 = vst [vmem:[%s5221_s22] sm:$0xff] %v3054_v14   ;;  %v2487_v5 = vadd.f32 %v3733_v2, %v2486_v26  ;;  %v2555_v34 = vadd.f32 %v2524_v63, %v2523_v25  ;;  %v3688_v56 = vpop.f32.mrb[84].mxu1 }
 0x1ed   : > { %v3749_v17 = vadd.f32 %v5181_v1, %v3688_v56  ;;  %v2183_v23 = vpop.f32.mrb[85].mxu1  ;;  %v5232_v38 = vadd.f32 %v5060_v30, %v3509_v44 }
 0x1ee   : > { %v2556_v16 = vadd.f32 %v2555_v34, %v2525_v22  ;;  %v3753_v19 = vadd.f32 %v5175_v53, %v2183_v23  ;;  %v2488_v32 = vadd.f32 %v3741_v57, %v2487_v5  ;;  %v3689_v49 = vpop.f32.mrb[86].mxu1 }
 0x1ef   : > { %v3757_v33 = vadd.f32 %v5184_v39, %v3689_v49  ;;  %v2186_v52 = vpop.f32.mrb[87].mxu1  ;;  %v3510_v1 = vpop.f32.mrb[120].mxu0  ;;  %v2529_v24 = vmul.f32 %v3749_v17, %v3749_v17 }
 0x1f0   : > { %v2489_v15 = vadd.f32 %v3753_v19, %v2488_v32  ;;  %v2527_v10 = vmul.f32 %v3753_v19, %v3753_v19  ;;  %v2557_v6 = vadd.f32 %v2556_v16, %v2526_v8  ;;  %v3761_v51 = vadd.f32 %v5178_v48, %v2186_v52  ;;  %v3511_v55 = vpop.f32.mrb[121].mxu0 }
 0x1f1   : > { %v3069_v2 = vpack.c.bf16 %v3757_v33, %v3749_v17  ;;  %v3513_v0 = vpop.f32.mrb[122].mxu0  ;;  %v3512_v30 = vadd.f32 %v3511_v55, %v3510_v1  ;;  %v2530_v14 = vmul.f32 %v3757_v33, %v3757_v33 }
 0x1f2   : > { %v2558_v58 = vadd.f32 %v2557_v6, %v2527_v10  ;;  %v3064_v53 = vpack.c.bf16 %v3761_v51, %v3753_v19  ;;  %v2490_v3 = vadd.f32 %v3761_v51, %v2489_v15  ;;  %v2528_v57 = vmul.f32 %v3761_v51, %v3761_v51  ;;  %v3514_v20 = vpop.f32.mrb[123].mxu0 }
 0x1f3   : > { %3149 = vst [vmem:[%s5221_s22 + $0x18] sm:$0xff] %v3069_v2   ;;  %v3515_v62 = vadd.f32 %v3514_v20, %v3513_v0  ;;  %v5240_v63 = vadd.f32 %v5066_v41, %v3512_v30 }
 0x1f4   : > { %3148 = vst [vmem:[%s5221_s22 + $0x10] sm:$0xff] %v3064_v53   ;;  %v2491_v39 = vadd.f32 %v3749_v17, %v2490_v3  ;;  %v2559_v25 = vadd.f32 %v2558_v58, %v2528_v57  ;;  %v3692_v28 = vpop.f32.mrb[88].mxu1 }
 0x1f5   : > { %v3765_v48 = vadd.f32 %v5193_v54, %v3692_v28  ;;  %v2199_v26 = vpop.f32.mrb[89].mxu1  ;;  %v5244_v5 = vadd.f32 %v5068_v46, %v3515_v62 }
 0x1f6   : > { %v2560_v35 = vadd.f32 %v2559_v25, %v2529_v24  ;;  %v3769_v11 = vadd.f32 %v5187_v7, %v2199_v26  ;;  %v2492_v22 = vadd.f32 %v3757_v33, %v2491_v39  ;;  %v3693_v43 = vpop.f32.mrb[90].mxu1 }
 0x1f7   : > { %v3773_v34 = vadd.f32 %v5196_v4, %v3693_v43  ;;  %v2202_v56 = vpop.f32.mrb[91].mxu1  ;;  %v3516_v41 = vpop.f32.mrb[124].mxu0  ;;  %v2533_v15 = vmul.f32 %v3765_v48, %v3765_v48 }
 0x1f8   : > { %v2493_v44 = vadd.f32 %v3769_v11, %v2492_v22  ;;  %v2531_v8 = vmul.f32 %v3769_v11, %v3769_v11  ;;  %v2561_v54 = vadd.f32 %v2560_v35, %v2530_v14  ;;  %v3777_v17 = vadd.f32 %v5190_v12, %v2202_v56  ;;  %v3517_v16 = vpop.f32.mrb[125].mxu0 }
 0x1f9   : > { %v3079_v23 = vpack.c.bf16 %v3773_v34, %v3765_v48  ;;  %v3519_v33 = vpop.f32.mrb[126].mxu0  ;;  %v3518_v46 = vadd.f32 %v3517_v16, %v3516_v41  ;;  %v2534_v1 = vmul.f32 %v3773_v34, %v3773_v34 }
 0x1fa   : > { %v2562_v19 = vadd.f32 %v2561_v54, %v2531_v8  ;;  %v3074_v7 = vpack.c.bf16 %v3777_v17, %v3769_v11  ;;  %v2494_v32 = vadd.f32 %v3777_v17, %v2493_v44  ;;  %v2532_v49 = vmul.f32 %v3777_v17, %v3777_v17  ;;  %v3520_v52 = vpop.f32.mrb[127].mxu0 }
 0x1fb   : > { %3151 = vst [vmem:[%s5221_s22 + $0x28] sm:$0xff] %v3079_v23   ;;  %v3521_v51 = vadd.f32 %v3520_v52, %v3519_v33  ;;  %v3807_v55 = vadd.f32 %v5075_v47, %v3518_v46 }
 0x1fc   : > { %3150 = vst [vmem:[%s5221_s22 + $0x20] sm:$0xff] %v3074_v7   ;;  %v2495_v4 = vadd.f32 %v3765_v48, %v2494_v32  ;;  %v2563_v10 = vadd.f32 %v2562_v19, %v2532_v49  ;;  %v3696_v6 = vpop.f32.mrb[92].mxu1 }
 0x1fd   : > { %v3781_v12 = vadd.f32 %v5204_v37, %v3696_v6  ;;  %v2215_v2 = vpop.f32.mrb[93].mxu1  ;;  %v5254_v0 = vadd.f32 %v5079_v13, %v3521_v51 }
 0x1fe   : > { %v2564_v58 = vadd.f32 %v2563_v10, %v2533_v15  ;;  %v3785_v53 = vadd.f32 %v5199_v31, %v2215_v2  ;;  %v2496_v3 = vadd.f32 %v3773_v34, %v2495_v4  ;;  %v3697_v57 = vpop.f32.mrb[94].mxu1 }
 0x1ff   : > { %v3789_v30 = vadd.f32 %v5207_v61, %v3697_v57  ;;  %v2218_v20 = vpop.f32.mrb[95].mxu1  ;;  %v3522_v28 = vpop.f32.mrb[128].mxu0  ;;  %v2537_v22 = vmul.f32 %v3781_v12, %v3781_v12 }
 0x200   : > { %v2497_v24 = vadd.f32 %v3785_v53, %v2496_v3  ;;  %v2535_v39 = vmul.f32 %v3785_v53, %v3785_v53  ;;  %v2565_v25 = vadd.f32 %v2564_v58, %v2534_v1  ;;  %v3793_v37 = vadd.f32 %v5201_v9, %v2218_v20  ;;  %v3523_v62 = vpop.f32.mrb[129].mxu0 }
 0x201   : > { %v3089_v47 = vpack.c.bf16 %v3789_v30, %v3781_v12  ;;  %v3525_v35 = vpop.f32.mrb[130].mxu0  ;;  %v3524_v13 = vadd.f32 %v3523_v62, %v3522_v28  ;;  %v2538_v44 = vmul.f32 %v3789_v30, %v3789_v30 }
 0x202   : > { %v2566_v14 = vadd.f32 %v2565_v25, %v2535_v39  ;;  %v3084_v31 = vpack.c.bf16 %v3793_v37, %v3785_v53  ;;  %v2498_v48 = vadd.f32 %v3793_v37, %v2497_v24  ;;  %v2536_v26 = vmul.f32 %v3793_v37, %v3793_v37  ;;  %v3526_v11 = vpop.f32.mrb[131].mxu0 }
 0x203   : > { %3153 = vst [vmem:[%s5221_s22 + $0x38] sm:$0xff] %v3089_v47   ;;  %v3527_v56 = vadd.f32 %v3526_v11, %v3525_v35  ;;  %v5262_v54 = vadd.f32 %v5097_v40, %v3524_v13 }
 0x204   : > { %3152 = vst [vmem:[%s5221_s22 + $0x30] sm:$0xff] %v3084_v31   ;;  %v2499_v61 = vadd.f32 %v3781_v12, %v2498_v48  ;;  %v2567_v43 = vadd.f32 %v2566_v14, %v2536_v26  ;;  %v3700_v34 = vpop.f32.mrb[0].mxu1 }
 0x205   : > { %v3796_v9 = vadd.f32 %v5227_v45, %v3700_v34  ;;  %v2231_v8 = vpop.f32.mrb[1].mxu1  ;;  %v5266_v19 = vadd.f32 %v5101_v21, %v3527_v56 }
 0x206   : > { %v2568_v17 = vadd.f32 %v2567_v43, %v2537_v22  ;;  %v3799_v41 = vadd.f32 %v5210_v60, %v2231_v8  ;;  %v2500_v23 = vadd.f32 %v3789_v30, %v2499_v61  ;;  %v3701_v16 = vpop.f32.mrb[2].mxu1 }
 0x207   : > { %v3802_v7 = vadd.f32 %v5232_v38, %v3701_v16  ;;  %v2234_v32 = vpop.f32.mrb[3].mxu1  ;;  %v3528_v40 = vpop.f32.mrb[132].mxu0  ;;  %v2541_v12 = vmul.f32 %v3796_v9, %v3796_v9 }
 0x208   : > { %v2501_v49 = vadd.f32 %v3799_v41, %v2500_v23  ;;  %v2539_v33 = vmul.f32 %v3799_v41, %v3799_v41  ;;  %v2569_v45 = vadd.f32 %v2568_v17, %v2538_v44  ;;  %v3805_v46 = vadd.f32 %v5214_v50, %v2234_v32  ;;  %v3529_v15 = vpop.f32.mrb[133].mxu0 }
 0x209   : > { %v3099_v52 = vpack.c.bf16 %v3802_v7, %v3796_v9  ;;  %v3531_v51 = vpop.f32.mrb[134].mxu0  ;;  %v3530_v21 = vadd.f32 %v3529_v15, %v3528_v40  ;;  %v2542_v3 = vmul.f32 %v3802_v7, %v3802_v7 }
 0x20a   : > { %v2570_v4 = vadd.f32 %v2569_v45, %v2539_v33  ;;  %v3094_v60 = vpack.c.bf16 %v3805_v46, %v3799_v41  ;;  %v2502_v10 = vadd.f32 %v3805_v46, %v2501_v49  ;;  %v2540_v6 = vmul.f32 %v3805_v46, %v3805_v46  ;;  %v3532_v1 = vpop.f32.mrb[135].mxu0 }
 0x20b   : > { %3155 = vst [vmem:[%s5221_s22 + $0x48] sm:$0xff] %v3099_v52   ;;  %v3533_v53 = vadd.f32 %v3532_v1, %v3531_v51  ;;  %v3819_v30 = vadd.f32 %v5119_v29, %v3530_v21 }
 0x20c   : > { %3154 = vst [vmem:[%s5221_s22 + $0x40] sm:$0xff] %v3094_v60   ;;  %v2503_v38 = vadd.f32 %v3796_v9, %v2502_v10  ;;  %v2571_v2 = vadd.f32 %v2570_v4, %v2540_v6  ;;  %v3704_v58 = vpop.f32.mrb[4].mxu1 }
 0x20d   : > { %v3808_v57 = vadd.f32 %v3807_v55, %v3704_v58  ;;  %v2247_v50 = vpop.f32.mrb[5].mxu1  ;;  %v3825_v37 = vadd.f32 %v5123_v59, %v3533_v53 }
 0x20e   : > { %v2572_v20 = vadd.f32 %v2571_v2, %v2541_v12  ;;  %v3811_v24 = vadd.f32 %v5240_v63, %v2247_v50  ;;  %v2504_v39 = vadd.f32 %v3802_v7, %v2503_v38  ;;  %v3705_v25 = vpop.f32.mrb[6].mxu1 }
 0x20f   : > { %v3814_v28 = vadd.f32 %v5254_v0, %v3705_v25  ;;  %v2250_v47 = vpop.f32.mrb[7].mxu1  ;;  %v3534_v48 = vpop.f32.mrb[136].mxu0  ;;  %v2545_v43 = vmul.f32 %v3808_v57, %v3808_v57 }
 0x210   : > { %v2505_v62 = vadd.f32 %v3811_v24, %v2504_v39  ;;  %v2543_v14 = vmul.f32 %v3811_v24, %v3811_v24  ;;  %v2573_v31 = vadd.f32 %v2572_v20, %v2542_v3  ;;  %v3817_v55 = vadd.f32 %v5244_v5, %v2250_v47  ;;  %v3535_v29 = vpop.f32.mrb[137].mxu0 }
 0x211   : > { %v3109_v26 = vpack.c.bf16 %v3814_v28, %v3808_v57  ;;  %v3537_v22 = vpop.f32.mrb[138].mxu0  ;;  %v3536_v61 = vadd.f32 %v3535_v29, %v3534_v48  ;;  %v2546_v9 = vmul.f32 %v3814_v28, %v3814_v28 }
 0x212   : > { %v2574_v35 = vadd.f32 %v2573_v31, %v2543_v14  ;;  %v3104_v13 = vpack.c.bf16 %v3817_v55, %v3811_v24  ;;  %v2506_v63 = vadd.f32 %v3817_v55, %v2505_v62  ;;  %v2544_v11 = vmul.f32 %v3817_v55, %v3817_v55  ;;  %v3538_v59 = vpop.f32.mrb[139].mxu0 }
 0x213   : > { %3157 = vst [vmem:[%s5221_s22 + $0x58] sm:$0xff] %v3109_v26   ;;  %v3539_v44 = vadd.f32 %v3538_v59, %v3537_v22  ;;  %v3834_v17 = vadd.f32 %v5141_v18, %v3536_v61 }
 0x214   : > { %3156 = vst [vmem:[%s5221_s22 + $0x50] sm:$0xff] %v3104_v13   ;;  %v2507_v0 = vadd.f32 %v3808_v57, %v2506_v63  ;;  %v2575_v34 = vadd.f32 %v2574_v35, %v2544_v11  ;;  %v3708_v56 = vpop.f32.mrb[8].mxu1 }
 0x215   : > { %v3820_v8 = vadd.f32 %v3819_v30, %v3708_v56  ;;  %v2263_v5 = vpop.f32.mrb[9].mxu1  ;;  %v3840_v32 = vadd.f32 %v5145_v27, %v3539_v44 }
 0x216   : > { %v2576_v41 = vadd.f32 %v2575_v34, %v2545_v43  ;;  %v3823_v23 = vadd.f32 %v5262_v54, %v2263_v5  ;;  %v2508_v16 = vadd.f32 %v3814_v28, %v2507_v0  ;;  %v3709_v7 = vpop.f32.mrb[10].mxu1 }
 0x217   : > { %v3826_v49 = vadd.f32 %v3825_v37, %v3709_v7  ;;  %v2266_v33 = vpop.f32.mrb[11].mxu1  ;;  %v3540_v15 = vpop.f32.mrb[140].mxu0  ;;  %v2549_v27 = vmul.f32 %v3820_v8, %v3820_v8 }
 0x218   : > { %v2509_v45 = vadd.f32 %v3823_v23, %v2508_v16  ;;  %v2547_v46 = vmul.f32 %v3823_v23, %v3823_v23  ;;  %v2577_v40 = vadd.f32 %v2576_v41, %v2546_v9  ;;  %v3829_v52 = vadd.f32 %v5266_v19, %v2266_v33  ;;  %v3541_v60 = vpop.f32.mrb[141].mxu0 }
 0x219   : > { %v3119_v4 = vpack.c.bf16 %v3826_v49, %v3820_v8  ;;  %v3543_v51 = vpop.f32.mrb[142].mxu0  ;;  %v3542_v21 = vadd.f32 %v3541_v60, %v3540_v15  ;;  %v2550_v53 = vmul.f32 %v3826_v49, %v3826_v49 }
 0x21a   : > { %v2578_v18 = vadd.f32 %v2577_v40, %v2547_v46  ;;  %v3114_v10 = vpack.c.bf16 %v3829_v52, %v3823_v23  ;;  %v2510_v6 = vadd.f32 %v3829_v52, %v2509_v45  ;;  %v2548_v54 = vmul.f32 %v3829_v52, %v3829_v52  ;;  %v3544_v1 = vpop.f32.mrb[143].mxu0 }
 0x21b   : > { %3159 = vst [vmem:[%s5221_s22 + $0x68] sm:$0xff] %v3119_v4   ;;  %v3545_v58 = vadd.f32 %v3544_v1, %v3543_v51  ;;  %v3831_v19 = vadd.f32 %v5161_v42, %v3542_v21 }
 0x21c   : > { %3158 = vst [vmem:[%s5221_s22 + $0x60] sm:$0xff] %v3114_v10   ;;  %v2511_v12 = vadd.f32 %v3820_v8, %v2510_v6  ;;  %v2579_v38 = vadd.f32 %v2578_v18, %v2548_v54  ;;  %v3712_v2 = vpop.f32.mrb[12].mxu1 }
 0x21d   : > { %v2279_v3 = vpop.f32.mrb[13].mxu1  ;;  %v3837_v24 = vadd.f32 %v5164_v36, %v3545_v58  ;;  %v3832_v39 = vadd.f32 %v3831_v19, %v3712_v2 }
 0x21e   : > { %v2580_v57 = vadd.f32 %v2579_v38, %v2549_v27  ;;  %v3835_v50 = vadd.f32 %v3834_v17, %v2279_v3  ;;  %v2512_v30 = vadd.f32 %v3826_v49, %v2511_v12  ;;  %v3713_v20 = vpop.f32.mrb[14].mxu1 }
 0x21f   : > { %v2282_v25 = vpop.f32.mrb[15].mxu1  ;;  %v3838_v62 = vadd.f32 %v3837_v24, %v3713_v20  ;;  %v2553_v48 = vmul.f32 %v3832_v39, %v3832_v39 }
 0x220   : > { %v2513_v37 = vadd.f32 %v3835_v50, %v2512_v30  ;;  %v2551_v28 = vmul.f32 %v3835_v50, %v3835_v50  ;;  %v2581_v47 = vadd.f32 %v2580_v57, %v2550_v53  ;;  %v3841_v14 = vadd.f32 %v3840_v32, %v2282_v25 }
 0x221   : > { %v3129_v55 = vpack.c.bf16 %v3838_v62, %v3832_v39  ;;  %v2554_v35 = vmul.f32 %v3838_v62, %v3838_v62 }
 0x222   : > { %v2582_v31 = vadd.f32 %v2581_v47, %v2551_v28  ;;  %v3124_v42 = vpack.c.bf16 %v3841_v14, %v3835_v50  ;;  %v2514_v26 = vadd.f32 %v3841_v14, %v2513_v37  ;;  %v2552_v29 = vmul.f32 %v3841_v14, %v3841_v14 }
 0x223   : > { %3161 = vst [vmem:[%s5221_s22 + $0x78] sm:$0xff] %v3129_v55  }
 0x224   : > { %3160 = vst [vmem:[%s5221_s22 + $0x70] sm:$0xff] %v3124_v42   ;;  %v2515_v13 = vadd.f32 %v3832_v39, %v2514_v26  ;;  %v2583_v36 = vadd.f32 %v2582_v31, %v2552_v29 }
 0x226   : > { %v2516_v63 = vadd.f32 %v3838_v62, %v2515_v13  ;;  %v2584_v11 = vadd.f32 %v2583_v36, %v2553_v48 }
 0x228   : > { %v2517_v22 = vrot.slane %v2516_v63, 4  ;;  %v2585_v61 = vadd.f32 %v2584_v11, %v2554_v35 }
 0x22a   : > { %v2518_v59 = vadd.f32 %v2517_v22, %v2516_v63  ;;  %v2586_v43 = vrot.slane %v2585_v61, 4 }
 0x22c   : > { %v2519_v0 = vrot.slane %v2518_v59, 2  ;;  %v2587_v34 = vadd.f32 %v2586_v43, %v2585_v61 }
 0x22e   : > { %v2520_v56 = vadd.f32 %v2519_v0, %v2518_v59  ;;  %v2588_v44 = vrot.slane %v2587_v34, 2 }
 0x230   : > { %v2521_v9 = vrot.slane %v2520_v56, 1  ;;  %v2589_v8 = vadd.f32 %v2588_v44, %v2587_v34 }
 0x232   : > { %v2590_v5 = vrot.slane %v2589_v8, 1  ;;  %v2522_v17 = vadd.f32 %v2521_v9, %v2520_v56 }
 0x234   : > { %v2591_v41 = vadd.f32 %v2590_v5, %v2589_v8 }
 0x236   : > { %v2593_v23 = vsel %vm638_vm2, %v2522_v17, %v2591_v41 }
 0x237   : > { %2594 = vst [vmem:[%s268_s26] sm:$0x3] %v2593_v23 }
 0x238 PF: > { %s16_s20 = sadd.s32 1, %s4010_s20   ;;  %s5337_s18 = smov %s4006_s19 }
 0x239   : > { %p13_p5 = scmp.ge.s32.totalorder %s16_s20, 4   ;;  %s5338_s19 = smov %s5340_s21 }
 0x23b   :  { %15 = sbr.rel (!%p13_p5) target bundleno = 2 (0x2), region = 83 }

</bundles_post_ra>
